<compile_context>
chip_gen: v7x
topology: tpu7x:2x2x1
jax: 0.10.0
libtpu: 0.0.40
codegen_flags: <defaults>
</compile_context>

<pallas_src>
import functools
import math

import jax
import jax.numpy as jnp
from jax import lax
from jax.experimental import pallas as pl
from jax.experimental.pallas import tpu as pltpu

# Small-but-consistent configuration (original module: d_model=256, 12 layers, 53x53=2809 edges).
D_MODEL = 32          # divisible by 8 (4 heads; pos-embedding split into quarters)
HEADS = 4
NUM_LAYERS = 12
EPS = 1e-5            # nn.InstanceNorm1d default eps
HEAD_PAD = 8          # width of the fused output-head slab (cols 0:2 edges, col 2 lambda)
VMEM_LIMIT = 32 * 1024 * 1024


# ----------------------------- fused transformer stack + output heads -----------------------------

def _stack_kernel(edges0_ref, gcol_ref, grow_ref, bbm_ref, bb_ref,
                  wqkv_ref, bqkv_ref, wos_ref, bos_ref,
                  wqc_ref, bqc_ref, wkvc_ref, bkvc_ref, woc_ref, boc_ref,
                  w1_ref, b1_ref, w2_ref, b2_ref,
                  we_ref, be_ref, l1w_ref, l1b_ref, l2w_ref, l2b_ref, l3w_ref, l3b_ref,
                  heads_ref):
    _, E, D = edges0_ref.shape
    M = bb_ref.shape[1]
    dh = D // HEADS
    nlayers = wqkv_ref.shape[0]
    scale = 1.0 / math.sqrt(dh)

    x0 = edges0_ref[...].reshape(E, D)
    bb = bb_ref[...].reshape(M, D)
    g_col = gcol_ref[...].reshape(E, 1)        # (E, 1) 0/1 edge mask
    g_row = grow_ref[...].reshape(1, E)        # (1, E)
    bbm_row = bbm_ref[...].reshape(1, M)       # (1, M) bb padding mask

    # Additive masks: identical for every head and every layer -> build once.
    # (mask - 1) * 1e9  ==  0 where attention is allowed, -1e9 where masked.
    add_self = (g_col * g_row - 1.0) * 1e9     # (E, E)
    add_cross = (g_col * bbm_row - 1.0) * 1e9  # (E, M)

    def inorm(t):
        # InstanceNorm1d as executed by the reference on (B, E, D): per-edge stats over D.
        mu = jnp.mean(t, axis=-1, keepdims=True)
        c = t - mu
        var = jnp.mean(c * c, axis=-1, keepdims=True)
        return c * lax.rsqrt(var + EPS)

    def mha(q, k, v, add_mask, wo, bo):
        hs = []
        for h in range(HEADS):
            sl = slice(h * dh, (h + 1) * dh)
            s = lax.dot_general(q[:, sl], k[:, sl], (((1,), (1,)), ((), ())),
                                preferred_element_type=jnp.float32) * scale + add_mask
            s = s - jnp.max(s, axis=-1, keepdims=True)
            p = jnp.exp(s)
            p = p * pl.reciprocal(jnp.sum(p, axis=-1, keepdims=True), approx=True)
            hs.append(jnp.dot(p, v[:, sl], preferred_element_type=jnp.float32))   # (Lq, dh)
        concat = jnp.concatenate(hs, axis=-1)                                     # (Lq, D)
        return jnp.dot(concat, wo, preferred_element_type=jnp.float32) + bo       # one D-wide proj

    def layer_body(l, x):
        # --- global (self) attention over edges ---
        xn = inorm(x)
        qkv = jnp.dot(xn, wqkv_ref[l], preferred_element_type=jnp.float32) + bqkv_ref[l]
        x = x + mha(qkv[:, 0:D], qkv[:, D:2 * D], qkv[:, 2 * D:], add_self,
                    wos_ref[l], bos_ref[l])

        # --- cross attention edges <- bb semantics ---
        xn = inorm(x)
        q2 = jnp.dot(xn, wqc_ref[l], preferred_element_type=jnp.float32) + bqc_ref[l]
        kv = jnp.dot(bb, wkvc_ref[l], preferred_element_type=jnp.float32) + bkvc_ref[l]
        x = x + mha(q2, kv[:, 0:D], kv[:, D:], add_cross, woc_ref[l], boc_ref[l])

        # --- feed forward ---
        xn = inorm(x)
        ff = jnp.dot(xn, w1_ref[l], preferred_element_type=jnp.float32) + b1_ref[l]
        ff = jnp.maximum(ff, 0.0)
        x = x + jnp.dot(ff, w2_ref[l], preferred_element_type=jnp.float32) + b2_ref[l]
        return x

    x = lax.fori_loop(0, nlayers, layer_body, x0)

    # --- fused output heads, emitted as one lane-dense (E, HEAD_PAD) slab ---
    oe = jnp.dot(x, we_ref[...], preferred_element_type=jnp.float32) + be_ref[...]     # cols 0:2
    h1 = jnp.dot(x, l1w_ref[...], preferred_element_type=jnp.float32) + l1b_ref[...]
    h1 = h1 * jax.nn.sigmoid(h1)
    h2 = jnp.dot(h1, l2w_ref[...], preferred_element_type=jnp.float32) + l2b_ref[...]
    h2 = h2 * jax.nn.sigmoid(h2)
    ol = jnp.dot(h2, l3w_ref[...], preferred_element_type=jnp.float32) + l3b_ref[...]   # col 2
    heads_ref[...] = (oe + ol).reshape(1, E, HEAD_PAD)


def transformer_and_heads(edges, g, bbm, bb_emb, params):
    """edges: (B,E,D); g: (B,E) 0/1; bbm: (B,M) 0/1; bb_emb: (B,M,D)."""
    B, E, D = edges.shape
    M = bb_emb.shape[1]
    lp = params["layers"]

    g_col = g.reshape(B, E, 1)
    g_row = g.reshape(B, 1, E)
    bbm_row = bbm.reshape(B, 1, M)

    def batch_spec(shape):
        return pl.BlockSpec((1,) + tuple(shape[1:]),
                            lambda b, _n=len(shape): (b,) + (0,) * (_n - 1))

    def full_spec(arr):
        return pl.BlockSpec(arr.shape, lambda b, _n=arr.ndim: (0,) * _n)

    batch_args = [edges, g_col, g_row, bbm_row, bb_emb]
    weight_args = [
        lp["wqkv"], lp["bqkv"], lp["wo_sa"], lp["bo_sa"],
        lp["wq_ca"], lp["bq_ca"], lp["wkv_ca"], lp["bkv_ca"], lp["wo_ca"], lp["bo_ca"],
        lp["w1"], lp["b1"], lp["w2"], lp["b2"],
        params["edges_w_p"], params["edges_b_p"],
        params["lam1_w"], params["lam1_b"], params["lam2_w"], params["lam2_b"],
        params["lam3_w_p"], params["lam3_b_p"],
    ]

    heads = pl.pallas_call(
        _stack_kernel,
        out_shape=jax.ShapeDtypeStruct((B, E, HEAD_PAD), jnp.float32),
        grid=(B,),
        in_specs=[batch_spec(a.shape) for a in batch_args]
                 + [full_spec(a) for a in weight_args],   # weights stay VMEM-resident (index 0)
        out_specs=pl.BlockSpec((1, E, HEAD_PAD), lambda b: (b, 0, 0)),
        compiler_params=pltpu.CompilerParams(
            dimension_semantics=("parallel",), vmem_limit_bytes=VMEM_LIMIT),
    )(*batch_args, *weight_args)
    return heads


# ----------------------------- full forward -----------------------------

@jax.jit
def topo_edge_forward(params, corners, global_attn_matrix, corners_padding_mask,
                      semantics, bb_semantics_embedding, bb_semantics_padding_mask, rng):
    # corners_padding_mask is unused in the reference forward; kept for signature parity.
    del corners_padding_mask
    B, N, _ = corners.shape
    E = N * N
    mask_flat = global_attn_matrix.reshape(B, E, 1).astype(jnp.float32)

    c1 = jnp.broadcast_to(corners[:, :, None, :], (B, N, N, 2)).reshape(B, E, 2)
    c2 = jnp.broadcast_to(corners[:, None, :, :], (B, N, N, 2)).reshape(B, E, 2)
    edge_coords1 = (c1 * 128.0 + 128.0) * mask_flat
    edge_coords2 = (c2 * 128.0 + 128.0) * mask_flat
    s1 = jnp.broadcast_to(semantics[:, :, None, :], (B, N, N, 7)).reshape(B, E, 7) * mask_flat
    s2 = jnp.broadcast_to(semantics[:, None, :, :], (B, N, N, 7)).reshape(B, E, 7) * mask_flat

    # torch.rand inside forward -> explicit JAX key (deterministic).
    random_lambda = jax.random.uniform(rng, (B, E, 1), jnp.float32)
    edge_coords3 = edge_coords1 * random_lambda + edge_coords2 * (1.0 - random_lambda)

    quarter = D_MODEL // 4
    div_term = (1.0 / 10000.0) ** (jnp.arange(0, quarter, 2, dtype=jnp.float32) / quarter)

    def pos_features(coords):  # (B, E, 2) -> (B, E, D_MODEL // 2) interleaved sin/cos
        def interleaved(c):    # c: (B, E, 1)
            arg = c * div_term[None, None, :]
            return jnp.stack([jnp.sin(arg), jnp.cos(arg)], axis=3).reshape(B, E, -1)
        return jnp.concatenate([interleaved(coords[:, :, 0:1]),
                                interleaved(coords[:, :, 1:2])], axis=2)

    pos_sum = (pos_features(edge_coords1) + pos_features(edge_coords2)
               + pos_features(edge_coords3))

    # semantics_embedding(s1) + semantics_embedding(s2) + semantics_embedding(zeros)
    #   == (s1 + s2) @ W + 3*b   (tiny 7->D/2 matmul: plain jnp, XLA fuses it).
    sem_sum = (jnp.einsum("bef,fd->bed", s1 + s2, params["sem_w"])
               + 3.0 * params["sem_b"].reshape(1, 1, -1))

    edges_embedding = jnp.concatenate([pos_sum, sem_sum], axis=2)

    # 0/1 mask vectors; the (E,E)/(E,M) attention masks are formed in-kernel (never in HBM).
    g = global_attn_matrix.reshape(B, E).astype(jnp.float32)
    bbm = bb_semantics_padding_mask.reshape(B, -1).astype(jnp.float32)

    heads = transformer_and_heads(edges_embedding, g, bbm,
                                  bb_semantics_embedding.astype(jnp.float32), params)
    output_edges = heads[:, :, 0:2]
    output_lambdas = heads[:, :, 2:3]
    return output_edges, random_lambda, output_lambdas


# ----------------------------- parameter init -----------------------------

def _init_linear(key, fan_in, fan_out):
    kw, kb = jax.random.split(key)
    bound = 1.0 / math.sqrt(fan_in)
    w = jax.random.uniform(kw, (fan_in, fan_out), jnp.float32, -bound, bound)
    b = jax.random.uniform(kb, (fan_out,), jnp.float32, -bound, bound)
    return w, b


def init_params(key):
    keys = iter(jax.random.split(key, 512))

    def lin(fi, fo):
        return _init_linear(next(keys), fi, fo)

    D = D_MODEL
    names = ["wqkv", "bqkv", "wo_sa", "bo_sa", "wq_ca", "bq_ca",
             "wkv_ca", "bkv_ca", "wo_ca", "bo_ca", "w1", "b1", "w2", "b2"]
    stacks = {k: [] for k in names}
    for _ in range(NUM_LAYERS):
        wq, bq = lin(D, D); wk, bk = lin(D, D); wv, bv = lin(D, D); wf, bf = lin(D, D)
        stacks["wqkv"].append(jnp.concatenate([wq, wk, wv], axis=1))
        stacks["bqkv"].append(jnp.concatenate([bq, bk, bv]).reshape(1, 3 * D))
        stacks["wo_sa"].append(wf); stacks["bo_sa"].append(bf.reshape(1, D))

        wq2, bq2 = lin(D, D); wk2, bk2 = lin(D, D); wv2, bv2 = lin(D, D); wf2, bf2 = lin(D, D)
        stacks["wq_ca"].append(wq2); stacks["bq_ca"].append(bq2.reshape(1, D))
        stacks["wkv_ca"].append(jnp.concatenate([wk2, wv2], axis=1))
        stacks["bkv_ca"].append(jnp.concatenate([bk2, bv2]).reshape(1, 2 * D))
        stacks["wo_ca"].append(wf2); stacks["bo_ca"].append(bf2.reshape(1, D))

        w1, b1 = lin(D, 4 * D); w2, b2 = lin(4 * D, D)
        stacks["w1"].append(w1); stacks["b1"].append(b1.reshape(1, 4 * D))
        stacks["w2"].append(w2); stacks["b2"].append(b2.reshape(1, D))

    layers = {k: jnp.stack(v, axis=0) for k, v in stacks.items()}

    sem_w, sem_b = lin(7, D // 2)
    ew, eb = lin(D, 2)
    l1w, l1b = lin(D, D); l2w, l2b = lin(D, D); l3w, l3b = lin(D, 1)

    # Output-head weights packed into HEAD_PAD-wide slabs: cols 0:2 edges_MLP, col 2 lambdas_MLP
    # final layer (padded columns are zero; the kernel sums the two slabs).
    edges_w_p = jnp.zeros((D, HEAD_PAD), jnp.float32).at[:, 0:2].set(ew)
    edges_b_p = jnp.zeros((1, HEAD_PAD), jnp.float32).at[:, 0:2].set(eb.reshape(1, 2))
    lam3_w_p = jnp.zeros((D, HEAD_PAD), jnp.float32).at[:, 2:3].set(l3w)
    lam3_b_p = jnp.zeros((1, HEAD_PAD), jnp.float32).at[:, 2:3].set(l3b.reshape(1, 1))

    return dict(layers=layers,
                sem_w=sem_w, sem_b=sem_b,
                edges_w_p=edges_w_p, edges_b_p=edges_b_p,
                lam1_w=l1w, lam1_b=l1b.reshape(1, D),
                lam2_w=l2w, lam2_b=l2b.reshape(1, D),
                lam3_w_p=lam3_w_p, lam3_b_p=lam3_b_p)


# ----------------------------- main -----------------------------

if __name__ == "__main__":
    key = jax.random.PRNGKey(0)
    kp, kc, kg, ks, kbe, kbm, kl = jax.random.split(key, 7)

    B, N, M = 2, 8, 8            # batch, corners-per-sample, bb tokens (E = N*N = 64 edges)
    E = N * N

    params = init_params(kp)
    corners = jax.random.uniform(kc, (B, N, 2), jnp.float32, -1.0, 1.0)
    global_attn_matrix = jax.random.bernoulli(kg, 0.7, (B, N, N))          # bool
    corners_padding_mask = jnp.ones((B, N, 1), jnp.float32)                # unused (matches PyTorch)
    semantics = jax.random.uniform(ks, (B, N, 7), jnp.float32)
    bb_semantics_embedding = jax.random.normal(kbe, (B, M, D_MODEL), jnp.float32)
    bb_semantics_padding_mask = jax.random.bernoulli(kbm, 0.8, (B, M, 1))  # bool

    out_edges, rand_lambda, out_lambdas = topo_edge_forward(
        params, corners, global_attn_matrix, corners_padding_mask, semantics,
        bb_semantics_embedding, bb_semantics_padding_mask, kl)

    jax.block_until_ready((out_edges, rand_lambda, out_lambdas))
    assert out_edges.shape == (B, E, 2)
    assert rand_lambda.shape == (B, E, 1)
    assert out_lambdas.shape == (B, E, 1)
    assert jnp.all(jnp.isfinite(out_edges)) and jnp.all(jnp.isfinite(out_lambdas))
    print("KERNEL_OK")
</pallas_src>

<mosaic_0001>
module attributes {stable_mosaic.version = 11 : i64} {
  func.func @_stack_kernel(%arg0: i32, %arg1: memref<1x64x32xf32, #tpu.memory_space<vmem>>, %arg2: memref<1x64x1xf32, #tpu.memory_space<vmem>>, %arg3: memref<1x1x64xf32, #tpu.memory_space<vmem>>, %arg4: memref<1x1x8xf32, #tpu.memory_space<vmem>>, %arg5: memref<1x8x32xf32, #tpu.memory_space<vmem>>, %arg6: memref<12x32x96xf32, #tpu.memory_space<vmem>>, %arg7: memref<12x1x96xf32, #tpu.memory_space<vmem>>, %arg8: memref<12x32x32xf32, #tpu.memory_space<vmem>>, %arg9: memref<12x1x32xf32, #tpu.memory_space<vmem>>, %arg10: memref<12x32x32xf32, #tpu.memory_space<vmem>>, %arg11: memref<12x1x32xf32, #tpu.memory_space<vmem>>, %arg12: memref<12x32x64xf32, #tpu.memory_space<vmem>>, %arg13: memref<12x1x64xf32, #tpu.memory_space<vmem>>, %arg14: memref<12x32x32xf32, #tpu.memory_space<vmem>>, %arg15: memref<12x1x32xf32, #tpu.memory_space<vmem>>, %arg16: memref<12x32x128xf32, #tpu.memory_space<vmem>>, %arg17: memref<12x1x128xf32, #tpu.memory_space<vmem>>, %arg18: memref<12x128x32xf32, #tpu.memory_space<vmem>>, %arg19: memref<12x1x32xf32, #tpu.memory_space<vmem>>, %arg20: memref<32x8xf32, #tpu.memory_space<vmem>>, %arg21: memref<1x8xf32, #tpu.memory_space<vmem>>, %arg22: memref<32x32xf32, #tpu.memory_space<vmem>>, %arg23: memref<1x32xf32, #tpu.memory_space<vmem>>, %arg24: memref<32x32xf32, #tpu.memory_space<vmem>>, %arg25: memref<1x32xf32, #tpu.memory_space<vmem>>, %arg26: memref<32x8xf32, #tpu.memory_space<vmem>>, %arg27: memref<1x8xf32, #tpu.memory_space<vmem>>, %arg28: memref<1x64x8xf32, #tpu.memory_space<vmem>>) attributes {dimension_semantics = [#tpu.dimension_semantics<parallel>], iteration_bounds = array<i64: 2>, scalar_prefetch = 0 : i64, scratch_operands = 0 : i64, tpu.core_type = #tpu.core_type<tc>, window_params = [{transform_indices = @transform_0, window_bounds = array<i64: 1, 64, 32>}, {transform_indices = @transform_1, window_bounds = array<i64: 1, 64, 1>}, {transform_indices = @transform_2, window_bounds = array<i64: 1, 1, 64>}, {transform_indices = @transform_3, window_bounds = array<i64: 1, 1, 8>}, {transform_indices = @transform_4, window_bounds = array<i64: 1, 8, 32>}, {pipeline_mode = #tpu.pipeline_mode<synchronous>, transform_indices = @transform_5, window_bounds = array<i64: 12, 32, 96>}, {pipeline_mode = #tpu.pipeline_mode<synchronous>, transform_indices = @transform_6, window_bounds = array<i64: 12, 1, 96>}, {pipeline_mode = #tpu.pipeline_mode<synchronous>, transform_indices = @transform_7, window_bounds = array<i64: 12, 32, 32>}, {pipeline_mode = #tpu.pipeline_mode<synchronous>, transform_indices = @transform_8, window_bounds = array<i64: 12, 1, 32>}, {pipeline_mode = #tpu.pipeline_mode<synchronous>, transform_indices = @transform_9, window_bounds = array<i64: 12, 32, 32>}, {pipeline_mode = #tpu.pipeline_mode<synchronous>, transform_indices = @transform_10, window_bounds = array<i64: 12, 1, 32>}, {pipeline_mode = #tpu.pipeline_mode<synchronous>, transform_indices = @transform_11, window_bounds = array<i64: 12, 32, 64>}, {pipeline_mode = #tpu.pipeline_mode<synchronous>, transform_indices = @transform_12, window_bounds = array<i64: 12, 1, 64>}, {pipeline_mode = #tpu.pipeline_mode<synchronous>, transform_indices = @transform_13, window_bounds = array<i64: 12, 32, 32>}, {pipeline_mode = #tpu.pipeline_mode<synchronous>, transform_indices = @transform_14, window_bounds = array<i64: 12, 1, 32>}, {pipeline_mode = #tpu.pipeline_mode<synchronous>, transform_indices = @transform_15, window_bounds = array<i64: 12, 32, 128>}, {pipeline_mode = #tpu.pipeline_mode<synchronous>, transform_indices = @transform_16, window_bounds = array<i64: 12, 1, 128>}, {pipeline_mode = #tpu.pipeline_mode<synchronous>, transform_indices = @transform_17, window_bounds = array<i64: 12, 128, 32>}, {pipeline_mode = #tpu.pipeline_mode<synchronous>, transform_indices = @transform_18, window_bounds = array<i64: 12, 1, 32>}, {pipeline_mode = #tpu.pipeline_mode<synchronous>, transform_indices = @transform_19, window_bounds = array<i64: 32, 8>}, {pipeline_mode = #tpu.pipeline_mode<synchronous>, transform_indices = @transform_20, window_bounds = array<i64: 1, 8>}, {pipeline_mode = #tpu.pipeline_mode<synchronous>, transform_indices = @transform_21, window_bounds = array<i64: 32, 32>}, {pipeline_mode = #tpu.pipeline_mode<synchronous>, transform_indices = @transform_22, window_bounds = array<i64: 1, 32>}, {pipeline_mode = #tpu.pipeline_mode<synchronous>, transform_indices = @transform_23, window_bounds = array<i64: 32, 32>}, {pipeline_mode = #tpu.pipeline_mode<synchronous>, transform_indices = @transform_24, window_bounds = array<i64: 1, 32>}, {pipeline_mode = #tpu.pipeline_mode<synchronous>, transform_indices = @transform_25, window_bounds = array<i64: 32, 8>}, {pipeline_mode = #tpu.pipeline_mode<synchronous>, transform_indices = @transform_26, window_bounds = array<i64: 1, 8>}, {transform_indices = @transform_27, window_bounds = array<i64: 1, 64, 8>}]} {
    %c0 = arith.constant 0 : index
    %c0_0 = arith.constant 0 : index
    %c0_1 = arith.constant 0 : index
    %0 = vector.load %arg1[%c0, %c0_0, %c0_1] : memref<1x64x32xf32, #tpu.memory_space<vmem>>, vector<1x64x32xf32>
    %1 = vector.shape_cast %0 : vector<1x64x32xf32> to vector<64x32xf32>
    %c0_2 = arith.constant 0 : index
    %c0_3 = arith.constant 0 : index
    %c0_4 = arith.constant 0 : index
    %2 = vector.load %arg5[%c0_2, %c0_3, %c0_4] : memref<1x8x32xf32, #tpu.memory_space<vmem>>, vector<1x8x32xf32>
    %3 = vector.shape_cast %2 : vector<1x8x32xf32> to vector<8x32xf32>
    %c0_5 = arith.constant 0 : index
    %c0_6 = arith.constant 0 : index
    %c0_7 = arith.constant 0 : index
    %4 = vector.load %arg2[%c0_5, %c0_6, %c0_7] : memref<1x64x1xf32, #tpu.memory_space<vmem>>, vector<1x64x1xf32>
    %5 = vector.shape_cast %4 : vector<1x64x1xf32> to vector<64x1xf32>
    %c0_8 = arith.constant 0 : index
    %c0_9 = arith.constant 0 : index
    %c0_10 = arith.constant 0 : index
    %6 = vector.load %arg3[%c0_8, %c0_9, %c0_10] : memref<1x1x64xf32, #tpu.memory_space<vmem>>, vector<1x1x64xf32>
    %7 = vector.shape_cast %6 : vector<1x1x64xf32> to vector<1x64xf32>
    %c0_11 = arith.constant 0 : index
    %c0_12 = arith.constant 0 : index
    %c0_13 = arith.constant 0 : index
    %8 = vector.load %arg4[%c0_11, %c0_12, %c0_13] : memref<1x1x8xf32, #tpu.memory_space<vmem>>, vector<1x1x8xf32>
    %9 = vector.shape_cast %8 : vector<1x1x8xf32> to vector<1x8xf32>
    %10 = vector.broadcast %5 : vector<64x1xf32> to vector<64x64xf32>
    %11 = vector.broadcast %7 : vector<1x64xf32> to vector<64x64xf32>
    %12 = arith.mulf %10, %11 : vector<64x64xf32>
    %cst = arith.constant 1.000000e+00 : f32
    %13 = vector.broadcast %cst : f32 to vector<64x64xf32>
    %14 = arith.subf %12, %13 : vector<64x64xf32>
    %cst_14 = arith.constant 1.000000e+09 : f32
    %15 = vector.broadcast %cst_14 : f32 to vector<64x64xf32>
    %16 = arith.mulf %14, %15 : vector<64x64xf32>
    %17 = vector.broadcast %5 : vector<64x1xf32> to vector<64x8xf32>
    %18 = vector.broadcast %9 : vector<1x8xf32> to vector<64x8xf32>
    %19 = arith.mulf %17, %18 : vector<64x8xf32>
    %cst_15 = arith.constant 1.000000e+00 : f32
    %20 = vector.broadcast %cst_15 : f32 to vector<64x8xf32>
    %21 = arith.subf %19, %20 : vector<64x8xf32>
    %cst_16 = arith.constant 1.000000e+09 : f32
    %22 = vector.broadcast %cst_16 : f32 to vector<64x8xf32>
    %23 = arith.mulf %21, %22 : vector<64x8xf32>
    %c0_i32 = arith.constant 0 : i32
    %c12_i32 = arith.constant 12 : i32
    %24 = arith.addi %c0_i32, %c12_i32 : i32
    %c1_i32 = arith.constant 1 : i32
    %25 = scf.for %arg29 = %c0_i32 to %24 step %c1_i32 iter_args(%arg30 = %1) -> (vector<64x32xf32>)  : i32 {
      %cst_43 = arith.constant dense<0.000000e+00> : vector<64xf32>
      %61 = vector.multi_reduction <add>, %arg30, %cst_43 [1] : vector<64x32xf32> to vector<64xf32>
      %62 = vector.shape_cast %61 : vector<64xf32> to vector<64x1xf32>
      %cst_44 = arith.constant 3.200000e+01 : f32
      %63 = vector.broadcast %cst_44 : f32 to vector<64x1xf32>
      %64 = arith.divf %62, %63 : vector<64x1xf32>
      %65 = vector.broadcast %64 : vector<64x1xf32> to vector<64x32xf32>
      %66 = arith.subf %arg30, %65 : vector<64x32xf32>
      %67 = arith.mulf %66, %66 : vector<64x32xf32>
      %cst_45 = arith.constant dense<0.000000e+00> : vector<64xf32>
      %68 = vector.multi_reduction <add>, %67, %cst_45 [1] : vector<64x32xf32> to vector<64xf32>
      %69 = vector.shape_cast %68 : vector<64xf32> to vector<64x1xf32>
      %cst_46 = arith.constant 3.200000e+01 : f32
      %70 = vector.broadcast %cst_46 : f32 to vector<64x1xf32>
      %71 = arith.divf %69, %70 : vector<64x1xf32>
      %cst_47 = arith.constant 9.99999974E-6 : f32
      %72 = vector.broadcast %cst_47 : f32 to vector<64x1xf32>
      %73 = arith.addf %71, %72 : vector<64x1xf32>
      %74 = math.rsqrt %73 : vector<64x1xf32>
      %75 = vector.broadcast %74 : vector<64x1xf32> to vector<64x32xf32>
      %76 = arith.mulf %66, %75 : vector<64x32xf32>
      %77 = arith.index_cast %arg29 : i32 to index
      %c0_48 = arith.constant 0 : index
      %c0_49 = arith.constant 0 : index
      %78 = vector.load %arg6[%77, %c0_48, %c0_49] : memref<12x32x96xf32, #tpu.memory_space<vmem>>, vector<1x32x96xf32>
      %79 = vector.shape_cast %78 : vector<1x32x96xf32> to vector<32x96xf32>
      %cst_50 = arith.constant dense<0.000000e+00> : vector<64x96xf32>
      %80 = tpu.matmul %76, %79, %cst_50 {dimension_numbers = #tpu.dot_dimension_numbers<[1], [0], [0], [1], [0, 0, 1, 1], [], []>} : vector<64x32xf32>, vector<32x96xf32>, vector<64x96xf32> -> vector<64x96xf32>
      %81 = arith.index_cast %arg29 : i32 to index
      %c0_51 = arith.constant 0 : index
      %c0_52 = arith.constant 0 : index
      %82 = vector.load %arg7[%81, %c0_51, %c0_52] : memref<12x1x96xf32, #tpu.memory_space<vmem>>, vector<1x1x96xf32>
      %83 = vector.shape_cast %82 : vector<1x1x96xf32> to vector<1x96xf32>
      %84 = vector.broadcast %83 : vector<1x96xf32> to vector<64x96xf32>
      %85 = arith.addf %80, %84 : vector<64x96xf32>
      %86 = vector.extract_strided_slice %85 {offsets = [0, 0], sizes = [64, 32], strides = [1, 1]} : vector<64x96xf32> to vector<64x32xf32>
      %87 = vector.extract_strided_slice %85 {offsets = [0, 32], sizes = [64, 32], strides = [1, 1]} : vector<64x96xf32> to vector<64x32xf32>
      %88 = vector.extract_strided_slice %85 {offsets = [0, 64], sizes = [64, 32], strides = [1, 1]} : vector<64x96xf32> to vector<64x32xf32>
      %89 = arith.index_cast %arg29 : i32 to index
      %c0_53 = arith.constant 0 : index
      %c0_54 = arith.constant 0 : index
      %90 = vector.load %arg8[%89, %c0_53, %c0_54] : memref<12x32x32xf32, #tpu.memory_space<vmem>>, vector<1x32x32xf32>
      %91 = vector.shape_cast %90 : vector<1x32x32xf32> to vector<32x32xf32>
      %92 = arith.index_cast %arg29 : i32 to index
      %c0_55 = arith.constant 0 : index
      %c0_56 = arith.constant 0 : index
      %93 = vector.load %arg9[%92, %c0_55, %c0_56] : memref<12x1x32xf32, #tpu.memory_space<vmem>>, vector<1x1x32xf32>
      %94 = vector.shape_cast %93 : vector<1x1x32xf32> to vector<1x32xf32>
      %95 = vector.extract_strided_slice %86 {offsets = [0, 0], sizes = [64, 8], strides = [1, 1]} : vector<64x32xf32> to vector<64x8xf32>
      %96 = vector.extract_strided_slice %87 {offsets = [0, 0], sizes = [64, 8], strides = [1, 1]} : vector<64x32xf32> to vector<64x8xf32>
      %cst_57 = arith.constant dense<0.000000e+00> : vector<64x64xf32>
      %97 = tpu.matmul %95, %96, %cst_57 {dimension_numbers = #tpu.dot_dimension_numbers<[1], [1], [0], [0], [0, 0, 1, 0], [], []>} : vector<64x8xf32>, vector<64x8xf32>, vector<64x64xf32> -> vector<64x64xf32>
      %cst_58 = arith.constant 0.353553385 : f32
      %98 = vector.broadcast %cst_58 : f32 to vector<64x64xf32>
      %99 = arith.mulf %97, %98 : vector<64x64xf32>
      %100 = arith.addf %99, %16 : vector<64x64xf32>
      %cst_59 = arith.constant dense<0xFF800000> : vector<64xf32>
      %101 = vector.multi_reduction <maximumf>, %100, %cst_59 [1] : vector<64x64xf32> to vector<64xf32>
      %102 = vector.shape_cast %101 : vector<64xf32> to vector<64x1xf32>
      %103 = vector.broadcast %102 : vector<64x1xf32> to vector<64x64xf32>
      %104 = arith.subf %100, %103 : vector<64x64xf32>
      %105 = math.exp %104 : vector<64x64xf32>
      %cst_60 = arith.constant dense<0.000000e+00> : vector<64xf32>
      %106 = vector.multi_reduction <add>, %105, %cst_60 [1] : vector<64x64xf32> to vector<64xf32>
      %107 = vector.shape_cast %106 : vector<64xf32> to vector<64x1xf32>
      %108 = tpu.reciprocal %107 {approx = true} : vector<64x1xf32> -> vector<64x1xf32>
      %109 = vector.broadcast %108 : vector<64x1xf32> to vector<64x64xf32>
      %110 = arith.mulf %105, %109 : vector<64x64xf32>
      %111 = vector.extract_strided_slice %88 {offsets = [0, 0], sizes = [64, 8], strides = [1, 1]} : vector<64x32xf32> to vector<64x8xf32>
      %cst_61 = arith.constant dense<0.000000e+00> : vector<64x8xf32>
      %112 = tpu.matmul %110, %111, %cst_61 {dimension_numbers = #tpu.dot_dimension_numbers<[1], [0], [0], [1], [0, 0, 1, 1], [], []>} : vector<64x64xf32>, vector<64x8xf32>, vector<64x8xf32> -> vector<64x8xf32>
      %113 = vector.extract_strided_slice %86 {offsets = [0, 8], sizes = [64, 8], strides = [1, 1]} : vector<64x32xf32> to vector<64x8xf32>
      %114 = vector.extract_strided_slice %87 {offsets = [0, 8], sizes = [64, 8], strides = [1, 1]} : vector<64x32xf32> to vector<64x8xf32>
      %cst_62 = arith.constant dense<0.000000e+00> : vector<64x64xf32>
      %115 = tpu.matmul %113, %114, %cst_62 {dimension_numbers = #tpu.dot_dimension_numbers<[1], [1], [0], [0], [0, 0, 1, 0], [], []>} : vector<64x8xf32>, vector<64x8xf32>, vector<64x64xf32> -> vector<64x64xf32>
      %cst_63 = arith.constant 0.353553385 : f32
      %116 = vector.broadcast %cst_63 : f32 to vector<64x64xf32>
      %117 = arith.mulf %115, %116 : vector<64x64xf32>
      %118 = arith.addf %117, %16 : vector<64x64xf32>
      %cst_64 = arith.constant dense<0xFF800000> : vector<64xf32>
      %119 = vector.multi_reduction <maximumf>, %118, %cst_64 [1] : vector<64x64xf32> to vector<64xf32>
      %120 = vector.shape_cast %119 : vector<64xf32> to vector<64x1xf32>
      %121 = vector.broadcast %120 : vector<64x1xf32> to vector<64x64xf32>
      %122 = arith.subf %118, %121 : vector<64x64xf32>
      %123 = math.exp %122 : vector<64x64xf32>
      %cst_65 = arith.constant dense<0.000000e+00> : vector<64xf32>
      %124 = vector.multi_reduction <add>, %123, %cst_65 [1] : vector<64x64xf32> to vector<64xf32>
      %125 = vector.shape_cast %124 : vector<64xf32> to vector<64x1xf32>
      %126 = tpu.reciprocal %125 {approx = true} : vector<64x1xf32> -> vector<64x1xf32>
      %127 = vector.broadcast %126 : vector<64x1xf32> to vector<64x64xf32>
      %128 = arith.mulf %123, %127 : vector<64x64xf32>
      %129 = vector.extract_strided_slice %88 {offsets = [0, 8], sizes = [64, 8], strides = [1, 1]} : vector<64x32xf32> to vector<64x8xf32>
      %cst_66 = arith.constant dense<0.000000e+00> : vector<64x8xf32>
      %130 = tpu.matmul %128, %129, %cst_66 {dimension_numbers = #tpu.dot_dimension_numbers<[1], [0], [0], [1], [0, 0, 1, 1], [], []>} : vector<64x64xf32>, vector<64x8xf32>, vector<64x8xf32> -> vector<64x8xf32>
      %131 = vector.extract_strided_slice %86 {offsets = [0, 16], sizes = [64, 8], strides = [1, 1]} : vector<64x32xf32> to vector<64x8xf32>
      %132 = vector.extract_strided_slice %87 {offsets = [0, 16], sizes = [64, 8], strides = [1, 1]} : vector<64x32xf32> to vector<64x8xf32>
      %cst_67 = arith.constant dense<0.000000e+00> : vector<64x64xf32>
      %133 = tpu.matmul %131, %132, %cst_67 {dimension_numbers = #tpu.dot_dimension_numbers<[1], [1], [0], [0], [0, 0, 1, 0], [], []>} : vector<64x8xf32>, vector<64x8xf32>, vector<64x64xf32> -> vector<64x64xf32>
      %cst_68 = arith.constant 0.353553385 : f32
      %134 = vector.broadcast %cst_68 : f32 to vector<64x64xf32>
      %135 = arith.mulf %133, %134 : vector<64x64xf32>
      %136 = arith.addf %135, %16 : vector<64x64xf32>
      %cst_69 = arith.constant dense<0xFF800000> : vector<64xf32>
      %137 = vector.multi_reduction <maximumf>, %136, %cst_69 [1] : vector<64x64xf32> to vector<64xf32>
      %138 = vector.shape_cast %137 : vector<64xf32> to vector<64x1xf32>
      %139 = vector.broadcast %138 : vector<64x1xf32> to vector<64x64xf32>
      %140 = arith.subf %136, %139 : vector<64x64xf32>
      %141 = math.exp %140 : vector<64x64xf32>
      %cst_70 = arith.constant dense<0.000000e+00> : vector<64xf32>
      %142 = vector.multi_reduction <add>, %141, %cst_70 [1] : vector<64x64xf32> to vector<64xf32>
      %143 = vector.shape_cast %142 : vector<64xf32> to vector<64x1xf32>
      %144 = tpu.reciprocal %143 {approx = true} : vector<64x1xf32> -> vector<64x1xf32>
      %145 = vector.broadcast %144 : vector<64x1xf32> to vector<64x64xf32>
      %146 = arith.mulf %141, %145 : vector<64x64xf32>
      %147 = vector.extract_strided_slice %88 {offsets = [0, 16], sizes = [64, 8], strides = [1, 1]} : vector<64x32xf32> to vector<64x8xf32>
      %cst_71 = arith.constant dense<0.000000e+00> : vector<64x8xf32>
      %148 = tpu.matmul %146, %147, %cst_71 {dimension_numbers = #tpu.dot_dimension_numbers<[1], [0], [0], [1], [0, 0, 1, 1], [], []>} : vector<64x64xf32>, vector<64x8xf32>, vector<64x8xf32> -> vector<64x8xf32>
      %149 = vector.extract_strided_slice %86 {offsets = [0, 24], sizes = [64, 8], strides = [1, 1]} : vector<64x32xf32> to vector<64x8xf32>
      %150 = vector.extract_strided_slice %87 {offsets = [0, 24], sizes = [64, 8], strides = [1, 1]} : vector<64x32xf32> to vector<64x8xf32>
      %cst_72 = arith.constant dense<0.000000e+00> : vector<64x64xf32>
      %151 = tpu.matmul %149, %150, %cst_72 {dimension_numbers = #tpu.dot_dimension_numbers<[1], [1], [0], [0], [0, 0, 1, 0], [], []>} : vector<64x8xf32>, vector<64x8xf32>, vector<64x64xf32> -> vector<64x64xf32>
      %cst_73 = arith.constant 0.353553385 : f32
      %152 = vector.broadcast %cst_73 : f32 to vector<64x64xf32>
      %153 = arith.mulf %151, %152 : vector<64x64xf32>
      %154 = arith.addf %153, %16 : vector<64x64xf32>
      %cst_74 = arith.constant dense<0xFF800000> : vector<64xf32>
      %155 = vector.multi_reduction <maximumf>, %154, %cst_74 [1] : vector<64x64xf32> to vector<64xf32>
      %156 = vector.shape_cast %155 : vector<64xf32> to vector<64x1xf32>
      %157 = vector.broadcast %156 : vector<64x1xf32> to vector<64x64xf32>
      %158 = arith.subf %154, %157 : vector<64x64xf32>
      %159 = math.exp %158 : vector<64x64xf32>
      %cst_75 = arith.constant dense<0.000000e+00> : vector<64xf32>
      %160 = vector.multi_reduction <add>, %159, %cst_75 [1] : vector<64x64xf32> to vector<64xf32>
      %161 = vector.shape_cast %160 : vector<64xf32> to vector<64x1xf32>
      %162 = tpu.reciprocal %161 {approx = true} : vector<64x1xf32> -> vector<64x1xf32>
      %163 = vector.broadcast %162 : vector<64x1xf32> to vector<64x64xf32>
      %164 = arith.mulf %159, %163 : vector<64x64xf32>
      %165 = vector.extract_strided_slice %88 {offsets = [0, 24], sizes = [64, 8], strides = [1, 1]} : vector<64x32xf32> to vector<64x8xf32>
      %cst_76 = arith.constant dense<0.000000e+00> : vector<64x8xf32>
      %166 = tpu.matmul %164, %165, %cst_76 {dimension_numbers = #tpu.dot_dimension_numbers<[1], [0], [0], [1], [0, 0, 1, 1], [], []>} : vector<64x64xf32>, vector<64x8xf32>, vector<64x8xf32> -> vector<64x8xf32>
      %167 = tpu.concatenate %112, %130, %148, %166 in 1 : vector<64x8xf32>, vector<64x8xf32>, vector<64x8xf32>, vector<64x8xf32> -> vector<64x32xf32>
      %cst_77 = arith.constant dense<0.000000e+00> : vector<64x32xf32>
      %168 = tpu.matmul %167, %91, %cst_77 {dimension_numbers = #tpu.dot_dimension_numbers<[1], [0], [0], [1], [0, 0, 1, 1], [], []>} : vector<64x32xf32>, vector<32x32xf32>, vector<64x32xf32> -> vector<64x32xf32>
      %169 = vector.broadcast %94 : vector<1x32xf32> to vector<64x32xf32>
      %170 = arith.addf %168, %169 : vector<64x32xf32>
      %171 = arith.addf %arg30, %170 : vector<64x32xf32>
      %cst_78 = arith.constant dense<0.000000e+00> : vector<64xf32>
      %172 = vector.multi_reduction <add>, %171, %cst_78 [1] : vector<64x32xf32> to vector<64xf32>
      %173 = vector.shape_cast %172 : vector<64xf32> to vector<64x1xf32>
      %cst_79 = arith.constant 3.200000e+01 : f32
      %174 = vector.broadcast %cst_79 : f32 to vector<64x1xf32>
      %175 = arith.divf %173, %174 : vector<64x1xf32>
      %176 = vector.broadcast %175 : vector<64x1xf32> to vector<64x32xf32>
      %177 = arith.subf %171, %176 : vector<64x32xf32>
      %178 = arith.mulf %177, %177 : vector<64x32xf32>
      %cst_80 = arith.constant dense<0.000000e+00> : vector<64xf32>
      %179 = vector.multi_reduction <add>, %178, %cst_80 [1] : vector<64x32xf32> to vector<64xf32>
      %180 = vector.shape_cast %179 : vector<64xf32> to vector<64x1xf32>
      %cst_81 = arith.constant 3.200000e+01 : f32
      %181 = vector.broadcast %cst_81 : f32 to vector<64x1xf32>
      %182 = arith.divf %180, %181 : vector<64x1xf32>
      %cst_82 = arith.constant 9.99999974E-6 : f32
      %183 = vector.broadcast %cst_82 : f32 to vector<64x1xf32>
      %184 = arith.addf %182, %183 : vector<64x1xf32>
      %185 = math.rsqrt %184 : vector<64x1xf32>
      %186 = vector.broadcast %185 : vector<64x1xf32> to vector<64x32xf32>
      %187 = arith.mulf %177, %186 : vector<64x32xf32>
      %188 = arith.index_cast %arg29 : i32 to index
      %c0_83 = arith.constant 0 : index
      %c0_84 = arith.constant 0 : index
      %189 = vector.load %arg10[%188, %c0_83, %c0_84] : memref<12x32x32xf32, #tpu.memory_space<vmem>>, vector<1x32x32xf32>
      %190 = vector.shape_cast %189 : vector<1x32x32xf32> to vector<32x32xf32>
      %cst_85 = arith.constant dense<0.000000e+00> : vector<64x32xf32>
      %191 = tpu.matmul %187, %190, %cst_85 {dimension_numbers = #tpu.dot_dimension_numbers<[1], [0], [0], [1], [0, 0, 1, 1], [], []>} : vector<64x32xf32>, vector<32x32xf32>, vector<64x32xf32> -> vector<64x32xf32>
      %192 = arith.index_cast %arg29 : i32 to index
      %c0_86 = arith.constant 0 : index
      %c0_87 = arith.constant 0 : index
      %193 = vector.load %arg11[%192, %c0_86, %c0_87] : memref<12x1x32xf32, #tpu.memory_space<vmem>>, vector<1x1x32xf32>
      %194 = vector.shape_cast %193 : vector<1x1x32xf32> to vector<1x32xf32>
      %195 = vector.broadcast %194 : vector<1x32xf32> to vector<64x32xf32>
      %196 = arith.addf %191, %195 : vector<64x32xf32>
      %197 = arith.index_cast %arg29 : i32 to index
      %c0_88 = arith.constant 0 : index
      %c0_89 = arith.constant 0 : index
      %198 = vector.load %arg12[%197, %c0_88, %c0_89] : memref<12x32x64xf32, #tpu.memory_space<vmem>>, vector<1x32x64xf32>
      %199 = vector.shape_cast %198 : vector<1x32x64xf32> to vector<32x64xf32>
      %cst_90 = arith.constant dense<0.000000e+00> : vector<8x64xf32>
      %200 = tpu.matmul %3, %199, %cst_90 {dimension_numbers = #tpu.dot_dimension_numbers<[1], [0], [0], [1], [0, 0, 1, 1], [], []>} : vector<8x32xf32>, vector<32x64xf32>, vector<8x64xf32> -> vector<8x64xf32>
      %201 = arith.index_cast %arg29 : i32 to index
      %c0_91 = arith.constant 0 : index
      %c0_92 = arith.constant 0 : index
      %202 = vector.load %arg13[%201, %c0_91, %c0_92] : memref<12x1x64xf32, #tpu.memory_space<vmem>>, vector<1x1x64xf32>
      %203 = vector.shape_cast %202 : vector<1x1x64xf32> to vector<1x64xf32>
      %204 = vector.broadcast %203 : vector<1x64xf32> to vector<8x64xf32>
      %205 = arith.addf %200, %204 : vector<8x64xf32>
      %206 = vector.extract_strided_slice %205 {offsets = [0, 0], sizes = [8, 32], strides = [1, 1]} : vector<8x64xf32> to vector<8x32xf32>
      %207 = vector.extract_strided_slice %205 {offsets = [0, 32], sizes = [8, 32], strides = [1, 1]} : vector<8x64xf32> to vector<8x32xf32>
      %208 = arith.index_cast %arg29 : i32 to index
      %c0_93 = arith.constant 0 : index
      %c0_94 = arith.constant 0 : index
      %209 = vector.load %arg14[%208, %c0_93, %c0_94] : memref<12x32x32xf32, #tpu.memory_space<vmem>>, vector<1x32x32xf32>
      %210 = vector.shape_cast %209 : vector<1x32x32xf32> to vector<32x32xf32>
      %211 = arith.index_cast %arg29 : i32 to index
      %c0_95 = arith.constant 0 : index
      %c0_96 = arith.constant 0 : index
      %212 = vector.load %arg15[%211, %c0_95, %c0_96] : memref<12x1x32xf32, #tpu.memory_space<vmem>>, vector<1x1x32xf32>
      %213 = vector.shape_cast %212 : vector<1x1x32xf32> to vector<1x32xf32>
      %214 = vector.extract_strided_slice %196 {offsets = [0, 0], sizes = [64, 8], strides = [1, 1]} : vector<64x32xf32> to vector<64x8xf32>
      %215 = vector.extract_strided_slice %206 {offsets = [0, 0], sizes = [8, 8], strides = [1, 1]} : vector<8x32xf32> to vector<8x8xf32>
      %cst_97 = arith.constant dense<0.000000e+00> : vector<64x8xf32>
      %216 = tpu.matmul %214, %215, %cst_97 {dimension_numbers = #tpu.dot_dimension_numbers<[1], [1], [0], [0], [0, 0, 1, 0], [], []>} : vector<64x8xf32>, vector<8x8xf32>, vector<64x8xf32> -> vector<64x8xf32>
      %cst_98 = arith.constant 0.353553385 : f32
      %217 = vector.broadcast %cst_98 : f32 to vector<64x8xf32>
      %218 = arith.mulf %216, %217 : vector<64x8xf32>
      %219 = arith.addf %218, %23 : vector<64x8xf32>
      %cst_99 = arith.constant dense<0xFF800000> : vector<64xf32>
      %220 = vector.multi_reduction <maximumf>, %219, %cst_99 [1] : vector<64x8xf32> to vector<64xf32>
      %221 = vector.shape_cast %220 : vector<64xf32> to vector<64x1xf32>
      %222 = vector.broadcast %221 : vector<64x1xf32> to vector<64x8xf32>
      %223 = arith.subf %219, %222 : vector<64x8xf32>
      %224 = math.exp %223 : vector<64x8xf32>
      %cst_100 = arith.constant dense<0.000000e+00> : vector<64xf32>
      %225 = vector.multi_reduction <add>, %224, %cst_100 [1] : vector<64x8xf32> to vector<64xf32>
      %226 = vector.shape_cast %225 : vector<64xf32> to vector<64x1xf32>
      %227 = tpu.reciprocal %226 {approx = true} : vector<64x1xf32> -> vector<64x1xf32>
      %228 = vector.broadcast %227 : vector<64x1xf32> to vector<64x8xf32>
      %229 = arith.mulf %224, %228 : vector<64x8xf32>
      %230 = vector.extract_strided_slice %207 {offsets = [0, 0], sizes = [8, 8], strides = [1, 1]} : vector<8x32xf32> to vector<8x8xf32>
      %cst_101 = arith.constant dense<0.000000e+00> : vector<64x8xf32>
      %231 = tpu.matmul %229, %230, %cst_101 {dimension_numbers = #tpu.dot_dimension_numbers<[1], [0], [0], [1], [0, 0, 1, 1], [], []>} : vector<64x8xf32>, vector<8x8xf32>, vector<64x8xf32> -> vector<64x8xf32>
      %232 = vector.extract_strided_slice %196 {offsets = [0, 8], sizes = [64, 8], strides = [1, 1]} : vector<64x32xf32> to vector<64x8xf32>
      %233 = vector.extract_strided_slice %206 {offsets = [0, 8], sizes = [8, 8], strides = [1, 1]} : vector<8x32xf32> to vector<8x8xf32>
      %cst_102 = arith.constant dense<0.000000e+00> : vector<64x8xf32>
      %234 = tpu.matmul %232, %233, %cst_102 {dimension_numbers = #tpu.dot_dimension_numbers<[1], [1], [0], [0], [0, 0, 1, 0], [], []>} : vector<64x8xf32>, vector<8x8xf32>, vector<64x8xf32> -> vector<64x8xf32>
      %cst_103 = arith.constant 0.353553385 : f32
      %235 = vector.broadcast %cst_103 : f32 to vector<64x8xf32>
      %236 = arith.mulf %234, %235 : vector<64x8xf32>
      %237 = arith.addf %236, %23 : vector<64x8xf32>
      %cst_104 = arith.constant dense<0xFF800000> : vector<64xf32>
      %238 = vector.multi_reduction <maximumf>, %237, %cst_104 [1] : vector<64x8xf32> to vector<64xf32>
      %239 = vector.shape_cast %238 : vector<64xf32> to vector<64x1xf32>
      %240 = vector.broadcast %239 : vector<64x1xf32> to vector<64x8xf32>
      %241 = arith.subf %237, %240 : vector<64x8xf32>
      %242 = math.exp %241 : vector<64x8xf32>
      %cst_105 = arith.constant dense<0.000000e+00> : vector<64xf32>
      %243 = vector.multi_reduction <add>, %242, %cst_105 [1] : vector<64x8xf32> to vector<64xf32>
      %244 = vector.shape_cast %243 : vector<64xf32> to vector<64x1xf32>
      %245 = tpu.reciprocal %244 {approx = true} : vector<64x1xf32> -> vector<64x1xf32>
      %246 = vector.broadcast %245 : vector<64x1xf32> to vector<64x8xf32>
      %247 = arith.mulf %242, %246 : vector<64x8xf32>
      %248 = vector.extract_strided_slice %207 {offsets = [0, 8], sizes = [8, 8], strides = [1, 1]} : vector<8x32xf32> to vector<8x8xf32>
      %cst_106 = arith.constant dense<0.000000e+00> : vector<64x8xf32>
      %249 = tpu.matmul %247, %248, %cst_106 {dimension_numbers = #tpu.dot_dimension_numbers<[1], [0], [0], [1], [0, 0, 1, 1], [], []>} : vector<64x8xf32>, vector<8x8xf32>, vector<64x8xf32> -> vector<64x8xf32>
      %250 = vector.extract_strided_slice %196 {offsets = [0, 16], sizes = [64, 8], strides = [1, 1]} : vector<64x32xf32> to vector<64x8xf32>
      %251 = vector.extract_strided_slice %206 {offsets = [0, 16], sizes = [8, 8], strides = [1, 1]} : vector<8x32xf32> to vector<8x8xf32>
      %cst_107 = arith.constant dense<0.000000e+00> : vector<64x8xf32>
      %252 = tpu.matmul %250, %251, %cst_107 {dimension_numbers = #tpu.dot_dimension_numbers<[1], [1], [0], [0], [0, 0, 1, 0], [], []>} : vector<64x8xf32>, vector<8x8xf32>, vector<64x8xf32> -> vector<64x8xf32>
      %cst_108 = arith.constant 0.353553385 : f32
      %253 = vector.broadcast %cst_108 : f32 to vector<64x8xf32>
      %254 = arith.mulf %252, %253 : vector<64x8xf32>
      %255 = arith.addf %254, %23 : vector<64x8xf32>
      %cst_109 = arith.constant dense<0xFF800000> : vector<64xf32>
      %256 = vector.multi_reduction <maximumf>, %255, %cst_109 [1] : vector<64x8xf32> to vector<64xf32>
      %257 = vector.shape_cast %256 : vector<64xf32> to vector<64x1xf32>
      %258 = vector.broadcast %257 : vector<64x1xf32> to vector<64x8xf32>
      %259 = arith.subf %255, %258 : vector<64x8xf32>
      %260 = math.exp %259 : vector<64x8xf32>
      %cst_110 = arith.constant dense<0.000000e+00> : vector<64xf32>
      %261 = vector.multi_reduction <add>, %260, %cst_110 [1] : vector<64x8xf32> to vector<64xf32>
      %262 = vector.shape_cast %261 : vector<64xf32> to vector<64x1xf32>
      %263 = tpu.reciprocal %262 {approx = true} : vector<64x1xf32> -> vector<64x1xf32>
      %264 = vector.broadcast %263 : vector<64x1xf32> to vector<64x8xf32>
      %265 = arith.mulf %260, %264 : vector<64x8xf32>
      %266 = vector.extract_strided_slice %207 {offsets = [0, 16], sizes = [8, 8], strides = [1, 1]} : vector<8x32xf32> to vector<8x8xf32>
      %cst_111 = arith.constant dense<0.000000e+00> : vector<64x8xf32>
      %267 = tpu.matmul %265, %266, %cst_111 {dimension_numbers = #tpu.dot_dimension_numbers<[1], [0], [0], [1], [0, 0, 1, 1], [], []>} : vector<64x8xf32>, vector<8x8xf32>, vector<64x8xf32> -> vector<64x8xf32>
      %268 = vector.extract_strided_slice %196 {offsets = [0, 24], sizes = [64, 8], strides = [1, 1]} : vector<64x32xf32> to vector<64x8xf32>
      %269 = vector.extract_strided_slice %206 {offsets = [0, 24], sizes = [8, 8], strides = [1, 1]} : vector<8x32xf32> to vector<8x8xf32>
      %cst_112 = arith.constant dense<0.000000e+00> : vector<64x8xf32>
      %270 = tpu.matmul %268, %269, %cst_112 {dimension_numbers = #tpu.dot_dimension_numbers<[1], [1], [0], [0], [0, 0, 1, 0], [], []>} : vector<64x8xf32>, vector<8x8xf32>, vector<64x8xf32> -> vector<64x8xf32>
      %cst_113 = arith.constant 0.353553385 : f32
      %271 = vector.broadcast %cst_113 : f32 to vector<64x8xf32>
      %272 = arith.mulf %270, %271 : vector<64x8xf32>
      %273 = arith.addf %272, %23 : vector<64x8xf32>
      %cst_114 = arith.constant dense<0xFF800000> : vector<64xf32>
      %274 = vector.multi_reduction <maximumf>, %273, %cst_114 [1] : vector<64x8xf32> to vector<64xf32>
      %275 = vector.shape_cast %274 : vector<64xf32> to vector<64x1xf32>
      %276 = vector.broadcast %275 : vector<64x1xf32> to vector<64x8xf32>
      %277 = arith.subf %273, %276 : vector<64x8xf32>
      %278 = math.exp %277 : vector<64x8xf32>
      %cst_115 = arith.constant dense<0.000000e+00> : vector<64xf32>
      %279 = vector.multi_reduction <add>, %278, %cst_115 [1] : vector<64x8xf32> to vector<64xf32>
      %280 = vector.shape_cast %279 : vector<64xf32> to vector<64x1xf32>
      %281 = tpu.reciprocal %280 {approx = true} : vector<64x1xf32> -> vector<64x1xf32>
      %282 = vector.broadcast %281 : vector<64x1xf32> to vector<64x8xf32>
      %283 = arith.mulf %278, %282 : vector<64x8xf32>
      %284 = vector.extract_strided_slice %207 {offsets = [0, 24], sizes = [8, 8], strides = [1, 1]} : vector<8x32xf32> to vector<8x8xf32>
      %cst_116 = arith.constant dense<0.000000e+00> : vector<64x8xf32>
      %285 = tpu.matmul %283, %284, %cst_116 {dimension_numbers = #tpu.dot_dimension_numbers<[1], [0], [0], [1], [0, 0, 1, 1], [], []>} : vector<64x8xf32>, vector<8x8xf32>, vector<64x8xf32> -> vector<64x8xf32>
      %286 = tpu.concatenate %231, %249, %267, %285 in 1 : vector<64x8xf32>, vector<64x8xf32>, vector<64x8xf32>, vector<64x8xf32> -> vector<64x32xf32>
      %cst_117 = arith.constant dense<0.000000e+00> : vector<64x32xf32>
      %287 = tpu.matmul %286, %210, %cst_117 {dimension_numbers = #tpu.dot_dimension_numbers<[1], [0], [0], [1], [0, 0, 1, 1], [], []>} : vector<64x32xf32>, vector<32x32xf32>, vector<64x32xf32> -> vector<64x32xf32>
      %288 = vector.broadcast %213 : vector<1x32xf32> to vector<64x32xf32>
      %289 = arith.addf %287, %288 : vector<64x32xf32>
      %290 = arith.addf %171, %289 : vector<64x32xf32>
      %cst_118 = arith.constant dense<0.000000e+00> : vector<64xf32>
      %291 = vector.multi_reduction <add>, %290, %cst_118 [1] : vector<64x32xf32> to vector<64xf32>
      %292 = vector.shape_cast %291 : vector<64xf32> to vector<64x1xf32>
      %cst_119 = arith.constant 3.200000e+01 : f32
      %293 = vector.broadcast %cst_119 : f32 to vector<64x1xf32>
      %294 = arith.divf %292, %293 : vector<64x1xf32>
      %295 = vector.broadcast %294 : vector<64x1xf32> to vector<64x32xf32>
      %296 = arith.subf %290, %295 : vector<64x32xf32>
      %297 = arith.mulf %296, %296 : vector<64x32xf32>
      %cst_120 = arith.constant dense<0.000000e+00> : vector<64xf32>
      %298 = vector.multi_reduction <add>, %297, %cst_120 [1] : vector<64x32xf32> to vector<64xf32>
      %299 = vector.shape_cast %298 : vector<64xf32> to vector<64x1xf32>
      %cst_121 = arith.constant 3.200000e+01 : f32
      %300 = vector.broadcast %cst_121 : f32 to vector<64x1xf32>
      %301 = arith.divf %299, %300 : vector<64x1xf32>
      %cst_122 = arith.constant 9.99999974E-6 : f32
      %302 = vector.broadcast %cst_122 : f32 to vector<64x1xf32>
      %303 = arith.addf %301, %302 : vector<64x1xf32>
      %304 = math.rsqrt %303 : vector<64x1xf32>
      %305 = vector.broadcast %304 : vector<64x1xf32> to vector<64x32xf32>
      %306 = arith.mulf %296, %305 : vector<64x32xf32>
      %307 = arith.index_cast %arg29 : i32 to index
      %c0_123 = arith.constant 0 : index
      %c0_124 = arith.constant 0 : index
      %308 = vector.load %arg16[%307, %c0_123, %c0_124] : memref<12x32x128xf32, #tpu.memory_space<vmem>>, vector<1x32x128xf32>
      %309 = vector.shape_cast %308 : vector<1x32x128xf32> to vector<32x128xf32>
      %cst_125 = arith.constant dense<0.000000e+00> : vector<64x128xf32>
      %310 = tpu.matmul %306, %309, %cst_125 {dimension_numbers = #tpu.dot_dimension_numbers<[1], [0], [0], [1], [0, 0, 1, 1], [], []>} : vector<64x32xf32>, vector<32x128xf32>, vector<64x128xf32> -> vector<64x128xf32>
      %311 = arith.index_cast %arg29 : i32 to index
      %c0_126 = arith.constant 0 : index
      %c0_127 = arith.constant 0 : index
      %312 = vector.load %arg17[%311, %c0_126, %c0_127] : memref<12x1x128xf32, #tpu.memory_space<vmem>>, vector<1x1x128xf32>
      %313 = vector.shape_cast %312 : vector<1x1x128xf32> to vector<1x128xf32>
      %314 = vector.broadcast %313 : vector<1x128xf32> to vector<64x128xf32>
      %315 = arith.addf %310, %314 : vector<64x128xf32>
      %cst_128 = arith.constant 0.000000e+00 : f32
      %316 = vector.broadcast %cst_128 : f32 to vector<64x128xf32>
      %317 = arith.maximumf %315, %316 : vector<64x128xf32>
      %318 = arith.index_cast %arg29 : i32 to index
      %c0_129 = arith.constant 0 : index
      %c0_130 = arith.constant 0 : index
      %319 = vector.load %arg18[%318, %c0_129, %c0_130] : memref<12x128x32xf32, #tpu.memory_space<vmem>>, vector<1x128x32xf32>
      %320 = vector.shape_cast %319 : vector<1x128x32xf32> to vector<128x32xf32>
      %cst_131 = arith.constant dense<0.000000e+00> : vector<64x32xf32>
      %321 = tpu.matmul %317, %320, %cst_131 {dimension_numbers = #tpu.dot_dimension_numbers<[1], [0], [0], [1], [0, 0, 1, 1], [], []>} : vector<64x128xf32>, vector<128x32xf32>, vector<64x32xf32> -> vector<64x32xf32>
      %322 = arith.addf %290, %321 : vector<64x32xf32>
      %323 = arith.index_cast %arg29 : i32 to index
      %c0_132 = arith.constant 0 : index
      %c0_133 = arith.constant 0 : index
      %324 = vector.load %arg19[%323, %c0_132, %c0_133] : memref<12x1x32xf32, #tpu.memory_space<vmem>>, vector<1x1x32xf32>
      %325 = vector.shape_cast %324 : vector<1x1x32xf32> to vector<1x32xf32>
      %326 = vector.broadcast %325 : vector<1x32xf32> to vector<64x32xf32>
      %327 = arith.addf %322, %326 : vector<64x32xf32>
      scf.yield %327 : vector<64x32xf32>
    }
    %c12_i32_17 = arith.constant 12 : i32
    %c0_18 = arith.constant 0 : index
    %c0_19 = arith.constant 0 : index
    %26 = vector.load %arg20[%c0_18, %c0_19] : memref<32x8xf32, #tpu.memory_space<vmem>>, vector<32x8xf32>
    %cst_20 = arith.constant dense<0.000000e+00> : vector<64x8xf32>
    %27 = tpu.matmul %25, %26, %cst_20 {dimension_numbers = #tpu.dot_dimension_numbers<[1], [0], [0], [1], [0, 0, 1, 1], [], []>} : vector<64x32xf32>, vector<32x8xf32>, vector<64x8xf32> -> vector<64x8xf32>
    %c0_21 = arith.constant 0 : index
    %c0_22 = arith.constant 0 : index
    %28 = vector.load %arg21[%c0_21, %c0_22] : memref<1x8xf32, #tpu.memory_space<vmem>>, vector<1x8xf32>
    %29 = vector.broadcast %28 : vector<1x8xf32> to vector<64x8xf32>
    %30 = arith.addf %27, %29 : vector<64x8xf32>
    %c0_23 = arith.constant 0 : index
    %c0_24 = arith.constant 0 : index
    %31 = vector.load %arg22[%c0_23, %c0_24] : memref<32x32xf32, #tpu.memory_space<vmem>>, vector<32x32xf32>
    %cst_25 = arith.constant dense<0.000000e+00> : vector<64x32xf32>
    %32 = tpu.matmul %25, %31, %cst_25 {dimension_numbers = #tpu.dot_dimension_numbers<[1], [0], [0], [1], [0, 0, 1, 1], [], []>} : vector<64x32xf32>, vector<32x32xf32>, vector<64x32xf32> -> vector<64x32xf32>
    %c0_26 = arith.constant 0 : index
    %c0_27 = arith.constant 0 : index
    %33 = vector.load %arg23[%c0_26, %c0_27] : memref<1x32xf32, #tpu.memory_space<vmem>>, vector<1x32xf32>
    %34 = vector.broadcast %33 : vector<1x32xf32> to vector<64x32xf32>
    %35 = arith.addf %32, %34 : vector<64x32xf32>
    %36 = arith.negf %35 : vector<64x32xf32>
    %37 = math.exp %36 : vector<64x32xf32>
    %cst_28 = arith.constant 1.000000e+00 : f32
    %38 = vector.broadcast %cst_28 : f32 to vector<64x32xf32>
    %39 = arith.addf %38, %37 : vector<64x32xf32>
    %40 = arith.divf %38, %39 : vector<64x32xf32>
    %41 = arith.mulf %35, %40 : vector<64x32xf32>
    %c0_29 = arith.constant 0 : index
    %c0_30 = arith.constant 0 : index
    %42 = vector.load %arg24[%c0_29, %c0_30] : memref<32x32xf32, #tpu.memory_space<vmem>>, vector<32x32xf32>
    %cst_31 = arith.constant dense<0.000000e+00> : vector<64x32xf32>
    %43 = tpu.matmul %41, %42, %cst_31 {dimension_numbers = #tpu.dot_dimension_numbers<[1], [0], [0], [1], [0, 0, 1, 1], [], []>} : vector<64x32xf32>, vector<32x32xf32>, vector<64x32xf32> -> vector<64x32xf32>
    %c0_32 = arith.constant 0 : index
    %c0_33 = arith.constant 0 : index
    %44 = vector.load %arg25[%c0_32, %c0_33] : memref<1x32xf32, #tpu.memory_space<vmem>>, vector<1x32xf32>
    %45 = vector.broadcast %44 : vector<1x32xf32> to vector<64x32xf32>
    %46 = arith.addf %43, %45 : vector<64x32xf32>
    %47 = arith.negf %46 : vector<64x32xf32>
    %48 = math.exp %47 : vector<64x32xf32>
    %cst_34 = arith.constant 1.000000e+00 : f32
    %49 = vector.broadcast %cst_34 : f32 to vector<64x32xf32>
    %50 = arith.addf %49, %48 : vector<64x32xf32>
    %51 = arith.divf %49, %50 : vector<64x32xf32>
    %52 = arith.mulf %46, %51 : vector<64x32xf32>
    %c0_35 = arith.constant 0 : index
    %c0_36 = arith.constant 0 : index
    %53 = vector.load %arg26[%c0_35, %c0_36] : memref<32x8xf32, #tpu.memory_space<vmem>>, vector<32x8xf32>
    %cst_37 = arith.constant dense<0.000000e+00> : vector<64x8xf32>
    %54 = tpu.matmul %52, %53, %cst_37 {dimension_numbers = #tpu.dot_dimension_numbers<[1], [0], [0], [1], [0, 0, 1, 1], [], []>} : vector<64x32xf32>, vector<32x8xf32>, vector<64x8xf32> -> vector<64x8xf32>
    %c0_38 = arith.constant 0 : index
    %c0_39 = arith.constant 0 : index
    %55 = vector.load %arg27[%c0_38, %c0_39] : memref<1x8xf32, #tpu.memory_space<vmem>>, vector<1x8xf32>
    %56 = vector.broadcast %55 : vector<1x8xf32> to vector<64x8xf32>
    %57 = arith.addf %54, %56 : vector<64x8xf32>
    %58 = arith.addf %30, %57 : vector<64x8xf32>
    %59 = vector.shape_cast %58 : vector<64x8xf32> to vector<1x64x8xf32>
    %c0_40 = arith.constant 0 : index
    %c0_41 = arith.constant 0 : index
    %c0_42 = arith.constant 0 : index
    %60 = vector.load %arg28[%c0_40, %c0_41, %c0_42] : memref<1x64x8xf32, #tpu.memory_space<vmem>>, vector<1x64x8xf32>
    tpu.vector_store %arg28[%c0_40, %c0_41, %c0_42], %59 {strides = array<i32>} : memref<1x64x8xf32, #tpu.memory_space<vmem>>, vector<1x64x8xf32>,
    return
  }
  func.func @transform_0(%arg0: i32) -> (i32, i32, i32) {
    %c0_i32 = arith.constant 0 : i32
    %c0_i32_0 = arith.constant 0 : i32
    %c0_i32_1 = arith.constant 0 : i32
    return %arg0, %c0_i32, %c0_i32_0 : i32, i32, i32
  }
  func.func @transform_1(%arg0: i32) -> (i32, i32, i32) {
    %c0_i32 = arith.constant 0 : i32
    %c0_i32_0 = arith.constant 0 : i32
    %c0_i32_1 = arith.constant 0 : i32
    return %arg0, %c0_i32, %c0_i32_0 : i32, i32, i32
  }
  func.func @transform_2(%arg0: i32) -> (i32, i32, i32) {
    %c0_i32 = arith.constant 0 : i32
    %c0_i32_0 = arith.constant 0 : i32
    %c0_i32_1 = arith.constant 0 : i32
    return %arg0, %c0_i32, %c0_i32_0 : i32, i32, i32
  }
  func.func @transform_3(%arg0: i32) -> (i32, i32, i32) {
    %c0_i32 = arith.constant 0 : i32
    %c0_i32_0 = arith.constant 0 : i32
    %c0_i32_1 = arith.constant 0 : i32
    return %arg0, %c0_i32, %c0_i32_0 : i32, i32, i32
  }
  func.func @transform_4(%arg0: i32) -> (i32, i32, i32) {
    %c0_i32 = arith.constant 0 : i32
    %c0_i32_0 = arith.constant 0 : i32
    %c0_i32_1 = arith.constant 0 : i32
    return %arg0, %c0_i32, %c0_i32_0 : i32, i32, i32
  }
  func.func @transform_5(%arg0: i32) -> (i32, i32, i32) {
    %c0_i32 = arith.constant 0 : i32
    %c0_i32_0 = arith.constant 0 : i32
    %c0_i32_1 = arith.constant 0 : i32
    %c0_i32_2 = arith.constant 0 : i32
    return %c0_i32, %c0_i32_0, %c0_i32_1 : i32, i32, i32
  }
  func.func @transform_6(%arg0: i32) -> (i32, i32, i32) {
    %c0_i32 = arith.constant 0 : i32
    %c0_i32_0 = arith.constant 0 : i32
    %c0_i32_1 = arith.constant 0 : i32
    %c0_i32_2 = arith.constant 0 : i32
    return %c0_i32, %c0_i32_0, %c0_i32_1 : i32, i32, i32
  }
  func.func @transform_7(%arg0: i32) -> (i32, i32, i32) {
    %c0_i32 = arith.constant 0 : i32
    %c0_i32_0 = arith.constant 0 : i32
    %c0_i32_1 = arith.constant 0 : i32
    %c0_i32_2 = arith.constant 0 : i32
    return %c0_i32, %c0_i32_0, %c0_i32_1 : i32, i32, i32
  }
  func.func @transform_8(%arg0: i32) -> (i32, i32, i32) {
    %c0_i32 = arith.constant 0 : i32
    %c0_i32_0 = arith.constant 0 : i32
    %c0_i32_1 = arith.constant 0 : i32
    %c0_i32_2 = arith.constant 0 : i32
    return %c0_i32, %c0_i32_0, %c0_i32_1 : i32, i32, i32
  }
  func.func @transform_9(%arg0: i32) -> (i32, i32, i32) {
    %c0_i32 = arith.constant 0 : i32
    %c0_i32_0 = arith.constant 0 : i32
    %c0_i32_1 = arith.constant 0 : i32
    %c0_i32_2 = arith.constant 0 : i32
    return %c0_i32, %c0_i32_0, %c0_i32_1 : i32, i32, i32
  }
  func.func @transform_10(%arg0: i32) -> (i32, i32, i32) {
    %c0_i32 = arith.constant 0 : i32
    %c0_i32_0 = arith.constant 0 : i32
    %c0_i32_1 = arith.constant 0 : i32
    %c0_i32_2 = arith.constant 0 : i32
    return %c0_i32, %c0_i32_0, %c0_i32_1 : i32, i32, i32
  }
  func.func @transform_11(%arg0: i32) -> (i32, i32, i32) {
    %c0_i32 = arith.constant 0 : i32
    %c0_i32_0 = arith.constant 0 : i32
    %c0_i32_1 = arith.constant 0 : i32
    %c0_i32_2 = arith.constant 0 : i32
    return %c0_i32, %c0_i32_0, %c0_i32_1 : i32, i32, i32
  }
  func.func @transform_12(%arg0: i32) -> (i32, i32, i32) {
    %c0_i32 = arith.constant 0 : i32
    %c0_i32_0 = arith.constant 0 : i32
    %c0_i32_1 = arith.constant 0 : i32
    %c0_i32_2 = arith.constant 0 : i32
    return %c0_i32, %c0_i32_0, %c0_i32_1 : i32, i32, i32
  }
  func.func @transform_13(%arg0: i32) -> (i32, i32, i32) {
    %c0_i32 = arith.constant 0 : i32
    %c0_i32_0 = arith.constant 0 : i32
    %c0_i32_1 = arith.constant 0 : i32
    %c0_i32_2 = arith.constant 0 : i32
    return %c0_i32, %c0_i32_0, %c0_i32_1 : i32, i32, i32
  }
  func.func @transform_14(%arg0: i32) -> (i32, i32, i32) {
    %c0_i32 = arith.constant 0 : i32
    %c0_i32_0 = arith.constant 0 : i32
    %c0_i32_1 = arith.constant 0 : i32
    %c0_i32_2 = arith.constant 0 : i32
    return %c0_i32, %c0_i32_0, %c0_i32_1 : i32, i32, i32
  }
  func.func @transform_15(%arg0: i32) -> (i32, i32, i32) {
    %c0_i32 = arith.constant 0 : i32
    %c0_i32_0 = arith.constant 0 : i32
    %c0_i32_1 = arith.constant 0 : i32
    %c0_i32_2 = arith.constant 0 : i32
    return %c0_i32, %c0_i32_0, %c0_i32_1 : i32, i32, i32
  }
  func.func @transform_16(%arg0: i32) -> (i32, i32, i32) {
    %c0_i32 = arith.constant 0 : i32
    %c0_i32_0 = arith.constant 0 : i32
    %c0_i32_1 = arith.constant 0 : i32
    %c0_i32_2 = arith.constant 0 : i32
    return %c0_i32, %c0_i32_0, %c0_i32_1 : i32, i32, i32
  }
  func.func @transform_17(%arg0: i32) -> (i32, i32, i32) {
    %c0_i32 = arith.constant 0 : i32
    %c0_i32_0 = arith.constant 0 : i32
    %c0_i32_1 = arith.constant 0 : i32
    %c0_i32_2 = arith.constant 0 : i32
    return %c0_i32, %c0_i32_0, %c0_i32_1 : i32, i32, i32
  }
  func.func @transform_18(%arg0: i32) -> (i32, i32, i32) {
    %c0_i32 = arith.constant 0 : i32
    %c0_i32_0 = arith.constant 0 : i32
    %c0_i32_1 = arith.constant 0 : i32
    %c0_i32_2 = arith.constant 0 : i32
    return %c0_i32, %c0_i32_0, %c0_i32_1 : i32, i32, i32
  }
  func.func @transform_19(%arg0: i32) -> (i32, i32) {
    %c0_i32 = arith.constant 0 : i32
    %c0_i32_0 = arith.constant 0 : i32
    %c0_i32_1 = arith.constant 0 : i32
    return %c0_i32, %c0_i32_0 : i32, i32
  }
  func.func @transform_20(%arg0: i32) -> (i32, i32) {
    %c0_i32 = arith.constant 0 : i32
    %c0_i32_0 = arith.constant 0 : i32
    %c0_i32_1 = arith.constant 0 : i32
    return %c0_i32, %c0_i32_0 : i32, i32
  }
  func.func @transform_21(%arg0: i32) -> (i32, i32) {
    %c0_i32 = arith.constant 0 : i32
    %c0_i32_0 = arith.constant 0 : i32
    %c0_i32_1 = arith.constant 0 : i32
    return %c0_i32, %c0_i32_0 : i32, i32
  }
  func.func @transform_22(%arg0: i32) -> (i32, i32) {
    %c0_i32 = arith.constant 0 : i32
    %c0_i32_0 = arith.constant 0 : i32
    %c0_i32_1 = arith.constant 0 : i32
    return %c0_i32, %c0_i32_0 : i32, i32
  }
  func.func @transform_23(%arg0: i32) -> (i32, i32) {
    %c0_i32 = arith.constant 0 : i32
    %c0_i32_0 = arith.constant 0 : i32
    %c0_i32_1 = arith.constant 0 : i32
    return %c0_i32, %c0_i32_0 : i32, i32
  }
  func.func @transform_24(%arg0: i32) -> (i32, i32) {
    %c0_i32 = arith.constant 0 : i32
    %c0_i32_0 = arith.constant 0 : i32
    %c0_i32_1 = arith.constant 0 : i32
    return %c0_i32, %c0_i32_0 : i32, i32
  }
  func.func @transform_25(%arg0: i32) -> (i32, i32) {
    %c0_i32 = arith.constant 0 : i32
    %c0_i32_0 = arith.constant 0 : i32
    %c0_i32_1 = arith.constant 0 : i32
    return %c0_i32, %c0_i32_0 : i32, i32
  }
  func.func @transform_26(%arg0: i32) -> (i32, i32) {
    %c0_i32 = arith.constant 0 : i32
    %c0_i32_0 = arith.constant 0 : i32
    %c0_i32_1 = arith.constant 0 : i32
    return %c0_i32, %c0_i32_0 : i32, i32
  }
  func.func @transform_27(%arg0: i32) -> (i32, i32, i32) {
    %c0_i32 = arith.constant 0 : i32
    %c0_i32_0 = arith.constant 0 : i32
    %c0_i32_1 = arith.constant 0 : i32
    return %arg0, %c0_i32, %c0_i32_0 : i32, i32, i32
  }
}

</mosaic_0001>

<bundles_post_ra>
// kernel: topo_edge_forward.1
= control target key start
LH: loop header
LB: loop body
LE: loop exit
PB: predicated region body
PF: predicated region fallthrough
CT: control target
= control target key end

     0   :  { %s10852_s0 = inlined_call_operand.vmem [shape: f32[2,64,32], index: 0, kind: input, shape index: {}]   ;;  %s10853_s1 = inlined_call_operand.vmem [shape: f32[2,64,1], index: 1, kind: input, shape index: {}]   ;;  %s10854_s2 = inlined_call_operand.vmem [shape: f32[2,1,64], index: 2, kind: input, shape index: {}]   ;;  %s10855_s3 = inlined_call_operand.vmem [shape: f32[2,1,8], index: 3, kind: input, shape index: {}]   ;;  %s10856_s4 = inlined_call_operand.vmem [shape: f32[2,8,32], index: 4, kind: input, shape index: {}]   ;;  %s10857_s5 = inlined_call_operand.vmem [shape: f32[12,32,96], index: 5, kind: input, shape index: {}]   ;;  %s10858_s6 = inlined_call_operand.vmem [shape: f32[12,1,96], index: 6, kind: input, shape index: {}]   ;;  %s10859_s7 = inlined_call_operand.vmem [shape: f32[12,32,32], index: 7, kind: input, shape index: {}]   ;;  %s10860_s8 = inlined_call_operand.vmem [shape: f32[12,1,32], index: 8, kind: input, shape index: {}]   ;;  %s10861_s9 = inlined_call_operand.vmem [shape: f32[12,32,32], index: 9, kind: input, shape index: {}]   ;;  %s10862_s10 = inlined_call_operand.vmem [shape: f32[12,1,32], index: 10, kind: input, shape index: {}]   ;;  %s10863_s11 = inlined_call_operand.vmem [shape: f32[12,32,64], index: 11, kind: input, shape index: {}]   ;;  %s10864_s12 = inlined_call_operand.vmem [shape: f32[12,1,64], index: 12, kind: input, shape index: {}]   ;;  %s10865_s13 = inlined_call_operand.vmem [shape: f32[12,32,32], index: 13, kind: input, shape index: {}]   ;;  %s10866_s14 = inlined_call_operand.vmem [shape: f32[12,1,32], index: 14, kind: input, shape index: {}]   ;;  %s10867_s15 = inlined_call_operand.vmem [shape: f32[12,32,128], index: 15, kind: input, shape index: {}]   ;;  %s10868_s16 = inlined_call_operand.vmem [shape: f32[12,1,128], index: 16, kind: input, shape index: {}]   ;;  %s10869_s17 = inlined_call_operand.vmem [shape: f32[12,128,32], index: 17, kind: input, shape index: {}]   ;;  %s10870_s18 = inlined_call_operand.vmem [shape: f32[12,1,32], index: 18, kind: input, shape index: {}]   ;;  %s10871_s19 = inlined_call_operand.vmem [shape: f32[32,8], index: 19, kind: input, shape index: {}]   ;;  %s10872_s20 = inlined_call_operand.vmem [shape: f32[1,8], index: 20, kind: input, shape index: {}]   ;;  %s10873_s21 = inlined_call_operand.vmem [shape: f32[32,32], index: 21, kind: input, shape index: {}]   ;;  %s10874_s22 = inlined_call_operand.vmem [shape: f32[1,32], index: 22, kind: input, shape index: {}]   ;;  %s10875_s23 = inlined_call_operand.vmem [shape: f32[32,32], index: 23, kind: input, shape index: {}]   ;;  %s10876_s24 = inlined_call_operand.vmem [shape: f32[1,32], index: 24, kind: input, shape index: {}]   ;;  %s10877_s25 = inlined_call_operand.vmem [shape: f32[32,8], index: 25, kind: input, shape index: {}]   ;;  %s10878_s26 = inlined_call_operand.vmem [shape: f32[1,8], index: 26, kind: input, shape index: {}]   ;;  %s10879_s27 = inlined_call_operand.vmem [shape: f32[2,64,8], index: 27, kind: output, shape index: {}]  }
   0x1   :  { %10909 = sst [smem:[#allocation23_spill]] %s10852_s0 }
   0x2   :  { %10910 = sst [smem:[#allocation24_spill]] %s10853_s1 }
   0x3   :  { %10911 = sst [smem:[#allocation25_spill]] %s10854_s2 }
   0x4   :  { %10912 = sst [smem:[#allocation26_spill]] %s10855_s3 }
   0x5   :  { %10913 = sst [smem:[#allocation27_spill]] %s10856_s4 }
   0x6   :  { %10914 = sst [smem:[#allocation28_spill]] %s10857_s5 }
   0x7   :  { %10915 = sst [smem:[#allocation29_spill]] %s10858_s6 }
   0x8   :  { %10916 = sst [smem:[#allocation30_spill]] %s10859_s7  ;;  %s8920_s7 = smov 0  }
   0x9   :  { %10917 = sst [smem:[#allocation31_spill]] %s10860_s8 }
   0xa   :  { %10918 = sst [smem:[#allocation32_spill]] %s10861_s9 }
   0xb   :  { %10919 = sst [smem:[#allocation33_spill]] %s10862_s10 }
   0xc   :  { %10920 = sst [smem:[#allocation34_spill]] %s10863_s11 }
   0xd   :  { %10921 = sst [smem:[#allocation35_spill]] %s10872_s20 }
   0xe   :  { %10922 = sst [smem:[#allocation36_spill]] %s10876_s24 }
   0xf   :  { %10923 = sst [smem:[#allocation37_spill]] %s10878_s26 }
  0x10 LB: > { %10924 = sst [smem:[#allocation2_spill]] %s8724_s7  ;;  %s6551_s4 = sadd.s32 4294967295, %s8724_s7   ;;  %s8724_s7 = sphi %s8920_s7, %s37_s7  }
  0x11   : > { %p6555_p0 = scmp.ge.s32.totalorder %s8724_s7, 1  ;;  %p772_p1 = scmp.lt.s32.totalorder %s8724_s7, 3 }
  0x13   : > { %p773_p2 = pnand %p6555_p0, %p772_p1 }
  0x15   : > { %776 = sbr.rel (%p773_p2) target bundleno = 6594 (0x19c2), region = 128 }
  0x1c   : > { %p859_p3 = scmp.lt.s32.totalorder %s6551_s4, 1  ;;  %v8762_v0 = vmov 0   ;;  %s10925_s28 = sld [smem:[#allocation24_spill]] }
  0x1d   : > { %8153 = vset.pattern.permute.xlu1 %v8762_v0  ;;  %8152 = vset.pattern.permute.xlu0 %v8762_v0  ;;  %s10926_s1 = sld [smem:[#allocation27_spill]]  ;;  %s10928_s20 = sld [smem:[#allocation23_spill]] }
  0x1e   : > { %s10996_s4 = smov (!%p859_p3, %s6551_s4), 1  ;;  %s10929_s7 = sld [smem:[#allocation25_spill]] }
  0x1f   : > { %s6849_s8 = sshll.u32 %s10996_s4, 6  ;;  %s6560_s30 = sshll.u32 %s10996_s4, 3 }
  0x20   : > { %s8941_s3 = scalar_lea.vmem %s10879_s27, %s6849_s8 }
  0x22   : > { %s868_s0 = scalar_lea.vmem %s10925_s28, %s6849_s8 }
  0x23   : > { %s878_s6 = scalar_lea.vmem %s10926_s1, %s6560_s30  ;;  %v895_v2 = vld [vmem:[%s868_s0 + $0x10] sm:$0xff]  ;;  %s863_s24 = scalar_lea.vmem %s10928_s20, %s6849_s8  ;;  %v893_v3 = vld [vmem:[%s868_s0] sm:$0xff]  ;;  %v896_v12 = vld [vmem:[%s868_s0 + $0x18] sm:$0xff] }
  0x24   : > { %v8943_v1 = vld [vmem:[%s878_s6] sm:$0xff]  ;;  %915 = vperm.xlu1 %8153, %v895_v2   ;;  %v8950_v5 = vld [vmem:[%s863_s24 + $0x8] sm:$0xff]   ;;  %v8952_v6 = vld [vmem:[%s863_s24 + $0x10] sm:$0xff]   ;;  %905 = vperm.xlu0 %8152, %v893_v3   ;;  %s871_s8 = scalar_lea.vmem %s10929_s7, %s10996_s4 }
  0x25   : > { %10927 = vst [vmem:[#allocation3_spill] sm:$0xff] %v8943_v1  ;;  %v8948_v4 = vld [vmem:[%s863_s24] sm:$0xff]   ;;  %v8954_v7 = vld [vmem:[%s863_s24 + $0x18] sm:$0xff]   ;;  %v8958_v9 = vld [vmem:[%s863_s24 + $0x28] sm:$0xff]  }
  0x26   : > { %v8956_v8 = vld [vmem:[%s863_s24 + $0x20] sm:$0xff]   ;;  %v8960_v10 = vld [vmem:[%s863_s24 + $0x30] sm:$0xff]   ;;  %v8962_v11 = vld [vmem:[%s863_s24 + $0x38] sm:$0xff]   ;;  %s10930_s24 = sld [smem:[#allocation26_spill]] }
  0x27   : > { %v894_v13 = vld [vmem:[%s868_s0 + $0x8] sm:$0xff]  ;;  %v897_v15 = vld [vmem:[%s868_s0 + $0x20] sm:$0xff]  ;;  %v900_v16 = vld [vmem:[%s868_s0 + $0x38] sm:$0xff] }
  0x28   : > { %920 = vperm.xlu1 %8153, %v896_v12   ;;  %910 = vperm.xlu0 %8152, %v894_v13   ;;  %v898_v14 = vld [vmem:[%s868_s0 + $0x28] sm:$0xff]  ;;  %v899_v17 = vld [vmem:[%s868_s0 + $0x30] sm:$0xff]  ;;  %v6563_v18 = vld [vmem:[%s871_s8] ss:$0 sm:$0xff] }
  0x2c   : > { %930 = vperm.xlu1 %8153, %v898_v14   ;;  %925 = vperm.xlu0 %8152, %v897_v15   ;;  %s874_s5 = scalar_lea.vmem %s10930_s24, %s10996_s4  ;;  %s9028_s4 = smov 0  }
  0x2d   : > { %v6572_v19 = vld [vmem:[%s874_s5] ss:$0 sm:$0xff] }
  0x30   : > { %940 = vperm.xlu1 %8153, %v900_v16   ;;  %935 = vperm.xlu0 %8152, %v899_v17  }
  0xa3   : > { %v916_v20 = vpop.permute.xlu1 %915  ;;  %v906_v21 = vpop.permute.xlu0 %905 }
  0xa4   : > { %v951_v22 = vmul.f32 %v6563_v18, %v916_v20  ;;  %v981_v23 = vmul.f32 %v6572_v19, %v916_v20  ;;  %v949_v24 = vmul.f32 %v6563_v18, %v906_v21  ;;  %v979_v25 = vmul.f32 %v6572_v19, %v906_v21 }
  0xa6   : > { %v6566_v26 = vadd.f32 -1.0, %v951_v22  ;;  %v6575_v27 = vadd.f32 -1.0, %v981_v23  ;;  %v6564_v28 = vadd.f32 -1.0, %v949_v24  ;;  %v6573_v29 = vadd.f32 -1.0, %v979_v25 }
  0xa7   : > { %v921_v30 = vpop.permute.xlu1 %920  ;;  %v911_v31 = vpop.permute.xlu0 %910 }
  0xa8   : > { %v8972_v32 = vmul.f32 1e+09, %v6566_v26  ;;  %v8974_v33 = vmul.f32 1e+09, %v6575_v27  ;;  %v8976_v34 = vmul.f32 1e+09, %v6564_v28  ;;  %v952_v35 = vmul.f32 %v6563_v18, %v921_v30 }
  0xa9   : > { %v8978_v36 = vmul.f32 1e+09, %v6573_v29  ;;  %v982_v37 = vmul.f32 %v6572_v19, %v921_v30  ;;  %v950_v38 = vmul.f32 %v6563_v18, %v911_v31  ;;  %v980_v39 = vmul.f32 %v6572_v19, %v911_v31 }
  0xaa   : > { %10931 = vst [vmem:[#allocation4_spill] sm:$0xff] %v8972_v32  ;;  %10932 = vst [vmem:[#allocation5_spill] sm:$0xff] %v8974_v33  ;;  %v6567_v40 = vadd.f32 -1.0, %v952_v35 }
  0xab   : > { %10933 = vst [vmem:[#allocation6_spill] sm:$0xff] %v8976_v34  ;;  %10934 = vst [vmem:[#allocation7_spill] sm:$0xff] %v8978_v36  ;;  %v6576_v41 = vadd.f32 -1.0, %v982_v37  ;;  %v6565_v42 = vadd.f32 -1.0, %v950_v38  ;;  %v6574_v43 = vadd.f32 -1.0, %v980_v39  ;;  %v931_v44 = vpop.permute.xlu1 %930  ;;  %v926_v45 = vpop.permute.xlu0 %925 }
  0xac   : > { %v8980_v46 = vmul.f32 1e+09, %v6567_v40  ;;  %v954_v47 = vmul.f32 %v6563_v18, %v931_v44  ;;  %v984_v48 = vmul.f32 %v6572_v19, %v931_v44  ;;  %v953_v49 = vmul.f32 %v6563_v18, %v926_v45 }
  0xad   : > { %v8982_v50 = vmul.f32 1e+09, %v6576_v41  ;;  %v8984_v51 = vmul.f32 1e+09, %v6565_v42  ;;  %v8986_v52 = vmul.f32 1e+09, %v6574_v43  ;;  %v983_v53 = vmul.f32 %v6572_v19, %v926_v45 }
  0xae   : > { %v6569_v54 = vadd.f32 -1.0, %v954_v47  ;;  %v6578_v55 = vadd.f32 -1.0, %v984_v48  ;;  %v6568_v56 = vadd.f32 -1.0, %v953_v49 }
  0xaf   : > { %10935 = vst [vmem:[#allocation8_spill] sm:$0xff] %v8982_v50  ;;  %10936 = vst [vmem:[#allocation9_spill] sm:$0xff] %v8986_v52  ;;  %v6577_v57 = vadd.f32 -1.0, %v983_v53  ;;  %v941_v58 = vpop.permute.xlu1 %940  ;;  %v936_v59 = vpop.permute.xlu0 %935 }
  0xb0   : > { %v8988_v60 = vmul.f32 1e+09, %v6569_v54  ;;  %v8990_v61 = vmul.f32 1e+09, %v6578_v55  ;;  %v8992_v62 = vmul.f32 1e+09, %v6568_v56  ;;  %v956_v63 = vmul.f32 %v6563_v18, %v941_v58 }
  0xb1   : > { %v8994_v0 = vmul.f32 1e+09, %v6577_v57  ;;  %v986_v2 = vmul.f32 %v6572_v19, %v941_v58  ;;  %v955_v3 = vmul.f32 %v6563_v18, %v936_v59  ;;  %v985_v12 = vmul.f32 %v6572_v19, %v936_v59 }
  0xb2   : > { %10937 = vst [vmem:[#allocation10_spill] sm:$0xff] %v8990_v61  ;;  %v6571_v13 = vadd.f32 -1.0, %v956_v63 }
  0xb3   : > { %10938 = vst [vmem:[#allocation11_spill] sm:$0xff] %v8994_v0  ;;  %v6580_v14 = vadd.f32 -1.0, %v986_v2  ;;  %v6570_v15 = vadd.f32 -1.0, %v955_v3  ;;  %v6579_v16 = vadd.f32 -1.0, %v985_v12 }
  0xb4   : > { %v8996_v17 = vmul.f32 1e+09, %v6571_v13 }
  0xb5   : > { %v8998_v20 = vmul.f32 1e+09, %v6580_v14  ;;  %v9000_v21 = vmul.f32 1e+09, %v6570_v15  ;;  %v9002_v22 = vmul.f32 1e+09, %v6579_v16 }
  0xb6   : > { %10939 = vst [vmem:[#allocation12_spill] sm:$0xff] %v8996_v17 }
  0xb7   : > { %10940 = vst [vmem:[#allocation13_spill] sm:$0xff] %v8998_v20  ;;  %10941 = vst [vmem:[#allocation14_spill] sm:$0xff] %v9000_v21 }
  0xb8   : > { %10942 = vst [vmem:[#allocation15_spill] sm:$0xff] %v9002_v22 }
  0xb9 LB: >> { %v10943_v34 = vld [vmem:[#allocation6_spill] sm:$0xff]  ;;  %v10944_v32 = vld [vmem:[#allocation4_spill] sm:$0xff]  ;;  %10947 = vst [vmem:[#allocation16_spill] sm:$0xff] %v8728_v11  ;;  %10948 = vst [vmem:[#allocation17_spill] sm:$0xff] %v8732_v10  ;;  %vm1017_vm0 = vcmask 261120   ;;  %s9122_s28 = sshll.u32 %s8760_s4, 5  ;;  %v8740_v8 = vphi %v8956_v8, %v10986_v8   ;;  %v8736_v9 = vphi %v8958_v9, %v10985_v9   ;;  %v8732_v10 = vphi %v8960_v10, %v10984_v10   ;;  %v8728_v11 = vphi %v8962_v11, %v10983_v11   ;;  %s8760_s4 = sphi %s9028_s4, %s1008_s4   ;;  %v8756_v4 = vphi %v8948_v4, %v10990_v4   ;;  %v8752_v5 = vphi %v8950_v5, %v10989_v5   ;;  %v8748_v6 = vphi %v8952_v6, %v10988_v6   ;;  %v8744_v7 = vphi %v8954_v7, %v10987_v7  }
  0xba   : >> { %10949 = vst [vmem:[#allocation18_spill] sm:$0xff] %v8736_v9  ;;  %10950 = vst [vmem:[#allocation19_spill] sm:$0xff] %v8740_v8  ;;  %v1018_v18 = vsel %vm1017_vm0, %v8756_v4, 0.0  ;;  %v1024_v19 = vsel %vm1017_vm0, %v8748_v6, 0.0  ;;  %v1021_v23 = vsel %vm1017_vm0, %v8752_v5, 0.0  ;;  %v1027_v24 = vsel %vm1017_vm0, %v8744_v7, 0.0 }
  0xbb   : >> { %10951 = vst [vmem:[#allocation20_spill] sm:$0xff] %v8744_v7  ;;  %10952 = vst [vmem:[#allocation21_spill] sm:$0xff] %v8748_v6  ;;  %1019 = vadd.xlane.f32.xlu0 %v1018_v18  ;;  %1025 = vadd.xlane.f32.xlu1 %v1024_v19  ;;  %v1030_v25 = vsel %vm1017_vm0, %v8740_v8, 0.0  ;;  %v1033_v26 = vsel %vm1017_vm0, %v8736_v9, 0.0  ;;  %v1036_v27 = vsel %vm1017_vm0, %v8732_v10, 0.0  ;;  %v1039_v28 = vsel %vm1017_vm0, %v8728_v11, 0.0 }
  0xbc   : >> { %10953 = vst [vmem:[#allocation22_spill] sm:$0xff] %v8756_v4  ;;  %s10954_s29 = sld [smem:[#allocation28_spill]]  ;;  %s10955_s2 = sld [smem:[#allocation29_spill]]  ;;  %vm1297_vm1 = vcmask 64512   ;;  %vm1451_vm3 = vcmask 523264   ;;  %vm3075_vm4 = vcmask 130048  }
  0xbd   : >> { %v10946_v17 = vld [vmem:[#allocation12_spill] sm:$0xff]  ;;  %s8763_s26 = smov 96   ;;  %s8764_s7 = smov 64   ;;  %vm9196_vm2 = vmpackc.low %vm1297_vm1, %vm1297_vm1  ;;  %vm3084_vm5 = vcmask 195584   ;;  %vm8778_vm6 = vmmov 0  }
  0xbe   : >> { %v10945_v21 = vld [vmem:[#allocation14_spill] sm:$0xff]  ;;  %s8765_s8 = smov 88   ;;  %s8766_s30 = smov 80  }
  0xbf   : >> { %1022 = vadd.xlane.f32.xlu0 %v1021_v23  ;;  %1028 = vadd.xlane.f32.xlu1 %v1027_v24  ;;  %s8767_s9 = smov 120   ;;  %s8768_s24 = smov 112  }
  0xc0   : >> { %s8769_s5 = smov 56   ;;  %s8770_s0 = smov 48  }
  0xc1   : >> { %s8771_s10 = smov 72   ;;  %s10900_s6 = smov 8  }
  0xc2   : >> { %s1124_s1 = scalar_lea.vmem %s10954_s29, %s9122_s28  ;;  %s1129_s20 = scalar_lea.vmem %s10955_s2, %s8760_s4 }
  0xc3   : >> { %1031 = vadd.xlane.f32.xlu0 %v1030_v25  ;;  %1034 = vadd.xlane.f32.xlu1 %v1033_v26  ;;  %s8772_s29 = smov 104   ;;  %s10898_s11 = smov 16  }
  0xc4   : >> { %s10967_s2 = sld [smem:[#allocation34_spill]] }
  0xc7   : >> { %1037 = vadd.xlane.f32.xlu0 %v1036_v27  ;;  %1040 = vadd.xlane.f32.xlu1 %v1039_v28 }
 0x148   : >> { %v1020_v29 = vpop.xlane.xlu0 %1019  ;;  %v1026_v30 = vpop.xlane.xlu1 %1025 }
 0x149   : >> { %v1043_v31 = vmul.f32 0.03125, %v1020_v29  ;;  %v1045_v35 = vmul.f32 0.03125, %v1026_v30  ;;  %v1125_v30 = vld [vmem:[%s1124_s1] sm:$0xff] }
 0x14b   : >> { %v9074_v37 = vsub.f32 %v8756_v4, %v1043_v31  ;;  %v9077_v38 = vsub.f32 %v8748_v6, %v1045_v35  ;;  %v1126_v31 = vld [vmem:[%s1124_s1 + $0x8] sm:$0xff] }
 0x14c   : >> { %v1023_v39 = vpop.xlane.xlu0 %1022  ;;  %v1029_v40 = vpop.xlane.xlu1 %1028  ;;  %v7760_v35 = vpack.c.bf16 %v1126_v31, %v1125_v30 }
 0x14d   : >> { %v1044_v41 = vmul.f32 0.03125, %v1023_v39  ;;  %v1046_v42 = vmul.f32 0.03125, %v1029_v40  ;;  %v1059_v43 = vmul.f32 %v9074_v37, %v9074_v37  ;;  %v1061_v44 = vmul.f32 %v9077_v38, %v9077_v38  ;;  %v1127_v39 = vld [vmem:[%s1124_s1 + $0x10] sm:$0xff]  ;;  %v1128_v40 = vld [vmem:[%s1124_s1 + $0x18] sm:$0xff]  ;;  %s8773_s1 = smov 40  }
 0x14e   : >> { %7761 = vmatprep.subr.bf16.mxu0 %v7760_v35 }
 0x14f   : >> { %v9084_v45 = vsub.f32 %v8752_v5, %v1044_v41  ;;  %v9087_v47 = vsub.f32 %v8744_v7, %v1046_v42  ;;  %v1067_v48 = vsel %vm1017_vm0, %v1059_v43, 0.0  ;;  %v1073_v54 = vsel %vm1017_vm0, %v1061_v44, 0.0  ;;  %7763 = vmatpush3.bf16.msra.mxu0 %v7760_v35 }
 0x150   : >> { %v1032_v49 = vpop.xlane.xlu0 %1031  ;;  %1068 = vadd.xlane.f32.xlu0 %v1067_v48  ;;  %v1035_v53 = vpop.xlane.xlu1 %1034  ;;  %v7764_v41 = vpack.c.bf16 %v1128_v40, %v1127_v39 }
 0x151   : >> { %v1047_v55 = vmul.f32 0.03125, %v1032_v49  ;;  %v1048_v56 = vmul.f32 0.03125, %v1035_v53  ;;  %v1060_v57 = vmul.f32 %v9084_v45, %v9084_v45  ;;  %v1062_v58 = vmul.f32 %v9087_v47, %v9087_v47 }
 0x152   : >> { %7765 = vmatprep.subr.bf16.mxu0 %v7764_v41 }
 0x153   : >> { %v9096_v59 = vsub.f32 %v8740_v8, %v1047_v55  ;;  %v9099_v63 = vsub.f32 %v8736_v9, %v1048_v56  ;;  %v1070_v2 = vsel %vm1017_vm0, %v1060_v57, 0.0  ;;  %v1076_v12 = vsel %vm1017_vm0, %v1062_v58, 0.0  ;;  %7767 = vmatpush3.bf16.msra.mxu0 %v7764_v41 }
 0x154   : >> { %1074 = vadd.xlane.f32.xlu0 %v1073_v54  ;;  %v1038_v3 = vpop.xlane.xlu0 %1037  ;;  %1071 = vadd.xlane.f32.xlu1 %v1070_v2  ;;  %v1041_v13 = vpop.xlane.xlu1 %1040 }
 0x155   : >> { %v1049_v14 = vmul.f32 0.03125, %v1038_v3  ;;  %v1063_v15 = vmul.f32 %v9096_v59, %v9096_v59  ;;  %v1050_v16 = vmul.f32 0.03125, %v1041_v13  ;;  %v1064_v18 = vmul.f32 %v9099_v63, %v9099_v63 }
 0x157   : >> { %v9108_v19 = vsub.f32 %v8732_v10, %v1049_v14  ;;  %v1079_v23 = vsel %vm1017_vm0, %v1063_v15, 0.0  ;;  %v9112_v24 = vsub.f32 %v8728_v11, %v1050_v16  ;;  %v1082_v26 = vsel %vm1017_vm0, %v1064_v18, 0.0 }
 0x158   : >> { %1080 = vadd.xlane.f32.xlu0 %v1079_v23  ;;  %1077 = vadd.xlane.f32.xlu1 %v1076_v12 }
 0x159   : >> { %v1065_v25 = vmul.f32 %v9108_v19, %v9108_v19  ;;  %v1066_v27 = vmul.f32 %v9112_v24, %v9112_v24 }
 0x15b   : >> { %v1085_v28 = vsel %vm1017_vm0, %v1065_v25, 0.0  ;;  %v1088_v29 = vsel %vm1017_vm0, %v1066_v27, 0.0 }
 0x15c   : >> { %1086 = vadd.xlane.f32.xlu0 %v1085_v28  ;;  %1083 = vadd.xlane.f32.xlu1 %v1082_v26 }
 0x160   : >> { %1089 = vadd.xlane.f32.xlu1 %v1088_v29 }
 0x1dd   : >> { %v1069_v42 = vpop.xlane.xlu0 %1068 }
 0x1de   : >> { %v1091_v43 = vmul.f32 0.03125, %v1069_v42 }
 0x1e0   : >> { %v1099_v44 = vadd.f32 1e-05, %v1091_v43 }
 0x1e1   : >> { %v1075_v48 = vpop.xlane.xlu0 %1074  ;;  %v1072_v49 = vpop.xlane.xlu1 %1071 }
 0x1e2   : >> { %8314 = vrsqrt.f32 %v1099_v44  ;;  %v1093_v53 = vmul.f32 0.03125, %v1075_v48  ;;  %v1092_v54 = vmul.f32 0.03125, %v1072_v49 }
 0x1e4   : >> { %v1101_v55 = vadd.f32 1e-05, %v1093_v53  ;;  %v1100_v56 = vadd.f32 1e-05, %v1092_v54 }
 0x1e5   : >> { %v1081_v57 = vpop.xlane.xlu0 %1080  ;;  %v1078_v58 = vpop.xlane.xlu1 %1077 }
 0x1e6   : >> { %8316 = vrsqrt.f32 %v1101_v55  ;;  %v1095_v2 = vmul.f32 0.03125, %v1081_v57  ;;  %v1094_v3 = vmul.f32 0.03125, %v1078_v58 }
 0x1e7   : >> { %8318 = vrsqrt.f32 %v1100_v56 }
 0x1e8   : >> { %v1103_v12 = vadd.f32 1e-05, %v1095_v2  ;;  %v1102_v13 = vadd.f32 1e-05, %v1094_v3 }
 0x1e9   : >> { %v1087_v14 = vpop.xlane.xlu0 %1086  ;;  %v1084_v15 = vpop.xlane.xlu1 %1083 }
 0x1ea   : >> { %8320 = vrsqrt.f32 %v1103_v12  ;;  %v1097_v16 = vmul.f32 0.03125, %v1087_v14  ;;  %v1096_v18 = vmul.f32 0.03125, %v1084_v15 }
 0x1eb   : >> { %8322 = vrsqrt.f32 %v1102_v13 }
 0x1ec   : >> { %v8315_v23 = vpop.eup %8314  ;;  %v1105_v25 = vadd.f32 1e-05, %v1097_v16  ;;  %v1104_v26 = vadd.f32 1e-05, %v1096_v18 }
 0x1ed   : >> { %v1090_v27 = vpop.xlane.xlu1 %1089  ;;  %v1115_v28 = vmul.f32 %v8315_v23, %v9074_v37 }
 0x1ee   : >> { %8324 = vrsqrt.f32 %v1105_v25  ;;  %v1098_v29 = vmul.f32 0.03125, %v1090_v27 }
 0x1ef   : >> { %8326 = vrsqrt.f32 %v1104_v26  ;;  %7197 = vmatprep.mubr.msk.f32.mxu0 %vm1017_vm0, %v1115_v28 }
 0x1f0   : >> { %v8317_v30 = vpop.eup %8316  ;;  %v1106_v31 = vadd.f32 1e-05, %v1098_v29 }
 0x1f1   : >> { %v8319_v35 = vpop.eup %8318  ;;  %v1117_v39 = vmul.f32 %v8317_v30, %v9077_v38 }
 0x1f2   : >> { %8328 = vrsqrt.f32 %v1106_v31  ;;  %v1116_v40 = vmul.f32 %v8319_v35, %v9084_v45 }
 0x1f4   : >> { %v8321_v41 = vpop.eup %8320  ;;  %7198 = vmatmul.mubr.msk.f32.vlgmr.msra.gmra.mrb[0].mxu0 %vm1017_vm0, %v1116_v40 }
 0x1f5   : >> { %v8323_v42 = vpop.eup %8322  ;;  %7200 = vmatprep.mubr.msk.f32.mxu0 %vm1017_vm0, %v1117_v39  ;;  %v1119_v37 = vmul.f32 %v8321_v41, %v9096_v59 }
 0x1f6   : >> { %v1118_v43 = vmul.f32 %v8323_v42, %v9087_v47  ;;  %v6582_v47 = vld [vmem:[%s1129_s20] ss:$0 sm:$0xff]  ;;  %s10959_s20 = sld [smem:[#allocation31_spill]] }
 0x1f8   : >> { %v8325_v44 = vpop.eup %8324  ;;  %7201 = vmatmul.mubr.msk.f32.gmra.mrb[2].mxu0 %vm1017_vm0, %v1118_v43 }
 0x1f9   : >> { %v8327_v48 = vpop.eup %8326  ;;  %7203 = vmatprep.mubr.msk.f32.mxu0 %vm1017_vm0, %v1119_v37  ;;  %v1121_v38 = vmul.f32 %v8325_v44, %v9108_v19 }
 0x1fa   : >> { %v1120_v45 = vmul.f32 %v8327_v48, %v9099_v63 }
 0x1fc   : >> { %v8329_v49 = vpop.eup %8328  ;;  %7204 = vmatmul.mubr.msk.f32.gmra.mrb[4].mxu0 %vm1017_vm0, %v1120_v45 }
 0x1fd   : >> { %7206 = vmatprep.mubr.msk.f32.mxu0 %vm1017_vm0, %v1121_v38  ;;  %v1122_v53 = vmul.f32 %v8329_v49, %v9112_v24 }
 0x200   : >> { %7207 = vmatmul.mubr.msk.f32.gmra.mrb[6].mxu0 %vm1017_vm0, %v1122_v53 }
 0x2c7   : >> { %v7199_v59 = vpop.f32.mrb[0].mxu0 }
 0x2c8   : >> { %v9148_v54 = vadd.f32 %v7199_v59, %v6582_v47  ;;  %v1227_v19 = vpop.f32.mrb[1].mxu0 }
 0x2c9   : >> { %v9150_v63 = vadd.f32 %v6582_v47, %v1227_v19 }
 0x2cb   : >> { %v7202_v55 = vpop.f32.mrb[2].mxu0  ;;  %7225 = vmatprep.mubr.msk.f32.mxu1 %vm1297_vm1, %v9150_v63  ;;  %v9156_v24 = vpack.i.bf16 %v9148_v54, %v9150_v63 }
 0x2cc   : >> { %v9158_v56 = vadd.f32 %v7202_v55, %v6582_v47  ;;  %v1237_v57 = vpop.f32.mrb[3].mxu0 }
 0x2cd   : >> { %v9160_v58 = vadd.f32 %v6582_v47, %v1237_v57  ;;  %8155 = vrot.lane.b32.xlu0 %v9156_v24, %s8763_s26 }
 0x2cf   : >> { %v7205_v2 = vpop.f32.mrb[4].mxu0  ;;  %v9166_v3 = vpack.i.bf16 %v9158_v56, %v9160_v58 }
 0x2d0   : >> { %v9168_v12 = vadd.f32 %v7205_v2, %v6582_v47  ;;  %v1247_v13 = vpop.f32.mrb[5].mxu0 }
 0x2d1   : >> { %v9170_v14 = vadd.f32 %v6582_v47, %v1247_v13  ;;  %8175 = vrot.lane.b32.xlu0 %v9156_v24, %s8764_s7  ;;  %8160 = vrot.lane.b32.xlu1 %v9166_v3, %s8763_s26 }
 0x2d3   : >> { %v7208_v15 = vpop.f32.mrb[6].mxu0  ;;  %v9177_v16 = vpack.i.bf16 %v9168_v12, %v9170_v14 }
 0x2d4   : >> { %v9179_v18 = vadd.f32 %v7208_v15, %v6582_v47  ;;  %v1257_v23 = vpop.f32.mrb[7].mxu0 }
 0x2d5   : >> { %v9181_v25 = vadd.f32 %v6582_v47, %v1257_v23  ;;  %8165 = vrot.lane.b32.xlu1 %v9177_v16, %s8763_s26 }
 0x2d7   : >> { %v9187_v26 = vpack.i.bf16 %v9179_v18, %v9181_v25 }
 0x2d9   : >> { %8170 = vrot.lane.b32.xlu1 %v9187_v26, %s8763_s26 }
 0x2dd   : >> { %8180 = vrot.lane.b32.xlu1 %v9166_v3, %s8764_s7 }
 0x2e1   : >> { %8185 = vrot.lane.b32.xlu1 %v9177_v16, %s8764_s7 }
 0x2e5   : >> { %8190 = vrot.lane.b32.xlu1 %v9187_v26, %s8764_s7  ;;  %s10958_s7 = sld [smem:[#allocation30_spill]] }
 0x33f   : >> { %v8156_v27 = vpop.permute.xlu0 %8155 }
 0x340   : >> { %v8158_v28 = vunpack.i.h.bf16 %v8156_v27  ;;  %v8157_v29 = vunpack.i.l.bf16 %v8156_v27 }
 0x342   : >> { %v7768_v31 = vpack.c.bf16 %v8158_v28, %v8157_v29 }
 0x343   : >> { %v8176_v35 = vpop.permute.xlu0 %8175  ;;  %v8161_v39 = vpop.permute.xlu1 %8160 }
 0x344   : >> { %v8178_v40 = vunpack.i.h.bf16 %v8176_v35  ;;  %v8177_v41 = vunpack.i.l.bf16 %v8176_v35  ;;  %v8163_v42 = vunpack.i.h.bf16 %v8161_v39  ;;  %v8162_v37 = vunpack.i.l.bf16 %v8161_v39  ;;  %7770 = vmatprep.subr.msk.bf16.mxu1 %vm9196_vm2, %v7768_v31 }
 0x345   : >> { %7773 = vmatpush3.bf16.xpose.msk.msra.mxu1 %vm9196_vm2, %v7768_v31 }
 0x346   : >> { %v7774_v43 = vpack.c.bf16 %v8163_v42, %v8162_v37  ;;  %v7792_v44 = vpack.c.bf16 %v8178_v40, %v8177_v41 }
 0x347   : >> { %v8166_v48 = vpop.permute.xlu1 %8165 }
 0x348   : >> { %v8168_v38 = vunpack.i.h.bf16 %v8166_v48  ;;  %v8167_v45 = vunpack.i.l.bf16 %v8166_v48  ;;  %7776 = vmatprep.subr.msk.bf16.mxu1 %vm9196_vm2, %v7774_v43  ;;  %7793 = vmatprep.subr.bf16.mxu0 %v7792_v44 }
 0x349   : >> { %7795 = vmatpush3.bf16.msra.mxu0 %v7792_v44 }
 0x34a   : >> { %v7780_v53 = vpack.c.bf16 %v8168_v38, %v8167_v45 }
 0x34b   : >> { %v8171_v49 = vpop.permute.xlu1 %8170 }
 0x34c   : >> { %v8173_v59 = vunpack.i.h.bf16 %v8171_v49  ;;  %v8172_v19 = vunpack.i.l.bf16 %v8171_v49 }
 0x34d   : >> { %7779 = vmatpush3.bf16.xpose.msk.msra.mxu1 %vm9196_vm2, %v7774_v43 }
 0x34e   : >> { %7782 = vmatprep.subr.msk.bf16.mxu1 %vm9196_vm2, %v7780_v53  ;;  %v7786_v15 = vpack.c.bf16 %v8173_v59, %v8172_v19 }
 0x34f   : >> { %v8181_v47 = vpop.permute.xlu1 %8180 }
 0x350   : >> { %v8183_v55 = vunpack.i.h.bf16 %v8181_v47  ;;  %v8182_v57 = vunpack.i.l.bf16 %v8181_v47 }
 0x352   : >> { %v7796_v2 = vpack.c.bf16 %v8183_v55, %v8182_v57 }
 0x353   : >> { %v8186_v13 = vpop.permute.xlu1 %8185 }
 0x354   : >> { %v8188_v23 = vunpack.i.h.bf16 %v8186_v13  ;;  %v8187_v27 = vunpack.i.l.bf16 %v8186_v13  ;;  %7797 = vmatprep.subr.bf16.mxu0 %v7796_v2 }
 0x355   : >> { %7785 = vmatpush3.bf16.xpose.msk.msra.mxu1 %vm9196_vm2, %v7780_v53  ;;  %7799 = vmatpush3.bf16.msra.mxu0 %v7796_v2 }
 0x356   : >> { %7788 = vmatprep.subr.msk.bf16.mxu1 %vm9196_vm2, %v7786_v15  ;;  %v7800_v28 = vpack.c.bf16 %v8188_v23, %v8187_v27 }
 0x357   : >> { %v8191_v29 = vpop.permute.xlu1 %8190 }
 0x358   : >> { %v8193_v31 = vunpack.i.h.bf16 %v8191_v29  ;;  %v8192_v35 = vunpack.i.l.bf16 %v8191_v29  ;;  %7801 = vmatprep.subr.bf16.mxu0 %v7800_v28 }
 0x359   : >> { %7803 = vmatpush3.bf16.msra.mxu0 %v7800_v28 }
 0x35a   : >> { %v7804_v39 = vpack.c.bf16 %v8193_v31, %v8192_v35 }
 0x35c   : >> { %7805 = vmatprep.subr.bf16.mxu0 %v7804_v39 }
 0x35d   : >> { %7791 = vmatpush3.bf16.xpose.msk.msra.mxu1 %vm9196_vm2, %v7786_v15  ;;  %7807 = vmatpush3.bf16.msra.mxu0 %v7804_v39 }
 0x364   : >> { %7226 = vmatmul.mubr.msk.f32.vlgmr.msra.gmra.mrb[0].mxu1 %vm1297_vm1, %v9148_v54 }
 0x365   : >> { %7228 = vmatprep.mubr.msk.f32.mxu1 %vm1297_vm1, %v9160_v58 }
 0x368   : >> { %7229 = vmatmul.mubr.msk.f32.gmra.mrb[2].mxu1 %vm1297_vm1, %v9158_v56 }
 0x369   : >> { %7231 = vmatprep.mubr.msk.f32.mxu1 %vm1297_vm1, %v9170_v14 }
 0x36c   : >> { %7232 = vmatmul.mubr.msk.f32.gmra.mrb[4].mxu1 %vm1297_vm1, %v9168_v12 }
 0x36d   : >> { %7234 = vmatprep.mubr.msk.f32.mxu1 %vm1297_vm1, %v9181_v25 }
 0x370   : >> { %7235 = vmatmul.mubr.msk.f32.gmra.mrb[6].mxu1 %vm1297_vm1, %v9179_v18 }
 0x437   : >> { %v7227_v40 = vpop.f32.mrb[0].mxu1 }
 0x438   : >> { %v1436_v41 = vmul.f32 0.35355338, %v7227_v40  ;;  %v1396_v42 = vpop.f32.mrb[1].mxu1 }
 0x439   : >> { %v1435_v37 = vmul.f32 0.35355338, %v1396_v42 }
 0x43a   : >> { %v1444_v43 = vadd.f32 %v1436_v41, %v8984_v51 }
 0x43b   : >> { %v1443_v44 = vadd.f32 %v1435_v37, %v10943_v34  ;;  %v7230_v48 = vpop.f32.mrb[2].mxu1 }
 0x43c   : >> { %v1438_v38 = vmul.f32 0.35355338, %v7230_v48  ;;  %v1406_v45 = vpop.f32.mrb[3].mxu1  ;;  %v1455_v49 = vsel %vm1451_vm3, %v1444_v43, -inf }
 0x43d   : >> { %v1437_v53 = vmul.f32 0.35355338, %v1406_v45  ;;  %1456 = vmax.xlane.f32.xlu1 %v1455_v49  ;;  %v1452_v47 = vsel %vm1451_vm3, %v1443_v44, -inf }
 0x43e   : >> { %v1446_v59 = vadd.f32 %v1438_v38, %v8980_v46  ;;  %1453 = vmax.xlane.f32.xlu0 %v1452_v47 }
 0x43f   : >> { %v7233_v19 = vpop.f32.mrb[4].mxu1  ;;  %v1445_v13 = vadd.f32 %v1437_v53, %v10944_v32 }
 0x440   : >> { %v1440_v55 = vmul.f32 0.35355338, %v7233_v19  ;;  %v1416_v57 = vpop.f32.mrb[5].mxu1  ;;  %v1461_v2 = vsel %vm1451_vm3, %v1446_v59, -inf }
 0x441   : >> { %v1439_v15 = vmul.f32 0.35355338, %v1416_v57  ;;  %v1458_v40 = vsel %vm1451_vm3, %v1445_v13, -inf }
 0x442   : >> { %v1448_v23 = vadd.f32 %v1440_v55, %v8988_v60  ;;  %1462 = vmax.xlane.f32.xlu0 %v1461_v2 }
 0x443   : >> { %v7236_v27 = vpop.f32.mrb[6].mxu1  ;;  %v1447_v35 = vadd.f32 %v1439_v15, %v8992_v62 }
 0x444   : >> { %v1442_v28 = vmul.f32 0.35355338, %v7236_v27  ;;  %v1426_v29 = vpop.f32.mrb[7].mxu1  ;;  %v1467_v31 = vsel %vm1451_vm3, %v1448_v23, -inf }
 0x445   : >> { %v1441_v39 = vmul.f32 0.35355338, %v1426_v29  ;;  %1468 = vmax.xlane.f32.xlu1 %v1467_v31  ;;  %v1464_v48 = vsel %vm1451_vm3, %v1447_v35, -inf }
 0x446   : >> { %v9242_v41 = vadd.f32 %v1442_v28, %v10946_v17  ;;  %1459 = vmax.xlane.f32.xlu0 %v1458_v40 }
 0x447   : >> { %v9247_v37 = vadd.f32 %v1441_v39, %v10945_v21 }
 0x448   : >> { %v1473_v42 = vsel %vm1451_vm3, %v9242_v41, -inf }
 0x449   : >> { %1474 = vmax.xlane.f32.xlu1 %v1473_v42  ;;  %v1470_v38 = vsel %vm1451_vm3, %v9247_v37, -inf }
 0x44a   : >> { %1465 = vmax.xlane.f32.xlu0 %v1464_v48 }
 0x44e   : >> { %1471 = vmax.xlane.f32.xlu0 %v1470_v38 }
 0x45a   : >> { %8200 = vrot.lane.b32.xlu1 %v9166_v3, %s8765_s8 }
 0x464   : >> { %8195 = vrot.lane.b32.xlu0 %v9156_v24, %s8765_s8 }
 0x4ca   : >> { %v1457_v45 = vpop.xlane.xlu1 %1456 }
 0x4cb   : >> { %v1477_v49 = vsub.f32 %v1444_v43, %v1457_v45  ;;  %v1454_v53 = vpop.xlane.xlu0 %1453 }
 0x4cc   : >> { %v1476_v47 = vsub.f32 %v1443_v44, %v1454_v53 }
 0x4cd   : >> { %v1486_v19 = vmul.f32 1.442695, %v1477_v49 }
 0x4ce   : >> { %v1484_v55 = vmul.f32 1.442695, %v1476_v47 }
 0x4cf   : >> { %8330 = vpow2.f32 %v1486_v19  ;;  %v1463_v57 = vpop.xlane.xlu0 %1462 }
 0x4d0   : >> { %8332 = vpow2.f32 %v1484_v55  ;;  %v1479_v48 = vsub.f32 %v1446_v59, %v1463_v57 }
 0x4d2   : >> { %v1469_v45 = vpop.xlane.xlu1 %1468  ;;  %v1490_v49 = vmul.f32 1.442695, %v1479_v48 }
 0x4d3   : >> { %v1460_v2 = vpop.xlane.xlu0 %1459  ;;  %v1481_v53 = vsub.f32 %v1448_v23, %v1469_v45 }
 0x4d4   : >> { %v1478_v38 = vsub.f32 %v1445_v13, %v1460_v2  ;;  %8334 = vpow2.f32 %v1490_v49 }
 0x4d5   : >> { %v1494_v19 = vmul.f32 1.442695, %v1481_v53 }
 0x4d6   : >> { %v1488_v47 = vmul.f32 1.442695, %v1478_v38  ;;  %v1475_v2 = vpop.xlane.xlu1 %1474 }
 0x4d7   : >> { %v1466_v15 = vpop.xlane.xlu0 %1465 }
 0x4d8   : >> { %8336 = vpow2.f32 %v1488_v47  ;;  %v1480_v55 = vsub.f32 %v1447_v35, %v1466_v15  ;;  %v1483_v15 = vsub.f32 %v9242_v41, %v1475_v2 }
 0x4d9   : >> { %v9256_v27 = vpop.eup %8330  ;;  %8338 = vpow2.f32 %v1494_v19 }
 0x4da   : >> { %v9258_v28 = vpop.eup %8332  ;;  %v1503_v29 = vsel %vm1451_vm3, %v9256_v27, 0.0  ;;  %v8201_v49 = vpop.permute.xlu1 %8200 }
 0x4db   : >> { %1504 = vadd.xlane.f32.xlu1 %v1503_v29  ;;  %v1472_v31 = vpop.xlane.xlu0 %1471  ;;  %v1500_v43 = vsel %vm1451_vm3, %v9258_v28, 0.0  ;;  %v1492_v29 = vmul.f32 1.442695, %v1480_v55  ;;  %v8202_v2 = vunpack.i.l.bf16 %v8201_v49 }
 0x4dc   : >> { %1501 = vadd.xlane.f32.xlu0 %v1500_v43  ;;  %v1482_v48 = vsub.f32 %v9247_v37, %v1472_v31 }
 0x4dd   : >> { %8340 = vpow2.f32 %v1492_v29 }
 0x4de   : >> { %v9273_v43 = vpop.eup %8334  ;;  %v1496_v38 = vmul.f32 1.442695, %v1482_v48 }
 0x4df   : >> { %v8196_v44 = vpop.permute.xlu0 %8195 }
 0x4e0   : >> { %v8198_v39 = vunpack.i.h.bf16 %v8196_v44  ;;  %v8197_v40 = vunpack.i.l.bf16 %v8196_v44 }
 0x4e2   : >> { %v9264_v42 = vpack.c.bf16 %v8198_v39, %v8197_v40  ;;  %v9275_v44 = vpop.eup %8336  ;;  %v1509_v39 = vsel %vm1451_vm3, %v9273_v43, 0.0  ;;  %v1498_v40 = vmul.f32 1.442695, %v1483_v15 }
 0x4e3   : >> { %v1506_v59 = vsel %vm1451_vm3, %v9275_v44, 0.0  ;;  %v9281_v13 = vpop.eup %8338 }
 0x4e4   : >> { %7810 = vmatprep.subr.msk.bf16.mxu0 %vm9196_vm2, %v9264_v42  ;;  %v1515_v23 = vsel %vm1451_vm3, %v9281_v13, 0.0  ;;  %8342 = vpow2.f32 %v1498_v40 }
 0x4e5   : >> { %8344 = vpow2.f32 %v1496_v38 }
 0x4e7   : >> { %v9285_v35 = vpop.eup %8340 }
 0x4e8   : >> { %v1512_v57 = vsel %vm1451_vm3, %v9285_v35, 0.0 }
 0x4ec   : >> { %8210 = vrot.lane.b32.xlu1 %v9156_v24, %s8766_s30 }
 0x4ee   : >> { %v9303_v41 = vpop.eup %8342 }
 0x4ef   : >> { %v1521_v37 = vsel %vm1451_vm3, %v9303_v41, 0.0  ;;  %v9309_v31 = vpop.eup %8344 }
 0x4f0   : >> { %v1518_v45 = vsel %vm1451_vm3, %v9309_v31, 0.0 }
 0x4f2   : >> { %8205 = vrot.lane.b32.xlu0 %v9177_v16, %s8765_s8 }
 0x510   : >> { %1510 = vadd.xlane.f32.xlu1 %v1509_v39 }
 0x511   : >> { %1507 = vadd.xlane.f32.xlu0 %v1506_v59 }
 0x515   : >> { %1516 = vadd.xlane.f32.xlu0 %v1515_v23 }
 0x519   : >> { %1513 = vadd.xlane.f32.xlu0 %v1512_v57  ;;  %v8203_v57 = vunpack.i.h.bf16 %v8201_v49 }
 0x51b   : >> { %v7814_v48 = vpack.c.bf16 %v8203_v57, %v8202_v2 }
 0x521   : >> { %8220 = vrot.lane.b32.xlu1 %v9166_v3, %s8766_s30 }
 0x52f   : >> { %8215 = vrot.lane.b32.xlu0 %v9187_v26, %s8765_s8 }
 0x533   : >> { %1693 = vrot.lane.b32.xlu0 %v9150_v63, %s8767_s9 }
 0x537   : >> { %8225 = vrot.lane.b32.xlu0 %v9177_v16, %s8766_s30 }
 0x53b   : >> { %1699 = vrot.lane.b32.xlu0 %v9158_v56, %s8767_s9 }
 0x53f   : >> { %1701 = vrot.lane.b32.xlu0 %v9170_v14, %s8767_s9 }
 0x543   : >> { %1705 = vrot.lane.b32.xlu0 %v9181_v25, %s8767_s9 }
 0x545   : >> { %1522 = vadd.xlane.f32.xlu1 %v1521_v37 }
 0x547   : >> { %2119 = vrot.lane.b32.xlu0 %v9150_v63, %s8768_s24 }
 0x549   : >> { %1519 = vadd.xlane.f32.xlu1 %v1518_v45 }
 0x54b   : >> { %2123 = vrot.lane.b32.xlu0 %v9160_v58, %s8768_s24 }
 0x54f   : >> { %2127 = vrot.lane.b32.xlu0 %v9170_v14, %s8768_s24 }
 0x553   : >> { %2131 = vrot.lane.b32.xlu0 %v9181_v25, %s8768_s24 }
 0x55a   : >> { %1695 = vrot.lane.b32.xlu1 %v9148_v54, %s8767_s9 }
 0x55e   : >> { %1697 = vrot.lane.b32.xlu1 %v9160_v58, %s8767_s9 }
 0x562   : >> { %8230 = vrot.lane.b32.xlu1 %v9187_v26, %s8766_s30 }
 0x566   : >> { %1703 = vrot.lane.b32.xlu1 %v9168_v12, %s8767_s9 }
 0x568   : >> { %v1505_v53 = vpop.xlane.xlu1 %1504 }
 0x569   : >> { %8346 = vrcp.f32 %v1505_v53  ;;  %v1502_v47 = vpop.xlane.xlu0 %1501 }
 0x56a   : >> { %8348 = vrcp.f32 %v1502_v47  ;;  %1707 = vrot.lane.b32.xlu1 %v9179_v18, %s8767_s9 }
 0x56c   : >> { %v8211_v19 = vpop.permute.xlu1 %8210 }
 0x56d   : >> { %v8213_v55 = vunpack.i.h.bf16 %v8211_v19  ;;  %v8212_v29 = vunpack.i.l.bf16 %v8211_v19  ;;  %v8206_v38 = vpop.permute.xlu0 %8205 }
 0x56e   : >> { %2121 = vrot.lane.b32.xlu1 %v9148_v54, %s8768_s24 }
 0x56f   : >> { %v7848_v39 = vpack.c.bf16 %v8213_v55, %v8212_v29 }
 0x571   : >> { %7850 = vmatprep.subr.msk.bf16.mxu1 %vm9196_vm2, %v7848_v39 }
 0x572   : >> { %7853 = vmatpush3.bf16.xpose.msk.msra.mxu1 %vm9196_vm2, %v7848_v39  ;;  %2125 = vrot.lane.b32.xlu1 %v9158_v56, %s8768_s24 }
 0x573   : >> { %v8347_v59 = vpop.eup %8346 }
 0x574   : >> { %v8349_v23 = vpop.eup %8348  ;;  %v1533_v40 = vmul.f32 %v8347_v59, %v9256_v27  ;;  %v8208_v27 = vunpack.i.h.bf16 %v8206_v38 }
 0x575   : >> { %v1532_v15 = vmul.f32 %v8349_v23, %v9258_v28  ;;  %v8207_v28 = vunpack.i.l.bf16 %v8206_v38 }
 0x576   : >> { %2129 = vrot.lane.b32.xlu1 %v9168_v12, %s8768_s24 }
 0x577   : >> { %7253 = vmatprep.mubr.msk.f32.mxu0 %vm1451_vm3, %v1532_v15  ;;  %v7820_v37 = vpack.c.bf16 %v8208_v27, %v8207_v28 }
 0x578   : >> { %7254 = vmatmul.mubr.msk.f32.vlgmr.msra.gmra.mrb[8].mxu0 %vm1451_vm3, %v1533_v40 }
 0x579   : >> { %7813 = vmatpush3.bf16.xpose.msk.msra.mxu0 %vm9196_vm2, %v9264_v42 }
 0x57a   : >> { %7816 = vmatprep.subr.msk.bf16.mxu0 %vm9196_vm2, %v7814_v48  ;;  %2133 = vrot.lane.b32.xlu1 %v9179_v18, %s8768_s24 }
 0x581   : >> { %7819 = vmatpush3.bf16.xpose.msk.msra.mxu0 %vm9196_vm2, %v7814_v48 }
 0x582   : >> { %7822 = vmatprep.subr.msk.bf16.mxu0 %vm9196_vm2, %v7820_v37 }
 0x589   : >> { %7825 = vmatpush3.bf16.xpose.msk.msra.mxu0 %vm9196_vm2, %v7820_v37 }
 0x59d   : >> { %v1511_v45 = vpop.xlane.xlu1 %1510 }
 0x59e   : >> { %8350 = vrcp.f32 %v1511_v45  ;;  %v1508_v42 = vpop.xlane.xlu0 %1507 }
 0x59f   : >> { %8352 = vrcp.f32 %v1508_v42 }
 0x5a1   : >> { %v8221_v49 = vpop.permute.xlu1 %8220 }
 0x5a2   : >> { %v8223_v53 = vunpack.i.h.bf16 %v8221_v49  ;;  %v8222_v47 = vunpack.i.l.bf16 %v8221_v49  ;;  %v1517_v19 = vpop.xlane.xlu0 %1516 }
 0x5a3   : >> { %8354 = vrcp.f32 %v1517_v19 }
 0x5a4   : >> { %v7854_v55 = vpack.c.bf16 %v8223_v53, %v8222_v47 }
 0x5a6   : >> { %7856 = vmatprep.subr.msk.bf16.mxu1 %vm9196_vm2, %v7854_v55  ;;  %v1514_v29 = vpop.xlane.xlu0 %1513 }
 0x5a7   : >> { %8356 = vrcp.f32 %v1514_v29  ;;  %7859 = vmatpush3.bf16.xpose.msk.msra.mxu1 %vm9196_vm2, %v7854_v55 }
 0x5a8   : >> { %v8351_v39 = vpop.eup %8350 }
 0x5a9   : >> { %v8353_v59 = vpop.eup %8352  ;;  %v1535_v40 = vmul.f32 %v8351_v39, %v9273_v43 }
 0x5aa   : >> { %v8216_v23 = vpop.permute.xlu0 %8215  ;;  %v1534_v57 = vmul.f32 %v8353_v59, %v9275_v44 }
 0x5ab   : >> { %v8218_v2 = vunpack.i.h.bf16 %v8216_v23  ;;  %v8217_v15 = vunpack.i.l.bf16 %v8216_v23 }
 0x5ac   : >> { %7256 = vmatprep.mubr.msk.f32.mxu0 %vm1451_vm3, %v1534_v57 }
 0x5ad   : >> { %v7826_v48 = vpack.c.bf16 %v8218_v2, %v8217_v15  ;;  %7257 = vmatmul.mubr.msk.f32.gmra.mrb[10].mxu0 %vm1451_vm3, %v1535_v40  ;;  %v8355_v27 = vpop.eup %8354 }
 0x5ae   : >> { %v1694_v38 = vpop.permute.xlu0 %1693  ;;  %v1537_v43 = vmul.f32 %v8355_v27, %v9281_v13 }
 0x5af   : >> { %7828 = vmatprep.subr.msk.bf16.mxu0 %vm9196_vm2, %v7826_v48 }
 0x5b0   : >> { %7831 = vmatpush3.bf16.xpose.msk.msra.mxu0 %vm9196_vm2, %v7826_v48 }
 0x5b1   : >> { %v8357_v28 = vpop.eup %8356 }
 0x5b2   : >> { %v8226_v37 = vpop.permute.xlu0 %8225  ;;  %v1536_v44 = vmul.f32 %v8357_v28, %v9285_v35 }
 0x5b3   : >> { %v8228_v45 = vunpack.i.h.bf16 %v8226_v37  ;;  %v8227_v42 = vunpack.i.l.bf16 %v8226_v37 }
 0x5b4   : >> { %7259 = vmatprep.mubr.msk.f32.mxu0 %vm1451_vm3, %v1536_v44 }
 0x5b5   : >> { %v7860_v49 = vpack.c.bf16 %v8228_v45, %v8227_v42  ;;  %7260 = vmatmul.mubr.msk.f32.gmra.mrb[12].mxu0 %vm1451_vm3, %v1537_v43 }
 0x5b6   : >> { %v1700_v53 = vpop.permute.xlu0 %1699 }
 0x5b7   : >> { %7862 = vmatprep.subr.msk.bf16.mxu1 %vm9196_vm2, %v7860_v49 }
 0x5b8   : >> { %7865 = vmatpush3.bf16.xpose.msk.msra.mxu1 %vm9196_vm2, %v7860_v49 }
 0x5ba   : >> { %v1702_v47 = vpop.permute.xlu0 %1701 }
 0x5be   : >> { %v1706_v19 = vpop.permute.xlu0 %1705 }
 0x5c2   : >> { %v2120_v55 = vpop.permute.xlu0 %2119 }
 0x5c3   : >> { %7337 = vmatprep.mubr.msk.f32.mxu1 %vm1297_vm1, %v2120_v55 }
 0x5d2   : >> { %v1523_v35 = vpop.xlane.xlu1 %1522 }
 0x5d3   : >> { %8358 = vrcp.f32 %v1523_v35 }
 0x5d6   : >> { %v1520_v13 = vpop.xlane.xlu1 %1519 }
 0x5d7   : >> { %8360 = vrcp.f32 %v1520_v13 }
 0x5da   : >> { %v1696_v29 = vpop.permute.xlu1 %1695 }
 0x5dd   : >> { %v8359_v59 = vpop.eup %8358 }
 0x5de   : >> { %v1698_v39 = vpop.permute.xlu1 %1697  ;;  %v1539_v48 = vmul.f32 %v8359_v59, %v9303_v41  ;;  %v2124_v41 = vpop.permute.xlu0 %2123 }
 0x5e1   : >> { %v8361_v23 = vpop.eup %8360 }
 0x5e2   : >> { %v8231_v57 = vpop.permute.xlu1 %8230  ;;  %v1538_v2 = vmul.f32 %v8361_v23, %v9309_v31 }
 0x5e3   : >> { %v8233_v15 = vunpack.i.h.bf16 %v8231_v57  ;;  %v8232_v40 = vunpack.i.l.bf16 %v8231_v57 }
 0x5e4   : >> { %7262 = vmatprep.mubr.msk.f32.mxu0 %vm1451_vm3, %v1538_v2 }
 0x5e5   : >> { %v7866_v27 = vpack.c.bf16 %v8233_v15, %v8232_v40  ;;  %7263 = vmatmul.mubr.msk.f32.gmra.mrb[14].mxu0 %vm1451_vm3, %v1539_v48 }
 0x5e6   : >> { %v1704_v28 = vpop.permute.xlu1 %1703  ;;  %7281 = vmatprep.mubr.msk.f32.mxu0 %vm1297_vm1, %v1694_v38  ;;  %v2128_v38 = vpop.permute.xlu0 %2127 }
 0x5e7   : >> { %7868 = vmatprep.subr.msk.bf16.mxu1 %vm9196_vm2, %v7866_v27 }
 0x5e8   : >> { %7871 = vmatpush3.bf16.xpose.msk.msra.mxu1 %vm9196_vm2, %v7866_v27 }
 0x5e9   : >> { %7282 = vmatmul.mubr.msk.f32.vlgmr.msra.gmra.mrb[16].mxu0 %vm1297_vm1, %v1696_v29 }
 0x5ea   : >> { %v1708_v31 = vpop.permute.xlu1 %1707  ;;  %7284 = vmatprep.mubr.msk.f32.mxu0 %vm1297_vm1, %v1698_v39  ;;  %v2132_v42 = vpop.permute.xlu0 %2131 }
 0x5ed   : >> { %7285 = vmatmul.mubr.msk.f32.gmra.mrb[18].mxu0 %vm1297_vm1, %v1700_v53 }
 0x5ee   : >> { %v2122_v37 = vpop.permute.xlu1 %2121  ;;  %7287 = vmatprep.mubr.msk.f32.mxu0 %vm1297_vm1, %v1702_v47 }
 0x5ef   : >> { %7338 = vmatmul.mubr.msk.f32.vlgmr.msra.gmra.mrb[8].mxu1 %vm1297_vm1, %v2122_v37 }
 0x5f0   : >> { %7340 = vmatprep.mubr.msk.f32.mxu1 %vm1297_vm1, %v2124_v41 }
 0x5f1   : >> { %7288 = vmatmul.mubr.msk.f32.gmra.mrb[20].mxu0 %vm1297_vm1, %v1704_v28 }
 0x5f2   : >> { %v2126_v44 = vpop.permute.xlu1 %2125  ;;  %7290 = vmatprep.mubr.msk.f32.mxu0 %vm1297_vm1, %v1706_v19 }
 0x5f3   : >> { %7341 = vmatmul.mubr.msk.f32.gmra.mrb[10].mxu1 %vm1297_vm1, %v2126_v44 }
 0x5f4   : >> { %7343 = vmatprep.mubr.msk.f32.mxu1 %vm1297_vm1, %v2128_v38 }
 0x5f5   : >> { %7291 = vmatmul.mubr.msk.f32.gmra.mrb[22].mxu0 %vm1297_vm1, %v1708_v31 }
 0x5f6   : >> { %v2130_v45 = vpop.permute.xlu1 %2129 }
 0x5f7   : >> { %7344 = vmatmul.mubr.msk.f32.gmra.mrb[12].mxu1 %vm1297_vm1, %v2130_v45 }
 0x5f8   : >> { %7346 = vmatprep.mubr.msk.f32.mxu1 %vm1297_vm1, %v2132_v42 }
 0x5fa   : >> { %v2134_v43 = vpop.permute.xlu1 %2133 }
 0x5fb   : >> { %7347 = vmatmul.mubr.msk.f32.gmra.mrb[14].mxu1 %vm1297_vm1, %v2134_v43 }
 0x64b   : >> { %v9402_v49 = vpop.f32.mrb[8].mxu0 }
 0x64c   : >> { %v9404_v53 = vpop.f32.mrb[9].mxu0 }
 0x680   : >> { %v9406_v47 = vpop.f32.mrb[10].mxu0 }
 0x681   : >> { %v9408_v19 = vpop.f32.mrb[11].mxu0 }
 0x688   : >> { %v9410_v55 = vpop.f32.mrb[12].mxu0 }
 0x689   : >> { %v9412_v35 = vpop.f32.mrb[13].mxu0 }
 0x6b8   : >> { %v9414_v13 = vpop.f32.mrb[14].mxu0 }
 0x6b9   : >> { %v9416_v29 = vpop.f32.mrb[15].mxu0 }
 0x6bc   : >> { %v7283_v39 = vpop.f32.mrb[16].mxu0 }
 0x6bd   : >> { %v1823_v59 = vpop.f32.mrb[17].mxu0 }
 0x6c0   : >> { %v7286_v23 = vpop.f32.mrb[18].mxu0 }
 0x6c1   : >> { %v1833_v57 = vpop.f32.mrb[19].mxu0 }
 0x6c2   : >> { %v7339_v2 = vpop.f32.mrb[8].mxu1 }
 0x6c3   : >> { %v2289_v15 = vmul.f32 0.35355338, %v7339_v2  ;;  %v2249_v40 = vpop.f32.mrb[9].mxu1 }
 0x6c4   : >> { %v2288_v48 = vmul.f32 0.35355338, %v2249_v40  ;;  %v9418_v27 = vpop.f32.mrb[20].mxu0 }
 0x6c5   : >> { %v9421_v28 = vadd.f32 %v2289_v15, %v8984_v51  ;;  %v1843_v31 = vpop.f32.mrb[21].mxu0 }
 0x6c6   : >> { %v9424_v41 = vadd.f32 %v2288_v48, %v10943_v34  ;;  %v7342_v37 = vpop.f32.mrb[10].mxu1 }
 0x6c7   : >> { %v2291_v38 = vmul.f32 0.35355338, %v7342_v37  ;;  %v2259_v44 = vpop.f32.mrb[11].mxu1  ;;  %v2307_v45 = vsel %vm1451_vm3, %v9421_v28, -inf }
 0x6c8   : >> { %v2290_v42 = vmul.f32 0.35355338, %v2259_v44  ;;  %2308 = vmax.xlane.f32.xlu1 %v2307_v45  ;;  %v7292_v43 = vpop.f32.mrb[22].mxu0  ;;  %v2304_v2 = vsel %vm1451_vm3, %v9424_v41, -inf }
 0x6c9   : >> { %v9431_v40 = vadd.f32 %v2291_v38, %v8980_v46  ;;  %2305 = vmax.xlane.f32.xlu0 %v2304_v2  ;;  %v1853_v15 = vpop.f32.mrb[23].mxu0 }
 0x6ca   : >> { %v9434_v48 = vadd.f32 %v2290_v42, %v10944_v32  ;;  %v7345_v20 = vpop.f32.mrb[12].mxu1 }
 0x6cb   : >> { %v2293_v37 = vmul.f32 0.35355338, %v7345_v20  ;;  %v2269_v22 = vpop.f32.mrb[13].mxu1  ;;  %v2313_v61 = vsel %vm1451_vm3, %v9431_v40, -inf }
 0x6cc   : >> { %v2292_v44 = vmul.f32 0.35355338, %v2269_v22  ;;  %2314 = vmax.xlane.f32.xlu1 %v2313_v61  ;;  %v2310_v45 = vsel %vm1451_vm3, %v9434_v48, -inf }
 0x6cd   : >> { %v9441_v0 = vadd.f32 %v2293_v37, %v8988_v60  ;;  %2311 = vmax.xlane.f32.xlu0 %v2310_v45 }
 0x6ce   : >> { %v9444_v38 = vadd.f32 %v2292_v44, %v8992_v62  ;;  %v7348_v42 = vpop.f32.mrb[14].mxu1 }
 0x6cf   : >> { %v2295_v2 = vmul.f32 0.35355338, %v7348_v42  ;;  %v2279_v33 = vpop.f32.mrb[15].mxu1  ;;  %v2319_v20 = vsel %vm1451_vm3, %v9441_v0, -inf  ;;  %v1862_v42 = vmul.f32 0.35355338, %v1823_v59 }
 0x6d0   : >> { %v2294_v50 = vmul.f32 0.35355338, %v2279_v33  ;;  %2320 = vmax.xlane.f32.xlu1 %v2319_v20  ;;  %v2316_v61 = vsel %vm1451_vm3, %v9444_v38, -inf  ;;  %v1863_v33 = vmul.f32 0.35355338, %v7283_v39 }
 0x6d1   : >> { %v9451_v22 = vadd.f32 %v2295_v2, %v10946_v17  ;;  %2317 = vmax.xlane.f32.xlu0 %v2316_v61  ;;  %v1865_v20 = vmul.f32 0.35355338, %v7286_v23  ;;  %v1866_v59 = vmul.f32 0.35355338, %v1843_v31 }
 0x6d2   : >> { %v9454_v37 = vadd.f32 %v2294_v50, %v10945_v21  ;;  %v9463_v2 = vadd.f32 %v1863_v33, %v8984_v51  ;;  %v9466_v50 = vadd.f32 %v1862_v42, %v10943_v34  ;;  %v1868_v42 = vmul.f32 0.35355338, %v1853_v15 }
 0x6d3   : >> { %v2325_v44 = vsel %vm1451_vm3, %v9451_v22, -inf  ;;  %v9481_v23 = vadd.f32 %v1866_v59, %v8992_v62  ;;  %v1867_v15 = vmul.f32 0.35355338, %v9418_v27 }
 0x6d4   : >> { %2326 = vmax.xlane.f32.xlu1 %v2325_v44  ;;  %v2322_v45 = vsel %vm1451_vm3, %v9454_v37, -inf  ;;  %v1881_v61 = vsel %vm1451_vm3, %v9463_v2, -inf  ;;  %v9471_v44 = vadd.f32 %v1865_v20, %v8980_v46  ;;  %v1878_v36 = vsel %vm1451_vm3, %v9466_v50, -inf }
 0x6d5   : >> { %2323 = vmax.xlane.f32.xlu0 %v2322_v45  ;;  %v1864_v45 = vmul.f32 0.35355338, %v1833_v57  ;;  %v9486_v20 = vadd.f32 %v1868_v42, %v10945_v21 }
 0x6d6   : >> { %v1887_v33 = vsel %vm1451_vm3, %v9471_v44, -inf }
 0x6d7   : >> { %v9476_v39 = vadd.f32 %v1864_v45, %v10944_v32  ;;  %v1896_v31 = vsel %vm1451_vm3, %v9486_v20, -inf  ;;  %v1869_v45 = vmul.f32 0.35355338, %v7292_v43 }
 0x6d9   : >> { %v1884_v57 = vsel %vm1451_vm3, %v9476_v39, -inf  ;;  %v9499_v59 = vadd.f32 %v1869_v45, %v10946_v17 }
 0x6db   : >> { %v1899_v42 = vsel %vm1451_vm3, %v9499_v59, -inf }
 0x6e5   : >> { %8235 = vrot.lane.b32.xlu1 %v9156_v24, %s8769_s5 }
 0x6eb   : >> { %8240 = vrot.lane.b32.xlu0 %v9166_v3, %s8769_s5 }
 0x709   : >> { %1882 = vmax.xlane.f32.xlu1 %v1881_v61  ;;  %v9496_v61 = vadd.f32 %v1867_v15, %v8988_v60 }
 0x70a   : >> { %1879 = vmax.xlane.f32.xlu0 %v1878_v36  ;;  %v1890_v36 = vsel %vm1451_vm3, %v9481_v23, -inf }
 0x70e   : >> { %1888 = vmax.xlane.f32.xlu0 %v1887_v33  ;;  %v1893_v33 = vsel %vm1451_vm3, %v9496_v61, -inf }
 0x712   : >> { %1885 = vmax.xlane.f32.xlu0 %v1884_v57 }
 0x716   : >> { %1891 = vmax.xlane.f32.xlu0 %v1890_v36 }
 0x71a   : >> { %8245 = vrot.lane.b32.xlu1 %v9177_v16, %s8769_s5  ;;  %1897 = vmax.xlane.f32.xlu0 %v1896_v31 }
 0x730   : >> { %8250 = vrot.lane.b32.xlu0 %v9187_v26, %s8769_s5  ;;  %s1266_s5 = scalar_lea.vmem %s10958_s7, %s9122_s28  ;;  %s1271_s7 = scalar_lea.vmem %s10959_s20, %s8760_s4 }
 0x731   : >> { %s3482_s20 = scalar_lea.vmem %s10967_s2, %s9122_s28  ;;  %s10970_s2 = sld [smem:[#allocation33_spill]] }
 0x73e   : >> { %1894 = vmax.xlane.f32.xlu1 %v1893_v33 }
 0x742   : >> { %1900 = vmax.xlane.f32.xlu1 %v1899_v42 }
 0x755   : >> { %v2309_v57 = vpop.xlane.xlu1 %2308 }
 0x756   : >> { %v2329_v36 = vsub.f32 %v9421_v28, %v2309_v57  ;;  %v2306_v31 = vpop.xlane.xlu0 %2305 }
 0x757   : >> { %v2328_v27 = vsub.f32 %v9424_v41, %v2306_v31 }
 0x758   : >> { %v2338_v15 = vmul.f32 1.442695, %v2329_v36 }
 0x759   : >> { %v2336_v52 = vmul.f32 1.442695, %v2328_v27  ;;  %v2315_v43 = vpop.xlane.xlu1 %2314 }
 0x75a   : >> { %8362 = vpow2.f32 %v2338_v15  ;;  %v2312_v45 = vpop.xlane.xlu0 %2311 }
 0x75b   : >> { %8364 = vpow2.f32 %v2336_v52 }
 0x75d   : >> { %v2321_v1 = vpop.xlane.xlu1 %2320 }
 0x75e   : >> { %v2318_v10 = vpop.xlane.xlu0 %2317  ;;  %v2333_v4 = vsub.f32 %v9441_v0, %v2321_v1 }
 0x761   : >> { %v9507_v11 = vpop.xlane.xlu1 %2326 }
 0x762   : >> { %v9509_v33 = vpop.xlane.xlu0 %2323 }
 0x764   : >> { %v9511_v8 = vpop.eup %8362 }
 0x765   : >> { %v9513_v42 = vpop.eup %8364  ;;  %v8236_v28 = vpop.permute.xlu1 %8235  ;;  %v2355_v41 = vsel %vm1451_vm3, %v9511_v8, 0.0 }
 0x766   : >> { %v8238_v57 = vunpack.i.h.bf16 %v8236_v28  ;;  %v8237_v36 = vunpack.i.l.bf16 %v8236_v28  ;;  %v8241_v31 = vpop.permute.xlu0 %8240  ;;  %2356 = vadd.xlane.f32.xlu0 %v2355_v41  ;;  %v2352_v52 = vsel %vm1451_vm3, %v9513_v42, 0.0  ;;  %v2331_v28 = vsub.f32 %v9431_v40, %v2315_v43 }
 0x767   : >> { %v8243_v27 = vunpack.i.h.bf16 %v8241_v31  ;;  %v8242_v15 = vunpack.i.l.bf16 %v8241_v31  ;;  %2353 = vadd.xlane.f32.xlu1 %v2352_v52 }
 0x768   : >> { %v7832_v9 = vpack.c.bf16 %v8238_v57, %v8237_v36  ;;  %v2342_v41 = vmul.f32 1.442695, %v2331_v28  ;;  %v2330_v57 = vsub.f32 %v9434_v48, %v2312_v45 }
 0x769   : >> { %v7836_v6 = vpack.c.bf16 %v8243_v27, %v8242_v15 }
 0x76a   : >> { %7833 = vmatprep.subr.bf16.mxu0 %v7832_v9  ;;  %8366 = vpow2.f32 %v2342_v41  ;;  %v2340_v36 = vmul.f32 1.442695, %v2330_v57  ;;  %v2346_v57 = vmul.f32 1.442695, %v2333_v4 }
 0x76b   : >> { %7835 = vmatpush3.bf16.msra.mxu0 %v7832_v9  ;;  %v2332_v9 = vsub.f32 %v9444_v38, %v2318_v10 }
 0x76c   : >> { %7837 = vmatprep.subr.bf16.mxu0 %v7836_v6  ;;  %8368 = vpow2.f32 %v2340_v36 }
 0x76d   : >> { %v2344_v40 = vmul.f32 1.442695, %v2332_v9 }
 0x76f   : >> { %7839 = vmatpush3.bf16.msra.mxu0 %v7836_v6 }
 0x774   : >> { %v9526_v31 = vpop.eup %8366 }
 0x775   : >> { %v2361_v48 = vsel %vm1451_vm3, %v9526_v31, 0.0 }
 0x776   : >> { %v9534_v0 = vpop.eup %8368 }
 0x778   : >> { %8255 = vrot.lane.b32.xlu1 %v9156_v24, %s8770_s0 }
 0x77c   : >> { %8265 = vrot.lane.b32.xlu1 %v9177_v16, %s8770_s0  ;;  %8260 = vrot.lane.b32.xlu0 %v9166_v3, %s8770_s0 }
 0x780   : >> { %8270 = vrot.lane.b32.xlu1 %v9187_v26, %s8770_s0  ;;  %s10896_s0 = smov 24  }
 0x796   : >> { %v1883_v6 = vpop.xlane.xlu1 %1882 }
 0x797   : >> { %v1903_v52 = vsub.f32 %v9463_v2, %v1883_v6  ;;  %v1880_v27 = vpop.xlane.xlu0 %1879  ;;  %v2358_v6 = vsel %vm1451_vm3, %v9534_v0, 0.0 }
 0x798   : >> { %v1902_v15 = vsub.f32 %v9466_v50, %v1880_v27 }
 0x799   : >> { %v1912_v7 = vmul.f32 1.442695, %v1903_v52 }
 0x79a   : >> { %v1910_v43 = vmul.f32 1.442695, %v1902_v15  ;;  %v8246_v28 = vpop.permute.xlu1 %8245 }
 0x79b   : >> { %8370 = vpow2.f32 %v1912_v7  ;;  %v8248_v45 = vunpack.i.h.bf16 %v8246_v28  ;;  %v8247_v10 = vunpack.i.l.bf16 %v8246_v28  ;;  %v1889_v38 = vpop.xlane.xlu0 %1888  ;;  %2362 = vadd.xlane.f32.xlu0 %v2361_v48 }
 0x79c   : >> { %8372 = vpow2.f32 %v1910_v43  ;;  %v1905_v2 = vsub.f32 %v9471_v44, %v1889_v38 }
 0x79d   : >> { %v7840_v41 = vpack.c.bf16 %v8248_v45, %v8247_v10  ;;  %8374 = vpow2.f32 %v2344_v40 }
 0x79e   : >> { %v1916_v50 = vmul.f32 1.442695, %v1905_v2 }
 0x79f   : >> { %7841 = vmatprep.subr.bf16.mxu0 %v7840_v41  ;;  %v1886_v1 = vpop.xlane.xlu0 %1885 }
 0x7a0   : >> { %8376 = vpow2.f32 %v1916_v50  ;;  %v1904_v36 = vsub.f32 %v9476_v39, %v1886_v1  ;;  %7843 = vmatpush3.bf16.msra.mxu0 %v7840_v41 }
 0x7a1   : >> { %8378 = vpow2.f32 %v2346_v57 }
 0x7a2   : >> { %v1914_v7 = vmul.f32 1.442695, %v1904_v36 }
 0x7a3   : >> { %v1892_v9 = vpop.xlane.xlu0 %1891 }
 0x7a4   : >> { %8380 = vpow2.f32 %v1914_v7  ;;  %v1906_v44 = vsub.f32 %v9481_v23, %v1892_v9  ;;  %2359 = vadd.xlane.f32.xlu1 %v2358_v6  ;;  %v2334_v9 = vsub.f32 %v9454_v37, %v9509_v33 }
 0x7a5   : >> { %v9540_v4 = vpop.eup %8370 }
 0x7a6   : >> { %v9542_v52 = vpop.eup %8372  ;;  %v1918_v27 = vmul.f32 1.442695, %v1906_v44  ;;  %v1929_v15 = vsel %vm1451_vm3, %v9540_v4, 0.0 }
 0x7a7   : >> { %v1898_v39 = vpop.xlane.xlu0 %1897  ;;  %v1926_v40 = vsel %vm1451_vm3, %v9542_v52, 0.0  ;;  %v9548_v43 = vpop.eup %8374 }
 0x7a8   : >> { %8382 = vpow2.f32 %v1918_v27  ;;  %1930 = vadd.xlane.f32.xlu1 %v1929_v15  ;;  %1927 = vadd.xlane.f32.xlu0 %v1926_v40  ;;  %v2364_v48 = vsel %vm1451_vm3, %v9548_v43, 0.0  ;;  %v2335_v27 = vsub.f32 %v9451_v22, %v9507_v11  ;;  %v2348_v15 = vmul.f32 1.442695, %v2334_v9 }
 0x7a9   : >> { %v1908_v40 = vsub.f32 %v9486_v20, %v1898_v39 }
 0x7aa   : >> { %v9550_v28 = vpop.eup %8376 }
 0x7ab   : >> { %v8251_v23 = vpop.permute.xlu0 %8250  ;;  %v1935_v45 = vsel %vm1451_vm3, %v9550_v28, 0.0  ;;  %v9556_v10 = vpop.eup %8378 }
 0x7ac   : >> { %v8253_v38 = vunpack.i.h.bf16 %v8251_v23  ;;  %v8252_v2 = vunpack.i.l.bf16 %v8251_v23  ;;  %2365 = vadd.xlane.f32.xlu1 %v2364_v48  ;;  %1936 = vadd.xlane.f32.xlu0 %v1935_v45  ;;  %v2367_v50 = vsel %vm1451_vm3, %v9556_v10, 0.0 }
 0x7ae   : >> { %v9558_v41 = vpop.eup %8380  ;;  %v7844_v57 = vpack.c.bf16 %v8253_v38, %v8252_v2  ;;  %v2350_v38 = vmul.f32 1.442695, %v2335_v27  ;;  %v1922_v2 = vmul.f32 1.442695, %v1908_v40 }
 0x7af   : >> { %v1932_v1 = vsel %vm1451_vm3, %v9558_v41, 0.0 }
 0x7b0   : >> { %2368 = vadd.xlane.f32.xlu1 %v2367_v50  ;;  %1933 = vadd.xlane.f32.xlu0 %v1932_v1 }
 0x7b1   : >> { %7845 = vmatprep.subr.bf16.mxu0 %v7844_v57 }
 0x7b2   : >> { %v9564_v36 = vpop.eup %8382  ;;  %7847 = vmatpush3.bf16.msra.mxu0 %v7844_v57 }
 0x7b3   : >> { %v1938_v7 = vsel %vm1451_vm3, %v9564_v36, 0.0 }
 0x7b4   : >> { %1939 = vadd.xlane.f32.xlu0 %v1938_v7 }
 0x7cb   : >> { %v1895_v6 = vpop.xlane.xlu1 %1894 }
 0x7cc   : >> { %v1907_v44 = vsub.f32 %v9496_v61, %v1895_v6 }
 0x7ce   : >> { %v1920_v23 = vmul.f32 1.442695, %v1907_v44 }
 0x7cf   : >> { %v1901_v48 = vpop.xlane.xlu1 %1900 }
 0x7d0   : >> { %8384 = vpow2.f32 %v1920_v23  ;;  %v1909_v45 = vsub.f32 %v9499_v59, %v1901_v48 }
 0x7d1   : >> { %8386 = vpow2.f32 %v2348_v15 }
 0x7d2   : >> { %v1924_v57 = vmul.f32 1.442695, %v1909_v45 }
 0x7d4   : >> { %8388 = vpow2.f32 %v1924_v57 }
 0x7d5   : >> { %8390 = vpow2.f32 %v2350_v38 }
 0x7d6   : >> { %8392 = vpow2.f32 %v1922_v2 }
 0x7da   : >> { %v9575_v37 = vpop.eup %8384 }
 0x7db   : >> { %v1941_v11 = vsel %vm1451_vm3, %v9575_v37, 0.0  ;;  %v9579_v22 = vpop.eup %8386 }
 0x7dc   : >> { %1942 = vadd.xlane.f32.xlu1 %v1941_v11  ;;  %v2370_v59 = vsel %vm1451_vm3, %v9579_v22, 0.0 }
 0x7de   : >> { %v9581_v20 = vpop.eup %8388 }
 0x7df   : >> { %v9583_v61 = vpop.eup %8390  ;;  %v1947_v33 = vsel %vm1451_vm3, %v9581_v20, 0.0 }
 0x7e0   : >> { %v9589_v39 = vpop.eup %8392  ;;  %2371 = vadd.xlane.f32.xlu1 %v2370_v59  ;;  %1948 = vadd.xlane.f32.xlu0 %v1947_v33  ;;  %v2373_v50 = vsel %vm1451_vm3, %v9583_v61, 0.0 }
 0x7e1   : >> { %v1944_v1 = vsel %vm1451_vm3, %v9589_v39, 0.0 }
 0x7e4   : >> { %2374 = vadd.xlane.f32.xlu1 %v2373_v50  ;;  %1945 = vadd.xlane.f32.xlu0 %v1944_v1 }
 0x7f4   : >> { %v9595_v7 = vpop.xlane.xlu1 %2353 }
 0x7f5   : >> { %8280 = vrot.lane.b32.xlu1 %v9166_v3, %s8771_s10 }
 0x7f8   : >> { %v8256_v9 = vpop.permute.xlu1 %8255 }
 0x7f9   : >> { %v8258_v6 = vunpack.i.h.bf16 %v8256_v9  ;;  %v8257_v44 = vunpack.i.l.bf16 %v8256_v9  ;;  %8290 = vrot.lane.b32.xlu1 %v9187_v26, %s8771_s10 }
 0x7fa   : >> { %8275 = vrot.lane.b32.xlu0 %v9156_v24, %s8771_s10 }
 0x7fb   : >> { %v7872_v27 = vpack.c.bf16 %v8258_v6, %v8257_v44 }
 0x7fd   : >> { %2547 = vrot.lane.b32.xlu1 %v9148_v54, %s8772_s29  ;;  %7873 = vmatprep.subr.bf16.mxu0 %v7872_v27  ;;  %v2357_v54 = vpop.xlane.xlu0 %2356 }
 0x7fe   : >> { %8285 = vrot.lane.b32.xlu0 %v9177_v16, %s8771_s10 }
 0x801   : >> { %2551 = vrot.lane.b32.xlu1 %v9158_v56, %s8772_s29  ;;  %v8266_v56 = vpop.permute.xlu1 %8265  ;;  %v8261_v15 = vpop.permute.xlu0 %8260 }
 0x802   : >> { %2545 = vrot.lane.b32.xlu0 %v9150_v63, %s8772_s29  ;;  %v8263_v38 = vunpack.i.h.bf16 %v8261_v15  ;;  %v8262_v2 = vunpack.i.l.bf16 %v8261_v15  ;;  %v8268_v59 = vunpack.i.h.bf16 %v8266_v56  ;;  %v8267_v33 = vunpack.i.l.bf16 %v8266_v56 }
 0x804   : >> { %v7876_v50 = vpack.c.bf16 %v8263_v38, %v8262_v2  ;;  %v7880_v15 = vpack.c.bf16 %v8268_v59, %v8267_v33 }
 0x805   : >> { %2555 = vrot.lane.b32.xlu1 %v9168_v12, %s8772_s29  ;;  %v8271_v40 = vpop.permute.xlu1 %8270 }
 0x806   : >> { %2549 = vrot.lane.b32.xlu0 %v9160_v58, %s8772_s29  ;;  %v8273_v6 = vunpack.i.h.bf16 %v8271_v40  ;;  %v8272_v44 = vunpack.i.l.bf16 %v8271_v40 }
 0x808   : >> { %v7884_v56 = vpack.c.bf16 %v8273_v6, %v8272_v44 }
 0x809   : >> { %2559 = vrot.lane.b32.xlu1 %v9179_v18, %s8772_s29 }
 0x80a   : >> { %2553 = vrot.lane.b32.xlu0 %v9170_v14, %s8772_s29 }
 0x80e   : >> { %2557 = vrot.lane.b32.xlu0 %v9181_v25, %s8772_s29 }
 0x828   : >> { %v9621_v63 = vpop.xlane.xlu0 %2362 }
 0x831   : >> { %v2360_v23 = vpop.xlane.xlu1 %2359 }
 0x835   : >> { %v1931_v12 = vpop.xlane.xlu1 %1930  ;;  %v1928_v48 = vpop.xlane.xlu0 %1927 }
 0x836   : >> { %8394 = vrcp.f32 %v1931_v12 }
 0x837   : >> { %8396 = vrcp.f32 %v1928_v48 }
 0x839   : >> { %v1937_v58 = vpop.xlane.xlu0 %1936  ;;  %v2366_v40 = vpop.xlane.xlu1 %2365 }
 0x83a   : >> { %8398 = vrcp.f32 %v1937_v58 }
 0x83d   : >> { %v1934_v45 = vpop.xlane.xlu0 %1933  ;;  %v2369_v48 = vpop.xlane.xlu1 %2368 }
 0x83e   : >> { %8400 = vrcp.f32 %v1934_v45 }
 0x840   : >> { %v8395_v18 = vpop.eup %8394 }
 0x841   : >> { %v8397_v14 = vpop.eup %8396  ;;  %v1959_v25 = vmul.f32 %v8395_v18, %v9540_v4  ;;  %v1940_v57 = vpop.xlane.xlu0 %1939 }
 0x842   : >> { %8402 = vrcp.f32 %v1940_v57  ;;  %v1958_v11 = vmul.f32 %v8397_v14, %v9542_v52 }
 0x844   : >> { %7309 = vmatprep.mubr.msk.f32.mxu0 %vm1451_vm3, %v1958_v11  ;;  %v8399_v1 = vpop.eup %8398 }
 0x845   : >> { %7310 = vmatmul.mubr.msk.f32.vlgmr.msra.gmra.mrb[24].mxu0 %vm1451_vm3, %v1959_v25  ;;  %v1961_v52 = vmul.f32 %v8399_v1, %v9550_v28 }
 0x846   : >> { %7875 = vmatpush3.bf16.msra.mxu0 %v7872_v27 }
 0x847   : >> { %7877 = vmatprep.subr.bf16.mxu0 %v7876_v50 }
 0x848   : >> { %v8401_v9 = vpop.eup %8400 }
 0x849   : >> { %v1960_v4 = vmul.f32 %v8401_v9, %v9558_v41 }
 0x84a   : >> { %7879 = vmatpush3.bf16.msra.mxu0 %v7876_v50 }
 0x84b   : >> { %7881 = vmatprep.subr.bf16.mxu0 %v7880_v15  ;;  %7312 = vmatprep.mubr.msk.f32.mxu0 %vm1451_vm3, %v1960_v4 }
 0x84c   : >> { %v8403_v12 = vpop.eup %8402  ;;  %7313 = vmatmul.mubr.msk.f32.gmra.mrb[26].mxu0 %vm1451_vm3, %v1961_v52 }
 0x84d   : >> { %v1962_v27 = vmul.f32 %v8403_v12, %v9564_v36 }
 0x84e   : >> { %7883 = vmatpush3.bf16.msra.mxu0 %v7880_v15 }
 0x84f   : >> { %7885 = vmatprep.subr.bf16.mxu0 %v7884_v56  ;;  %7315 = vmatprep.mubr.msk.f32.mxu0 %vm1451_vm3, %v1962_v27 }
 0x852   : >> { %7887 = vmatpush3.bf16.msra.mxu0 %v7884_v56 }
 0x869   : >> { %v1943_v58 = vpop.xlane.xlu1 %1942 }
 0x86a   : >> { %8404 = vrcp.f32 %v1943_v58 }
 0x86b   : >> { %8406 = vrcp.f32 %v9595_v7 }
 0x86d   : >> { %v1949_v41 = vpop.xlane.xlu0 %1948  ;;  %v2372_v45 = vpop.xlane.xlu1 %2371 }
 0x86e   : >> { %8408 = vrcp.f32 %v1949_v41 }
 0x871   : >> { %v1946_v28 = vpop.xlane.xlu0 %1945  ;;  %v2375_v25 = vpop.xlane.xlu1 %2374 }
 0x872   : >> { %8410 = vrcp.f32 %v1946_v28 }
 0x873   : >> { %8412 = vrcp.f32 %v2357_v54 }
 0x874   : >> { %v8405_v18 = vpop.eup %8404  ;;  %8414 = vrcp.f32 %v2360_v23 }
 0x875   : >> { %v8276_v14 = vpop.permute.xlu0 %8275  ;;  %v1963_v36 = vmul.f32 %v8405_v18, %v9575_v37  ;;  %8416 = vrcp.f32 %v9621_v63  ;;  %v8407_v7 = vpop.eup %8406 }
 0x876   : >> { %v8278_v38 = vunpack.i.h.bf16 %v8276_v14  ;;  %v8277_v2 = vunpack.i.l.bf16 %v8276_v14  ;;  %8418 = vrcp.f32 %v2366_v40  ;;  %v8281_v33 = vpop.permute.xlu1 %8280  ;;  %v2384_v50 = vmul.f32 %v8407_v7, %v9513_v42 }
 0x877   : >> { %7316 = vmatmul.mubr.msk.f32.gmra.mrb[28].mxu0 %vm1451_vm3, %v1963_v36  ;;  %8420 = vrcp.f32 %v2369_v48  ;;  %v8283_v1 = vunpack.i.h.bf16 %v8281_v33  ;;  %v8282_v9 = vunpack.i.l.bf16 %v8281_v33 }
 0x878   : >> { %v7888_v57 = vpack.c.bf16 %v8278_v38, %v8277_v2  ;;  %v8409_v11 = vpop.eup %8408  ;;  %8422 = vrcp.f32 %v2372_v45 }
 0x879   : >> { %v1965_v54 = vmul.f32 %v8409_v11, %v9581_v20  ;;  %8424 = vrcp.f32 %v2375_v25  ;;  %v7894_v20 = vpack.c.bf16 %v8283_v1, %v8282_v9  ;;  %v8286_v4 = vpop.permute.xlu0 %8285 }
 0x87a   : >> { %7890 = vmatprep.subr.msk.bf16.mxu0 %vm9196_vm2, %v7888_v57  ;;  %v8287_v56 = vunpack.i.l.bf16 %v8286_v4  ;;  %v8291_v41 = vpop.permute.xlu1 %8290 }
 0x87b   : >> { %v8292_v28 = vunpack.i.l.bf16 %v8291_v41 }
 0x87c   : >> { %v8411_v59 = vpop.eup %8410 }
 0x87d   : >> { %v1964_v37 = vmul.f32 %v8411_v59, %v9589_v39  ;;  %v8413_v23 = vpop.eup %8412 }
 0x87e   : >> { %v8415_v63 = vpop.eup %8414  ;;  %v2385_v6 = vmul.f32 %v8413_v23, %v9511_v8  ;;  %v2548_v45 = vpop.permute.xlu1 %2547 }
 0x87f   : >> { %7318 = vmatprep.mubr.msk.f32.mxu0 %vm1451_vm3, %v1964_v37  ;;  %v8417_v44 = vpop.eup %8416  ;;  %v2386_v39 = vmul.f32 %v8415_v63, %v9534_v0  ;;  %v8288_v0 = vunpack.i.h.bf16 %v8286_v4 }
 0x880   : >> { %7319 = vmatmul.mubr.msk.f32.gmra.mrb[30].mxu0 %vm1451_vm3, %v1965_v54  ;;  %v8419_v15 = vpop.eup %8418  ;;  %v2387_v42 = vmul.f32 %v8417_v44, %v9526_v31 }
 0x881   : >> { %7365 = vmatprep.mubr.msk.f32.mxu0 %vm1451_vm3, %v2384_v50  ;;  %v8421_v52 = vpop.eup %8420  ;;  %v2388_v8 = vmul.f32 %v8419_v15, %v9548_v43  ;;  %v7900_v58 = vpack.c.bf16 %v8288_v0, %v8287_v56  ;;  %v8293_v43 = vunpack.i.h.bf16 %v8291_v41 }
 0x882   : >> { %v8423_v12 = vpop.eup %8422  ;;  %v2389_v27 = vmul.f32 %v8421_v52, %v9556_v10  ;;  %v2546_v10 = vpop.permute.xlu0 %2545 }
 0x883   : >> { %v8425_v40 = vpop.eup %8424  ;;  %v2390_v48 = vmul.f32 %v8423_v12, %v9579_v22  ;;  %v7906_v22 = vpack.c.bf16 %v8293_v43, %v8292_v28 }
 0x884   : >> { %7366 = vmatmul.mubr.msk.f32.vlgmr.msra.gmra.mrb[32].mxu0 %vm1451_vm3, %v2385_v6  ;;  %v2391_v31 = vmul.f32 %v8425_v40, %v9583_v61  ;;  %v2552_v61 = vpop.permute.xlu1 %2551 }
 0x885   : >> { %7893 = vmatpush3.bf16.xpose.msk.msra.mxu0 %vm9196_vm2, %v7888_v57  ;;  %7368 = vmatprep.mubr.msk.f32.mxu0 %vm1451_vm3, %v2386_v39 }
 0x886   : >> { %7896 = vmatprep.subr.msk.bf16.mxu0 %vm9196_vm2, %v7894_v20  ;;  %v2550_v18 = vpop.permute.xlu0 %2549 }
 0x888   : >> { %7369 = vmatmul.mubr.msk.f32.gmra.mrb[34].mxu0 %vm1451_vm3, %v2387_v42  ;;  %v2556_v36 = vpop.permute.xlu1 %2555 }
 0x889   : >> { %7371 = vmatprep.mubr.msk.f32.mxu0 %vm1451_vm3, %v2388_v8 }
 0x88a   : >> { %v2554_v14 = vpop.permute.xlu0 %2553 }
 0x88c   : >> { %7372 = vmatmul.mubr.msk.f32.gmra.mrb[36].mxu0 %vm1451_vm3, %v2389_v27  ;;  %v2560_v2 = vpop.permute.xlu1 %2559 }
 0x88d   : >> { %7899 = vmatpush3.bf16.xpose.msk.msra.mxu0 %vm9196_vm2, %v7894_v20  ;;  %7374 = vmatprep.mubr.msk.f32.mxu0 %vm1451_vm3, %v2390_v48 }
 0x88e   : >> { %7902 = vmatprep.subr.msk.bf16.mxu0 %vm9196_vm2, %v7900_v58  ;;  %v2558_v38 = vpop.permute.xlu0 %2557 }
 0x890   : >> { %7375 = vmatmul.mubr.msk.f32.gmra.mrb[38].mxu0 %vm1451_vm3, %v2391_v31 }
 0x891   : >> { %7393 = vmatprep.mubr.msk.f32.mxu0 %vm1297_vm1, %v2546_v10 }
 0x895   : >> { %7905 = vmatpush3.bf16.xpose.msk.msra.mxu0 %vm9196_vm2, %v7900_v58 }
 0x896   : >> { %7908 = vmatprep.subr.msk.bf16.mxu0 %vm9196_vm2, %v7906_v22 }
 0x89d   : >> { %7911 = vmatpush3.bf16.xpose.msk.msra.mxu0 %vm9196_vm2, %v7906_v22 }
 0x8a4   : >> { %7394 = vmatmul.mubr.msk.f32.vlgmr.msra.gmra.mrb[40].mxu0 %vm1297_vm1, %v2548_v45 }
 0x8a5   : >> { %7396 = vmatprep.mubr.msk.f32.mxu0 %vm1297_vm1, %v2550_v18 }
 0x8a8   : >> { %7397 = vmatmul.mubr.msk.f32.gmra.mrb[42].mxu0 %vm1297_vm1, %v2552_v61 }
 0x8a9   : >> { %7399 = vmatprep.mubr.msk.f32.mxu0 %vm1297_vm1, %v2554_v14 }
 0x8ac   : >> { %7400 = vmatmul.mubr.msk.f32.gmra.mrb[44].mxu0 %vm1297_vm1, %v2556_v36 }
 0x8ad   : >> { %7402 = vmatprep.mubr.msk.f32.mxu0 %vm1297_vm1, %v2558_v38 }
 0x8b0   : >> { %7403 = vmatmul.mubr.msk.f32.gmra.mrb[46].mxu0 %vm1297_vm1, %v2560_v2 }
 0x918   : >> { %v9681_v30 = vpop.f32.mrb[24].mxu0 }
 0x919   : >> { %v9683_v25 = vpop.f32.mrb[25].mxu0 }
 0x91f   : >> { %v9685_v57 = vpop.f32.mrb[26].mxu0 }
 0x920   : >> { %v9687_v7 = vpop.f32.mrb[27].mxu0 }
 0x94a   : >> { %v9689_v11 = vpop.f32.mrb[28].mxu0 }
 0x94b   : >> { %v9691_v59 = vpop.f32.mrb[29].mxu0 }
 0x953   : >> { %v9693_v33 = vpop.f32.mrb[30].mxu0 }
 0x954   : >> { %v9695_v37 = vpop.f32.mrb[31].mxu0 }
 0x957   : >> { %v9697_v54 = vpop.f32.mrb[32].mxu0 }
 0x958   : >> { %v9699_v23 = vpop.f32.mrb[33].mxu0 }
 0x95b   : >> { %v9701_v50 = vpop.f32.mrb[34].mxu0 }
 0x95c   : >> { %v9703_v63 = vpop.f32.mrb[35].mxu0 }
 0x95f   : >> { %v9705_v1 = vpop.f32.mrb[36].mxu0 }
 0x960   : >> { %v9707_v9 = vpop.f32.mrb[37].mxu0 }
 0x963   : >> { %v9709_v6 = vpop.f32.mrb[38].mxu0 }
 0x964   : >> { %v9711_v44 = vpop.f32.mrb[39].mxu0 }
 0x977   : >> { %v7395_v39 = vpop.f32.mrb[40].mxu0 }
 0x978   : >> { %v2715_v15 = vmul.f32 0.35355338, %v7395_v39  ;;  %v2675_v20 = vpop.f32.mrb[41].mxu0 }
 0x979   : >> { %v2714_v4 = vmul.f32 0.35355338, %v2675_v20 }
 0x97a   : >> { %v2723_v42 = vadd.f32 %v2715_v15, %v8984_v51 }
 0x97b   : >> { %v2722_v52 = vadd.f32 %v2714_v4, %v10943_v34  ;;  %v7398_v8 = vpop.f32.mrb[42].mxu0 }
 0x97c   : >> { %v2717_v12 = vmul.f32 0.35355338, %v7398_v8  ;;  %v2685_v0 = vpop.f32.mrb[43].mxu0  ;;  %v2733_v56 = vsel %vm1451_vm3, %v2723_v42, -inf }
 0x97d   : >> { %v2716_v27 = vmul.f32 0.35355338, %v2685_v0  ;;  %2734 = vmax.xlane.f32.xlu1 %v2733_v56  ;;  %v2730_v40 = vsel %vm1451_vm3, %v2722_v52, -inf }
 0x97e   : >> { %v2725_v48 = vadd.f32 %v2717_v12, %v8980_v46  ;;  %2731 = vmax.xlane.f32.xlu0 %v2730_v40 }
 0x97f   : >> { %v7401_v58 = vpop.f32.mrb[44].mxu0  ;;  %v2724_v28 = vadd.f32 %v2716_v27, %v10944_v32 }
 0x980   : >> { %v2719_v41 = vmul.f32 0.35355338, %v7401_v58  ;;  %v2695_v31 = vpop.f32.mrb[45].mxu0  ;;  %v2739_v43 = vsel %vm1451_vm3, %v2725_v48, -inf }
 0x981   : >> { %v2718_v10 = vmul.f32 0.35355338, %v2695_v31  ;;  %v2736_v2 = vsel %vm1451_vm3, %v2724_v28, -inf }
 0x982   : >> { %v2727_v22 = vadd.f32 %v2719_v41, %v8988_v60  ;;  %2740 = vmax.xlane.f32.xlu0 %v2739_v43 }
 0x983   : >> { %v7404_v45 = vpop.f32.mrb[46].mxu0  ;;  %v2726_v36 = vadd.f32 %v2718_v10, %v8992_v62 }
 0x984   : >> { %v2721_v18 = vmul.f32 0.35355338, %v7404_v45  ;;  %v2705_v61 = vpop.f32.mrb[47].mxu0  ;;  %v2745_v14 = vsel %vm1451_vm3, %v2727_v22, -inf }
 0x985   : >> { %v2720_v38 = vmul.f32 0.35355338, %v2705_v61  ;;  %2746 = vmax.xlane.f32.xlu1 %v2745_v14  ;;  %v2742_v4 = vsel %vm1451_vm3, %v2726_v36, -inf }
 0x986   : >> { %v2729_v39 = vadd.f32 %v2721_v18, %v10946_v17  ;;  %2737 = vmax.xlane.f32.xlu0 %v2736_v2 }
 0x987   : >> { %v2728_v20 = vadd.f32 %v2720_v38, %v10945_v21 }
 0x988   : >> { %v2751_v15 = vsel %vm1451_vm3, %v2729_v39, -inf }
 0x989   : >> { %2752 = vmax.xlane.f32.xlu1 %v2751_v15  ;;  %v2748_v8 = vsel %vm1451_vm3, %v2728_v20, -inf }
 0x98a   : >> { %2743 = vmax.xlane.f32.xlu0 %v2742_v4 }
 0x98e   : >> { %2749 = vmax.xlane.f32.xlu0 %v2748_v8 }
 0x99a   : >> { %8300 = vrot.lane.b32.xlu1 %v9166_v3, %s8773_s1 }
 0x9a4   : >> { %8295 = vrot.lane.b32.xlu0 %v9156_v24, %s8773_s1 }
 0xa0a   : >> { %v2735_v12 = vpop.xlane.xlu1 %2734 }
 0xa0b   : >> { %v2755_v0 = vsub.f32 %v2723_v42, %v2735_v12  ;;  %v2732_v56 = vpop.xlane.xlu0 %2731 }
 0xa0c   : >> { %v2754_v27 = vsub.f32 %v2722_v52, %v2732_v56 }
 0xa0d   : >> { %v2764_v40 = vmul.f32 1.442695, %v2755_v0 }
 0xa0e   : >> { %v2762_v58 = vmul.f32 1.442695, %v2754_v27 }
 0xa0f   : >> { %8426 = vpow2.f32 %v2764_v40  ;;  %v2741_v41 = vpop.xlane.xlu0 %2740 }
 0xa10   : >> { %8428 = vpow2.f32 %v2762_v58  ;;  %v2757_v31 = vsub.f32 %v2725_v48, %v2741_v41 }
 0xa12   : >> { %v2768_v43 = vmul.f32 1.442695, %v2757_v31  ;;  %v2747_v10 = vpop.xlane.xlu1 %2746 }
 0xa13   : >> { %v2759_v45 = vsub.f32 %v2727_v22, %v2747_v10  ;;  %v2738_v18 = vpop.xlane.xlu0 %2737 }
 0xa14   : >> { %8430 = vpow2.f32 %v2768_v43  ;;  %v2756_v61 = vsub.f32 %v2724_v28, %v2738_v18 }
 0xa15   : >> { %v2772_v3 = vmul.f32 1.442695, %v2759_v45 }
 0xa16   : >> { %v2766_v14 = vmul.f32 1.442695, %v2756_v61  ;;  %v2753_v38 = vpop.xlane.xlu1 %2752 }
 0xa17   : >> { %8432 = vpow2.f32 %v2772_v3  ;;  %v2761_v24 = vsub.f32 %v2729_v39, %v2753_v38  ;;  %v2744_v42 = vpop.xlane.xlu0 %2743 }
 0xa18   : >> { %8434 = vpow2.f32 %v2766_v14  ;;  %v2758_v52 = vsub.f32 %v2726_v36, %v2744_v42 }
 0xa19   : >> { %v9733_v2 = vpop.eup %8426  ;;  %v2776_v15 = vmul.f32 1.442695, %v2761_v24 }
 0xa1a   : >> { %v9735_v4 = vpop.eup %8428  ;;  %v2770_v48 = vmul.f32 1.442695, %v2758_v52  ;;  %v2781_v22 = vsel %vm1451_vm3, %v9733_v2, 0.0  ;;  %v8301_v36 = vpop.permute.xlu1 %8300 }
 0xa1b   : >> { %8436 = vpow2.f32 %v2776_v15  ;;  %2782 = vadd.xlane.f32.xlu1 %v2781_v22  ;;  %v2750_v28 = vpop.xlane.xlu0 %2749  ;;  %v2778_v8 = vsel %vm1451_vm3, %v9735_v4, 0.0  ;;  %v8303_v31 = vunpack.i.h.bf16 %v8301_v36  ;;  %v8302_v43 = vunpack.i.l.bf16 %v8301_v36 }
 0xa1c   : >> { %8438 = vpow2.f32 %v2770_v48  ;;  %v2760_v39 = vsub.f32 %v2728_v20, %v2750_v28  ;;  %2779 = vadd.xlane.f32.xlu0 %v2778_v8 }
 0xa1d   : >> { %v7916_v3 = vpack.c.bf16 %v8303_v31, %v8302_v43  ;;  %v1268_v31 = vld [vmem:[%s1266_s5 + $0x8] sm:$0xff]  ;;  %v1269_v43 = vld [vmem:[%s1266_s5 + $0x10] sm:$0xff] }
 0xa1e   : >> { %v9741_v12 = vpop.eup %8430  ;;  %v2774_v0 = vmul.f32 1.442695, %v2760_v39 }
 0xa1f   : >> { %v8296_v56 = vpop.permute.xlu0 %8295  ;;  %v2787_v27 = vsel %vm1451_vm3, %v9741_v12, 0.0 }
 0xa20   : >> { %8440 = vpow2.f32 %v2774_v0  ;;  %v8298_v40 = vunpack.i.h.bf16 %v8296_v56  ;;  %v8297_v58 = vunpack.i.l.bf16 %v8296_v56  ;;  %2788 = vadd.xlane.f32.xlu1 %v2787_v27 }
 0xa21   : >> { %v9745_v41 = vpop.eup %8432 }
 0xa22   : >> { %v9747_v10 = vpop.eup %8434  ;;  %v2793_v20 = vsel %vm1451_vm3, %v9745_v41, 0.0  ;;  %v7912_v45 = vpack.c.bf16 %v8298_v40, %v8297_v58 }
 0xa23   : >> { %v2784_v18 = vsel %vm1451_vm3, %v9747_v10, 0.0 }
 0xa24   : >> { %2794 = vadd.xlane.f32.xlu1 %v2793_v20  ;;  %2785 = vadd.xlane.f32.xlu0 %v2784_v18 }
 0xa25   : >> { %v9753_v61 = vpop.eup %8436  ;;  %7913 = vmatprep.subr.bf16.mxu1 %v7912_v45 }
 0xa26   : >> { %v9755_v14 = vpop.eup %8438  ;;  %7915 = vmatpush3.bf16.msra.mxu1 %v7912_v45  ;;  %v2799_v38 = vsel %vm1451_vm3, %v9753_v61, 0.0 }
 0xa27   : >> { %7917 = vmatprep.subr.bf16.mxu1 %v7916_v3  ;;  %v2790_v24 = vsel %vm1451_vm3, %v9755_v14, 0.0 }
 0xa28   : >> { %2800 = vadd.xlane.f32.xlu1 %v2799_v38  ;;  %2791 = vadd.xlane.f32.xlu0 %v2790_v24 }
 0xa2a   : >> { %v9761_v42 = vpop.eup %8440  ;;  %7919 = vmatpush3.bf16.msra.mxu1 %v7916_v3 }
 0xa2b   : >> { %v2796_v52 = vsel %vm1451_vm3, %v9761_v42, 0.0 }
 0xa2c   : >> { %2797 = vadd.xlane.f32.xlu1 %v2796_v52 }
 0xa3d   : >> { %8310 = vrot.lane.b32.xlu1 %v9187_v26, %s8773_s1 }
 0xa3e   : >> { %8305 = vrot.lane.b32.xlu0 %v9177_v16, %s8773_s1  ;;  %s6793_s1 = sshll.u32 %s8760_s4, 7 }
 0xa41   : >> { %2981 = vrot.lane.b32.xlu1 %v9681_v30, %s10900_s6 }
 0xa42   : >> { %2979 = vrot.lane.b32.xlu0 %v9683_v25, %s10900_s6 }
 0xa45   : >> { %3013 = vrot.lane.b32.xlu1 %v9697_v54, %s10898_s11 }
 0xa46   : >> { %3011 = vrot.lane.b32.xlu0 %v9699_v23, %s10898_s11 }
 0xa49   : >> { %2985 = vrot.lane.b32.xlu1 %v9685_v57, %s10900_s6 }
 0xa4a   : >> { %2983 = vrot.lane.b32.xlu0 %v9687_v7, %s10900_s6 }
 0xa4d   : >> { %3017 = vrot.lane.b32.xlu1 %v9701_v50, %s10898_s11 }
 0xa4e   : >> { %3015 = vrot.lane.b32.xlu0 %v9703_v63, %s10898_s11 }
 0xa51   : >> { %2989 = vrot.lane.b32.xlu1 %v9689_v11, %s10900_s6 }
 0xa52   : >> { %2987 = vrot.lane.b32.xlu0 %v9691_v59, %s10900_s6 }
 0xa55   : >> { %3021 = vrot.lane.b32.xlu1 %v9705_v1, %s10898_s11 }
 0xa56   : >> { %3019 = vrot.lane.b32.xlu0 %v9707_v9, %s10898_s11 }
 0xa59   : >> { %2993 = vrot.lane.b32.xlu1 %v9693_v33, %s10900_s6 }
 0xa5a   : >> { %2991 = vrot.lane.b32.xlu0 %v9695_v37, %s10900_s6 }
 0xa5d   : >> { %3025 = vrot.lane.b32.xlu1 %v9709_v6, %s10898_s11 }
 0xa5e   : >> { %3023 = vrot.lane.b32.xlu0 %v9711_v44, %s10898_s11  ;;  %s10968_s11 = sld [smem:[#allocation32_spill]] }
 0xa64   : >> { %s3340_s6 = scalar_lea.vmem %s10968_s11, %s9122_s28 }
 0xaa8   : >> { %v2783_v16 = vpop.xlane.xlu1 %2782 }
 0xaa9   : >> { %v2780_v26 = vpop.xlane.xlu0 %2779 }
 0xaaa   : >> { %8442 = vrcp.f32 %v2780_v26 }
 0xaab   : >> { %8444 = vrcp.f32 %v2783_v16 }
 0xaad   : >> { %v2789_v30 = vpop.xlane.xlu1 %2788 }
 0xab1   : >> { %v2795_v25 = vpop.xlane.xlu1 %2794  ;;  %v2786_v57 = vpop.xlane.xlu0 %2785 }
 0xab2   : >> { %8446 = vrcp.f32 %v2786_v57 }
 0xab3   : >> { %8448 = vrcp.f32 %v2789_v30 }
 0xab4   : >> { %v8443_v7 = vpop.eup %8442 }
 0xab5   : >> { %v2801_v11 = vpop.xlane.xlu1 %2800  ;;  %v2792_v59 = vpop.xlane.xlu0 %2791  ;;  %v2810_v33 = vmul.f32 %v8443_v7, %v9735_v4 }
 0xab6   : >> { %8450 = vrcp.f32 %v2792_v59  ;;  %v8445_v15 = vpop.eup %8444 }
 0xab7   : >> { %7421 = vmatprep.mubr.msk.f32.mxu1 %vm1451_vm3, %v2810_v33  ;;  %8452 = vrcp.f32 %v2795_v25  ;;  %v2811_v48 = vmul.f32 %v8445_v15, %v9733_v2 }
 0xab9   : >> { %v2798_v37 = vpop.xlane.xlu1 %2797  ;;  %v8306_v54 = vpop.permute.xlu0 %8305 }
 0xaba   : >> { %v8308_v23 = vunpack.i.h.bf16 %v8306_v54  ;;  %v8307_v50 = vunpack.i.l.bf16 %v8306_v54  ;;  %8454 = vrcp.f32 %v2798_v37 }
 0xabb   : >> { %8456 = vrcp.f32 %v2801_v11 }
 0xabc   : >> { %v7920_v63 = vpack.c.bf16 %v8308_v23, %v8307_v50  ;;  %v8447_v4 = vpop.eup %8446 }
 0xabd   : >> { %v8311_v1 = vpop.permute.xlu1 %8310  ;;  %v8449_v22 = vpop.eup %8448  ;;  %v2812_v28 = vmul.f32 %v8447_v4, %v9747_v10 }
 0xabe   : >> { %v8313_v9 = vunpack.i.h.bf16 %v8311_v1  ;;  %v8312_v6 = vunpack.i.l.bf16 %v8311_v1  ;;  %7921 = vmatprep.subr.bf16.mxu1 %v7920_v63  ;;  %v2813_v39 = vmul.f32 %v8449_v22, %v9741_v12  ;;  %v1267_v12 = vld [vmem:[%s1266_s5] sm:$0xff]  ;;  %v2980_v16 = vpop.permute.xlu0 %2979 }
 0xabf   : >> { %7923 = vmatpush3.bf16.msra.mxu1 %v7920_v63  ;;  %v7928_v10 = vpack.c.bf16 %v1268_v31, %v1267_v12 }
 0xac0   : >> { %v7924_v44 = vpack.c.bf16 %v8313_v9, %v8312_v6  ;;  %v8451_v8 = vpop.eup %8450  ;;  %v3067_v9 = vsel %vm1297_vm1, %v9404_v53, %v2980_v16 }
 0xac1   : >> { %v8453_v36 = vpop.eup %8452  ;;  %v2814_v0 = vmul.f32 %v8451_v8, %v9755_v14  ;;  %v2982_v52 = vpop.permute.xlu1 %2981 }
 0xac2   : >> { %7925 = vmatprep.subr.bf16.mxu1 %v7924_v44  ;;  %v2815_v2 = vmul.f32 %v8453_v36, %v9745_v41  ;;  %v1270_v41 = vld [vmem:[%s1266_s5 + $0x18] sm:$0xff]  ;;  %v3012_v30 = vpop.permute.xlu0 %3011  ;;  %s5441_s5 = scalar_lea.vmem %s10867_s15, %s9122_s28 }
 0xac3   : >> { %7927 = vmatpush3.bf16.msra.mxu1 %v7924_v44  ;;  %v7932_v20 = vpack.c.bf16 %v1270_v41, %v1269_v43  ;;  %v3068_v44 = vsel %vm1297_vm1, %v9402_v49, %v2982_v52  ;;  %v3076_v15 = vsel %vm3075_vm4, %v3067_v9, %v3012_v30 }
 0xac4   : >> { %v8455_v56 = vpop.eup %8454  ;;  %7929 = vmatprep.subr.bf16.mxu1 %v7928_v10 }
 0xac5   : >> { %v8457_v27 = vpop.eup %8456  ;;  %v2816_v40 = vmul.f32 %v8455_v56, %v9761_v42  ;;  %v3014_v26 = vpop.permute.xlu1 %3013 }
 0xac6   : >> { %7422 = vmatmul.mubr.msk.f32.vlgmr.msra.gmra.mrb[16].mxu1 %vm1451_vm3, %v2811_v48  ;;  %v2817_v58 = vmul.f32 %v8457_v27, %v9753_v61  ;;  %v2984_v57 = vpop.permute.xlu0 %2983  ;;  %v3077_v48 = vsel %vm3075_vm4, %v3068_v44, %v3014_v26 }
 0xac7   : >> { %7424 = vmatprep.mubr.msk.f32.mxu1 %vm1451_vm3, %v2812_v28  ;;  %7931 = vmatpush3.bf16.msra.mxu1 %v7928_v10  ;;  %v3069_v8 = vsel %vm1297_vm1, %v9408_v19, %v2984_v57 }
 0xac8   : >> { %7933 = vmatprep.subr.bf16.mxu1 %v7932_v20 }
 0xac9   : >> { %v2986_v25 = vpop.permute.xlu1 %2985 }
 0xaca   : >> { %7425 = vmatmul.mubr.msk.f32.gmra.mrb[18].mxu1 %vm1451_vm3, %v2813_v39  ;;  %v3016_v11 = vpop.permute.xlu0 %3015  ;;  %v3070_v49 = vsel %vm1297_vm1, %v9406_v47, %v2986_v25 }
 0xacb   : >> { %7427 = vmatprep.mubr.msk.f32.mxu1 %vm1451_vm3, %v2814_v0  ;;  %7935 = vmatpush3.bf16.msra.mxu1 %v7932_v20  ;;  %v3078_v39 = vsel %vm3075_vm4, %v3069_v8, %v3016_v11  ;;  %v10961_v11 = vld [vmem:[#allocation20_spill] sm:$0xff] }
 0xacd   : >> { %v3018_v7 = vpop.permute.xlu1 %3017 }
 0xace   : >> { %7428 = vmatmul.mubr.msk.f32.gmra.mrb[20].mxu1 %vm1451_vm3, %v2815_v2  ;;  %v2988_v33 = vpop.permute.xlu0 %2987  ;;  %v3079_v0 = vsel %vm3075_vm4, %v3070_v49, %v3018_v7 }
 0xacf   : >> { %7430 = vmatprep.mubr.msk.f32.mxu1 %vm1451_vm3, %v2816_v40  ;;  %v3071_v19 = vsel %vm1297_vm1, %v9412_v35, %v2988_v33 }
 0xad1   : >> { %v2990_v59 = vpop.permute.xlu1 %2989 }
 0xad2   : >> { %7431 = vmatmul.mubr.msk.f32.gmra.mrb[22].mxu1 %vm1451_vm3, %v2817_v58  ;;  %v3020_v54 = vpop.permute.xlu0 %3019  ;;  %v3072_v47 = vsel %vm1297_vm1, %v9410_v55, %v2990_v59 }
 0xad3   : >> { %v3080_v40 = vsel %vm3075_vm4, %v3071_v19, %v3020_v54 }
 0xad5   : >> { %v3022_v37 = vpop.permute.xlu1 %3021 }
 0xad6   : >> { %v2992_v50 = vpop.permute.xlu0 %2991  ;;  %v3081_v12 = vsel %vm3075_vm4, %v3072_v47, %v3022_v37 }
 0xad7   : >> { %v3073_v35 = vsel %vm1297_vm1, %v9416_v29, %v2992_v50  ;;  %v6687_v29 = vld [vmem:[%s1271_s7] ss:$0 sm:$0xff] }
 0xad9   : >> { %v2994_v23 = vpop.permute.xlu1 %2993 }
 0xada   : >> { %v3024_v1 = vpop.permute.xlu0 %3023  ;;  %v3074_v55 = vsel %vm1297_vm1, %v9414_v13, %v2994_v23  ;;  %v10962_v23 = vld [vmem:[#allocation21_spill] sm:$0xff] }
 0xadb   : >> { %v3082_v41 = vsel %vm3075_vm4, %v3073_v35, %v3024_v1  ;;  %v10963_v1 = vld [vmem:[#allocation18_spill] sm:$0xff] }
 0xadd   : >> { %v3026_v63 = vpop.permute.xlu1 %3025 }
 0xb99   : >> { %v7423_v45 = vpop.f32.mrb[16].mxu1 }
 0xb9a   : >> { %3045 = vrot.lane.b32.xlu1 %v7423_v45, %s10896_s0  ;;  %v2932_v18 = vpop.f32.mrb[17].mxu1  ;;  %v3083_v45 = vsel %vm3075_vm4, %v3074_v55, %v3026_v63 }
 0xb9b   : >> { %3043 = vrot.lane.b32.xlu0 %v2932_v18, %s10896_s0 }
 0xb9d   : >> { %v7426_v61 = vpop.f32.mrb[18].mxu1 }
 0xb9e   : >> { %3049 = vrot.lane.b32.xlu1 %v7426_v61, %s10896_s0  ;;  %v2942_v3 = vpop.f32.mrb[19].mxu1 }
 0xb9f   : >> { %3047 = vrot.lane.b32.xlu0 %v2942_v3, %s10896_s0 }
 0xba1   : >> { %v7429_v14 = vpop.f32.mrb[20].mxu1 }
 0xba2   : >> { %3053 = vrot.lane.b32.xlu1 %v7429_v14, %s10896_s0  ;;  %v2952_v38 = vpop.f32.mrb[21].mxu1 }
 0xba3   : >> { %3051 = vrot.lane.b32.xlu0 %v2952_v38, %s10896_s0 }
 0xba5   : >> { %v7432_v24 = vpop.f32.mrb[22].mxu1 }
 0xba6   : >> { %3057 = vrot.lane.b32.xlu1 %v7432_v24, %s10896_s0  ;;  %v2962_v42 = vpop.f32.mrb[23].mxu1 }
 0xba7   : >> { %3055 = vrot.lane.b32.xlu0 %v2962_v42, %s10896_s0  ;;  %v10960_v42 = vld [vmem:[#allocation22_spill] sm:$0xff]  ;;  %s3487_s0 = scalar_lea.vmem %s10864_s12, %s8760_s4 }
 0xc0c   : >> { %v3046_v6 = vpop.permute.xlu1 %3045 }
 0xc0d   : >> { %v3044_v4 = vpop.permute.xlu0 %3043  ;;  %v3086_v28 = vsel %vm3084_vm5, %v3077_v48, %v3046_v6  ;;  %v10964_v48 = vld [vmem:[#allocation19_spill] sm:$0xff] }
 0xc0e   : >> { %v3085_v22 = vsel %vm3084_vm5, %v3076_v15, %v3044_v4 }
 0xc0f   : >> { %7441 = vmatprep.mubr.msk.f32.mxu1 %vm1017_vm0, %v3085_v22 }
 0xc10   : >> { %7442 = vmatmul.mubr.msk.f32.vlgmr.msra.gmra.mrb[24].mxu1 %vm1017_vm0, %v3086_v28  ;;  %v3050_v53 = vpop.permute.xlu1 %3049 }
 0xc11   : >> { %v3048_v36 = vpop.permute.xlu0 %3047  ;;  %v3088_v2 = vsel %vm3084_vm5, %v3079_v0, %v3050_v53  ;;  %v10965_v53 = vld [vmem:[#allocation16_spill] sm:$0xff] }
 0xc12   : >> { %v3087_v56 = vsel %vm3084_vm5, %v3078_v39, %v3048_v36  ;;  %v10966_v36 = vld [vmem:[#allocation17_spill] sm:$0xff] }
 0xc13   : >> { %7444 = vmatprep.mubr.msk.f32.mxu1 %vm1017_vm0, %v3087_v56 }
 0xc14   : >> { %7445 = vmatmul.mubr.msk.f32.gmra.mrb[26].mxu1 %vm1017_vm0, %v3088_v2  ;;  %v3054_v27 = vpop.permute.xlu1 %3053 }
 0xc15   : >> { %v3052_v58 = vpop.permute.xlu0 %3051  ;;  %v3090_v43 = vsel %vm3084_vm5, %v3081_v12, %v3054_v27 }
 0xc16   : >> { %v3089_v31 = vsel %vm3084_vm5, %v3080_v40, %v3052_v58 }
 0xc17   : >> { %7447 = vmatprep.mubr.msk.f32.mxu1 %vm1017_vm0, %v3089_v31 }
 0xc18   : >> { %7448 = vmatmul.mubr.msk.f32.gmra.mrb[28].mxu1 %vm1017_vm0, %v3090_v43  ;;  %v3058_v10 = vpop.permute.xlu1 %3057 }
 0xc19   : >> { %v3056_v20 = vpop.permute.xlu0 %3055  ;;  %v3092_v61 = vsel %vm3084_vm5, %v3083_v45, %v3058_v10 }
 0xc1a   : >> { %v3091_v18 = vsel %vm3084_vm5, %v3082_v41, %v3056_v20 }
 0xc1b   : >> { %7450 = vmatprep.mubr.msk.f32.mxu1 %vm1017_vm0, %v3091_v18 }
 0xc1c   : >> { %7451 = vmatmul.mubr.msk.f32.gmra.mrb[30].mxu1 %vm1017_vm0, %v3092_v61 }
 0xce3   : >> { %v7443_v3 = vpop.f32.mrb[24].mxu1 }
 0xce4   : >> { %v3195_v13 = vadd.f32 %v7443_v3, %v6687_v29  ;;  %v3189_v14 = vpop.f32.mrb[25].mxu1 }
 0xce5   : >> { %v3190_v38 = vadd.f32 %v6687_v29, %v3189_v14 }
 0xce6   : >> { %v9874_v24 = vadd.f32 %v8752_v5, %v3195_v13 }
 0xce7   : >> { %v9877_v52 = vadd.f32 %v10960_v42, %v3190_v38  ;;  %v7446_v16 = vpop.f32.mrb[26].mxu1 }
 0xce8   : >> { %v3205_v26 = vadd.f32 %v7446_v16, %v6687_v29  ;;  %v3199_v30 = vpop.f32.mrb[27].mxu1  ;;  %v3239_v25 = vsel %vm1017_vm0, %v9874_v24, 0.0 }
 0xce9   : >> { %v3200_v57 = vadd.f32 %v6687_v29, %v3199_v30  ;;  %3240 = vadd.xlane.f32.xlu1 %v3239_v25  ;;  %v3236_v7 = vsel %vm1017_vm0, %v9877_v52, 0.0 }
 0xcea   : >> { %v9884_v59 = vadd.f32 %v10961_v11, %v3205_v26  ;;  %3237 = vadd.xlane.f32.xlu0 %v3236_v7 }
 0xceb   : >> { %v7449_v5 = vpop.f32.mrb[28].mxu1  ;;  %v9889_v50 = vadd.f32 %v10962_v23, %v3200_v57 }
 0xcec   : >> { %v3215_v33 = vadd.f32 %v7449_v5, %v6687_v29  ;;  %v3209_v37 = vpop.f32.mrb[29].mxu1  ;;  %v3245_v54 = vsel %vm1017_vm0, %v9884_v59, 0.0 }
 0xced   : >> { %v3210_v63 = vadd.f32 %v6687_v29, %v3209_v37  ;;  %v3242_v8 = vsel %vm1017_vm0, %v9889_v50, 0.0 }
 0xcee   : >> { %v9892_v9 = vadd.f32 %v10963_v1, %v3215_v33  ;;  %3246 = vadd.xlane.f32.xlu0 %v3245_v54 }
 0xcef   : >> { %v7452_v6 = vpop.f32.mrb[30].mxu1  ;;  %v9897_v22 = vadd.f32 %v10964_v48, %v3210_v63  ;;  %v3483_v48 = vld [vmem:[%s3482_s20] sm:$0xff] }
 0xcf0   : >> { %v3225_v44 = vadd.f32 %v7452_v6, %v6687_v29  ;;  %v3219_v15 = vpop.f32.mrb[31].mxu1  ;;  %v3251_v4 = vsel %vm1017_vm0, %v9892_v9, 0.0 }
 0xcf1   : >> { %v3220_v28 = vadd.f32 %v6687_v29, %v3219_v15  ;;  %3252 = vadd.xlane.f32.xlu1 %v3251_v4  ;;  %v3248_v56 = vsel %vm1017_vm0, %v9897_v22, 0.0 }
 0xcf2   : >> { %v9902_v49 = vadd.f32 %v10965_v53, %v3225_v44  ;;  %3243 = vadd.xlane.f32.xlu0 %v3242_v8  ;;  %v8777_v53 = vmov 0.0|0.0  }
 0xcf3   : >> { %v9907_v0 = vadd.f32 %v10966_v36, %v3220_v28  ;;  %v3484_v28 = vld [vmem:[%s3482_s20 + $0x8] sm:$0xff]  ;;  %7944 = vmatprep.subr.bf16.mxu1 %v8777_v53 }
 0xcf4   : >> { %v3257_v39 = vsel %vm1017_vm0, %v9902_v49, 0.0  ;;  %v7945_v8 = vpack.c.bf16 %v3484_v28, %v3483_v48  ;;  %v3342_v36 = vld [vmem:[%s3340_s6 + $0x8] sm:$0xff] }
 0xcf5   : >> { %3258 = vadd.xlane.f32.xlu1 %v3257_v39  ;;  %v3254_v2 = vsel %vm1017_vm0, %v9907_v0, 0.0  ;;  %v3341_v39 = vld [vmem:[%s3340_s6] sm:$0xff] }
 0xcf6   : >> { %3249 = vadd.xlane.f32.xlu0 %v3248_v56  ;;  %7946 = vmatpush3.bf16.msra.mxu1 %v7945_v8  ;;  %v3485_v56 = vld [vmem:[%s3482_s20 + $0x10] sm:$0xff] }
 0xcf7   : >> { %7947 = vmatprep.subr.bf16.mxu1 %v8777_v53 }
 0xcfa   : >> { %3255 = vadd.xlane.f32.xlu0 %v3254_v2  ;;  %v7936_v2 = vpack.c.bf16 %v3342_v36, %v3341_v39 }
 0xcfc   : >> { %7937 = vmatprep.subr.bf16.mxu0 %v7936_v2 }
 0xcfd   : >> { %7939 = vmatpush3.bf16.msra.mxu0 %v7936_v2 }
 0xd76   : >> { %v3241_v19 = vpop.xlane.xlu1 %3240 }
 0xd77   : >> { %v3261_v27 = vmul.f32 0.03125, %v3241_v19  ;;  %v3238_v47 = vpop.xlane.xlu0 %3237  ;;  %v3486_v19 = vld [vmem:[%s3482_s20 + $0x18] sm:$0xff]  ;;  %s3345_s20 = scalar_lea.vmem %s10970_s2, %s8760_s4 }
 0xd78   : >> { %v3260_v40 = vmul.f32 0.03125, %v3238_v47  ;;  %v3343_v47 = vld [vmem:[%s3340_s6 + $0x10] sm:$0xff] }
 0xd79   : >> { %v9914_v58 = vsub.f32 %v9874_v24, %v3261_v27  ;;  %v7948_v27 = vpack.c.bf16 %v3486_v19, %v3485_v56 }
 0xd7a   : >> { %v9917_v12 = vsub.f32 %v9877_v52, %v3260_v40  ;;  %v3344_v40 = vld [vmem:[%s3340_s6 + $0x18] sm:$0xff]  ;;  %s3573_s6 = scalar_lea.vmem %s10866_s14, %s8760_s4 }
 0xd7b   : >> { %v3247_v31 = vpop.xlane.xlu0 %3246  ;;  %v3277_v43 = vmul.f32 %v9914_v58, %v9914_v58  ;;  %7949 = vmatpush3.bf16.msra.mxu1 %v7948_v27 }
 0xd7c   : >> { %v3263_v35 = vmul.f32 0.03125, %v3247_v31  ;;  %v3276_v10 = vmul.f32 %v9917_v12, %v9917_v12  ;;  %v8779_v31 = vmov 0.0  }
 0xd7d   : >> { %v3287_v55 = vsel %vm1017_vm0, %v3277_v43, 0.0  ;;  %7481 = vmatprep.mubr.msk.f32.mxu1 %vm8778_vm6, %v8779_v31  ;;  %v7940_v43 = vpack.c.bf16 %v3344_v40, %v3343_v47 }
 0xd7e   : >> { %v9925_v41 = vsub.f32 %v9884_v59, %v3263_v35  ;;  %v3253_v20 = vpop.xlane.xlu1 %3252  ;;  %3288 = vadd.xlane.f32.xlu1 %v3287_v55  ;;  %v3284_v45 = vsel %vm1017_vm0, %v3276_v10, 0.0  ;;  %v10969_v35 = vld [vmem:[#allocation3_spill] sm:$0xff] }
 0xd7f   : >> { %v3265_v18 = vmul.f32 0.03125, %v3253_v20  ;;  %3285 = vadd.xlane.f32.xlu0 %v3284_v45  ;;  %v3244_v61 = vpop.xlane.xlu0 %3243  ;;  %7482 = vmatmul.mubr.msk.f32.vlgmr.msra.gmra.mrb[32].mxu1 %vm1017_vm0, %v10969_v35 }
 0xd80   : >> { %v3262_v29 = vmul.f32 0.03125, %v3244_v61  ;;  %v3279_v3 = vmul.f32 %v9925_v41, %v9925_v41  ;;  %7941 = vmatprep.subr.bf16.mxu0 %v7940_v43 }
 0xd81   : >> { %v9931_v13 = vsub.f32 %v9892_v9, %v3265_v18  ;;  %7943 = vmatpush3.bf16.msra.mxu0 %v7940_v43 }
 0xd82   : >> { %v9934_v14 = vsub.f32 %v9889_v50, %v3262_v29  ;;  %v3259_v38 = vpop.xlane.xlu1 %3258  ;;  %v3293_v42 = vsel %vm1017_vm0, %v3279_v3, 0.0 }
 0xd83   : >> { %v3267_v16 = vmul.f32 0.03125, %v3259_v38  ;;  %3294 = vadd.xlane.f32.xlu1 %v3293_v42  ;;  %v3250_v26 = vpop.xlane.xlu0 %3249  ;;  %v3281_v30 = vmul.f32 %v9931_v13, %v9931_v13 }
 0xd84   : >> { %v3264_v25 = vmul.f32 0.03125, %v3250_v26  ;;  %v3278_v57 = vmul.f32 %v9934_v14, %v9934_v14 }
 0xd85   : >> { %v9942_v7 = vsub.f32 %v9902_v49, %v3267_v16  ;;  %v3299_v11 = vsel %vm1017_vm0, %v3281_v30, 0.0 }
 0xd86   : >> { %v9946_v5 = vsub.f32 %v9897_v22, %v3264_v25  ;;  %v3290_v33 = vsel %vm1017_vm0, %v3278_v57, 0.0 }
 0xd87   : >> { %3300 = vadd.xlane.f32.xlu1 %v3299_v11  ;;  %3291 = vadd.xlane.f32.xlu0 %v3290_v33  ;;  %v3256_v37 = vpop.xlane.xlu0 %3255  ;;  %v3283_v54 = vmul.f32 %v9942_v7, %v9942_v7 }
 0xd88   : >> { %v3266_v23 = vmul.f32 0.03125, %v3256_v37  ;;  %v3280_v63 = vmul.f32 %v9946_v5, %v9946_v5 }
 0xd89   : >> { %v3305_v1 = vsel %vm1017_vm0, %v3283_v54, 0.0 }
 0xd8a   : >> { %v9955_v6 = vsub.f32 %v9907_v0, %v3266_v23  ;;  %v3296_v44 = vsel %vm1017_vm0, %v3280_v63, 0.0 }
 0xd8b   : >> { %3306 = vadd.xlane.f32.xlu1 %v3305_v1  ;;  %3297 = vadd.xlane.f32.xlu0 %v3296_v44 }
 0xd8c   : >> { %v3282_v15 = vmul.f32 %v9955_v6, %v9955_v6 }
 0xd8e   : >> { %v3302_v4 = vsel %vm1017_vm0, %v3282_v15, 0.0 }
 0xd8f   : >> { %3303 = vadd.xlane.f32.xlu0 %v3302_v4 }
 0xe0b   : >> { %v3289_v10 = vpop.xlane.xlu1 %3288 }
 0xe0c   : >> { %v3309_v55 = vmul.f32 0.03125, %v3289_v10  ;;  %v3286_v20 = vpop.xlane.xlu0 %3285 }
 0xe0d   : >> { %v3308_v45 = vmul.f32 0.03125, %v3286_v20 }
 0xe0e   : >> { %v3317_v18 = vadd.f32 1e-05, %v3309_v55 }
 0xe0f   : >> { %v3316_v61 = vadd.f32 1e-05, %v3308_v45 }
 0xe10   : >> { %8458 = vrsqrt.f32 %v3317_v18  ;;  %v3295_v29 = vpop.xlane.xlu1 %3294 }
 0xe11   : >> { %8460 = vrsqrt.f32 %v3316_v61  ;;  %v3311_v3 = vmul.f32 0.03125, %v3295_v29 }
 0xe13   : >> { %v3319_v16 = vadd.f32 1e-05, %v3311_v3 }
 0xe14   : >> { %v3301_v38 = vpop.xlane.xlu1 %3300  ;;  %v3292_v42 = vpop.xlane.xlu0 %3291 }
 0xe15   : >> { %v3313_v26 = vmul.f32 0.03125, %v3301_v38  ;;  %v3310_v30 = vmul.f32 0.03125, %v3292_v42  ;;  %8462 = vrsqrt.f32 %v3319_v16 }
 0xe17   : >> { %v3318_v25 = vadd.f32 1e-05, %v3310_v30  ;;  %v3321_v33 = vadd.f32 1e-05, %v3313_v26 }
 0xe18   : >> { %v3307_v57 = vpop.xlane.xlu1 %3306  ;;  %v3298_v11 = vpop.xlane.xlu0 %3297 }
 0xe19   : >> { %v3315_v37 = vmul.f32 0.03125, %v3307_v57  ;;  %v3312_v54 = vmul.f32 0.03125, %v3298_v11  ;;  %8464 = vrsqrt.f32 %v3318_v25 }
 0xe1a   : >> { %v8459_v23 = vpop.eup %8458  ;;  %8466 = vrsqrt.f32 %v3321_v33 }
 0xe1b   : >> { %v8461_v63 = vpop.eup %8460  ;;  %v3320_v1 = vadd.f32 1e-05, %v3312_v54  ;;  %v3323_v44 = vadd.f32 1e-05, %v3315_v37  ;;  %v3333_v48 = vmul.f32 %v8459_v23, %v9914_v58 }
 0xe1c   : >> { %v3304_v15 = vpop.xlane.xlu0 %3303  ;;  %v3332_v4 = vmul.f32 %v8461_v63, %v9917_v12 }
 0xe1d   : >> { %v3314_v28 = vmul.f32 0.03125, %v3304_v15  ;;  %8468 = vrsqrt.f32 %v3320_v1 }
 0xe1e   : >> { %7461 = vmatprep.mubr.msk.f32.mxu0 %vm1017_vm0, %v3332_v4  ;;  %8470 = vrsqrt.f32 %v3323_v44 }
 0xe1f   : >> { %v3322_v8 = vadd.f32 1e-05, %v3314_v28  ;;  %7462 = vmatmul.mubr.msk.f32.vlgmr.msra.gmra.mrb[48].mxu0 %vm1017_vm0, %v3333_v48  ;;  %v8463_v53 = vpop.eup %8462 }
 0xe20   : >> { %v3335_v56 = vmul.f32 %v8463_v53, %v9925_v41 }
 0xe21   : >> { %8472 = vrsqrt.f32 %v3322_v8 }
 0xe23   : >> { %v8465_v39 = vpop.eup %8464 }
 0xe24   : >> { %v3334_v36 = vmul.f32 %v8465_v39, %v9934_v14  ;;  %v8467_v12 = vpop.eup %8466 }
 0xe25   : >> { %v3337_v27 = vmul.f32 %v8467_v12, %v9931_v13 }
 0xe26   : >> { %7464 = vmatprep.mubr.msk.f32.mxu0 %vm1017_vm0, %v3334_v36 }
 0xe27   : >> { %v8469_v58 = vpop.eup %8468  ;;  %7465 = vmatmul.mubr.msk.f32.gmra.mrb[50].mxu0 %vm1017_vm0, %v3335_v56 }
 0xe28   : >> { %v3336_v2 = vmul.f32 %v8469_v58, %v9946_v5  ;;  %v8471_v19 = vpop.eup %8470  ;;  %v6705_v5 = vld [vmem:[%s3487_s0] ss:$0 sm:$0xff] }
 0xe29   : >> { %v3339_v41 = vmul.f32 %v8471_v19, %v9942_v7 }
 0xe2a   : >> { %7467 = vmatprep.mubr.msk.f32.mxu0 %vm1017_vm0, %v3336_v2 }
 0xe2b   : >> { %v8473_v47 = vpop.eup %8472  ;;  %7468 = vmatmul.mubr.msk.f32.gmra.mrb[52].mxu0 %vm1017_vm0, %v3337_v27 }
 0xe2c   : >> { %v3338_v14 = vmul.f32 %v8473_v47, %v9955_v6  ;;  %v6696_v6 = vld [vmem:[%s3345_s20] ss:$0 sm:$0xff] }
 0xe2e   : >> { %7470 = vmatprep.mubr.msk.f32.mxu0 %vm1017_vm0, %v3338_v14 }
 0xe2f   : >> { %7471 = vmatmul.mubr.msk.f32.gmra.mrb[54].mxu0 %vm1017_vm0, %v3339_v41 }
 0xe52   : >> { %v3564_v13 = vpop.f32.mrb[32].mxu1 }
 0xe53   : >> { %v9991_v40 = vadd.f32 %v6705_v5, %v3564_v13  ;;  %v7483_v31 = vpop.f32.mrb[33].mxu1 }
 0xe55   : >> { %3959 = vrot.lane.b32.xlu0 %v9991_v40, %s8767_s9  ;;  %7484 = vmatprep.subr.msk.mxu1 %vm1297_vm1, %v9991_v40 }
 0xe56   : >> { %4336 = vrot.lane.b32.xlu1 %v9991_v40, %s8768_s24  ;;  %7485 = vmatpush3.xpose.msk.msra.mxu1 %vm1297_vm1, %v9991_v40 }
 0xec7   : >> { %v3960_v7 = vpop.permute.xlu0 %3959 }
 0xec8   : >> { %7512 = vmatprep.subr.msk.mxu1 %vm1297_vm1, %v3960_v7  ;;  %v4337_v20 = vpop.permute.xlu1 %4336 }
 0xef2   : >> { %v7463_v43 = vpop.f32.mrb[48].mxu0 }
 0xef3   : >> { %v3449_v35 = vadd.f32 %v7463_v43, %v6696_v6  ;;  %v3443_v10 = vpop.f32.mrb[49].mxu0  ;;  %v10971_v43 = vld [vmem:[#allocation9_spill] sm:$0xff] }
 0xef4   : >> { %v3444_v55 = vadd.f32 %v6696_v6, %v3443_v10  ;;  %v10972_v10 = vld [vmem:[#allocation7_spill] sm:$0xff] }
 0xef5   : >> { %3945 = vrot.lane.b32.xlu1 %v3449_v35, %s8767_s9 }
 0xef6   : >> { %4320 = vrot.lane.b32.xlu0 %v3444_v55, %s8768_s24  ;;  %7486 = vmatprep.mubr.msk.f32.mxu1 %vm1297_vm1, %v3444_v55 }
 0xef7   : >> { %7487 = vmatmul.mubr.msk.f32.vlgmr.msra.gmra.mrb[34].mxu1 %vm1297_vm1, %v3449_v35 }
 0xef8   : >> { %7513 = vmatpush3.xpose.msk.msra.mxu1 %vm1297_vm1, %v3960_v7 }
 0xef9   : >> { %3943 = vrot.lane.b32.xlu1 %v3444_v55, %s8767_s9  ;;  %7540 = vmatprep.subr.msk.mxu1 %vm1297_vm1, %v4337_v20 }
 0xefa   : >> { %v7466_v45 = vpop.f32.mrb[50].mxu0 }
 0xefb   : >> { %v3459_v18 = vadd.f32 %v7466_v45, %v6696_v6  ;;  %v3453_v61 = vpop.f32.mrb[51].mxu0 }
 0xefc   : >> { %v3454_v29 = vadd.f32 %v6696_v6, %v3453_v61 }
 0xefd   : >> { %3949 = vrot.lane.b32.xlu0 %v3459_v18, %s8767_s9 }
 0xefe   : >> { %3947 = vrot.lane.b32.xlu1 %v3454_v29, %s8767_s9  ;;  %v7469_v3 = vpop.f32.mrb[52].mxu0  ;;  %7489 = vmatprep.mubr.msk.f32.mxu1 %vm1297_vm1, %v3454_v29 }
 0xeff   : >> { %v3469_v38 = vadd.f32 %v7469_v3, %v6696_v6  ;;  %v3463_v42 = vpop.f32.mrb[53].mxu0  ;;  %7490 = vmatmul.mubr.msk.f32.gmra.mrb[36].mxu1 %vm1297_vm1, %v3459_v18 }
 0xf00   : >> { %v3464_v16 = vadd.f32 %v6696_v6, %v3463_v42  ;;  %v10974_v42 = vld [vmem:[#allocation8_spill] sm:$0xff] }
 0xf01   : >> { %3953 = vrot.lane.b32.xlu0 %v3469_v38, %s8767_s9 }
 0xf02   : >> { %3951 = vrot.lane.b32.xlu1 %v3464_v16, %s8767_s9  ;;  %v7472_v26 = vpop.f32.mrb[54].mxu0  ;;  %7492 = vmatprep.mubr.msk.f32.mxu1 %vm1297_vm1, %v3464_v16 }
 0xf03   : >> { %v3479_v30 = vadd.f32 %v7472_v26, %v6696_v6  ;;  %v3473_v25 = vpop.f32.mrb[55].mxu0  ;;  %7493 = vmatmul.mubr.msk.f32.gmra.mrb[38].mxu1 %vm1297_vm1, %v3469_v38 }
 0xf04   : >> { %v3474_v57 = vadd.f32 %v6696_v6, %v3473_v25 }
 0xf05   : >> { %3957 = vrot.lane.b32.xlu0 %v3479_v30, %s8767_s9 }
 0xf06   : >> { %3955 = vrot.lane.b32.xlu1 %v3474_v57, %s8767_s9  ;;  %7495 = vmatprep.mubr.msk.f32.mxu1 %vm1297_vm1, %v3474_v57  ;;  %s3568_s9 = scalar_lea.vmem %s10865_s13, %s9122_s28 }
 0xf07   : >> { %7496 = vmatmul.mubr.msk.f32.gmra.mrb[40].mxu1 %vm1297_vm1, %v3479_v30 }
 0xf09   : >> { %4324 = vrot.lane.b32.xlu0 %v3454_v29, %s8768_s24 }
 0xf0a   : >> { %4322 = vrot.lane.b32.xlu1 %v3449_v35, %s8768_s24 }
 0xf0d   : >> { %4328 = vrot.lane.b32.xlu0 %v3464_v16, %s8768_s24 }
 0xf0e   : >> { %4326 = vrot.lane.b32.xlu1 %v3459_v18, %s8768_s24 }
 0xf11   : >> { %4332 = vrot.lane.b32.xlu0 %v3474_v57, %s8768_s24 }
 0xf12   : >> { %4330 = vrot.lane.b32.xlu1 %v3469_v38, %s8768_s24 }
 0xf15   : >> { %4713 = vrot.lane.b32.xlu0 %v9991_v40, %s8772_s29 }
 0xf16   : >> { %4334 = vrot.lane.b32.xlu1 %v3479_v30, %s8768_s24  ;;  %s10981_s24 = smov 16  }
 0xf19   : >> { %4699 = vrot.lane.b32.xlu0 %v3449_v35, %s8772_s29 }
 0xf1a   : >> { %4697 = vrot.lane.b32.xlu1 %v3444_v55, %s8772_s29  ;;  %v10973_v55 = vmov %v10972_v10 }
 0xf1d   : >> { %4703 = vrot.lane.b32.xlu0 %v3459_v18, %s8772_s29 }
 0xf1e   : >> { %4701 = vrot.lane.b32.xlu1 %v3454_v29, %s8772_s29 }
 0xf21   : >> { %4707 = vrot.lane.b32.xlu0 %v3469_v38, %s8772_s29 }
 0xf22   : >> { %4705 = vrot.lane.b32.xlu1 %v3464_v16, %s8772_s29 }
 0xf25   : >> { %4711 = vrot.lane.b32.xlu0 %v3479_v30, %s8772_s29  ;;  %v10975_v30 = vld [vmem:[#allocation5_spill] sm:$0xff] }
 0xf26   : >> { %4709 = vrot.lane.b32.xlu1 %v3474_v57, %s8772_s29 }
 0xf2a   : >> { %3811 = vrot.lane.b32.xlu1 %v9991_v40, %s8763_s26  ;;  %s10980_s26 = smov 8  }
 0xf67   : >> { %v3946_v11 = vpop.permute.xlu1 %3945 }
 0xf68   : >> { %v4321_v37 = vpop.permute.xlu0 %4320 }
 0xf6b   : >> { %v3944_v33 = vpop.permute.xlu1 %3943 }
 0xf6c   : >> { %7514 = vmatprep.mubr.msk.f32.mxu1 %vm1297_vm1, %v3944_v33 }
 0xf6d   : >> { %7515 = vmatmul.mubr.msk.f32.vlgmr.msra.gmra.mrb[42].mxu1 %vm1297_vm1, %v3946_v11 }
 0xf6e   : >> { %7541 = vmatpush3.xpose.msk.msra.mxu1 %vm1297_vm1, %v4337_v20 }
 0xf6f   : >> { %v3950_v54 = vpop.permute.xlu0 %3949 }
 0xf70   : >> { %v3948_v23 = vpop.permute.xlu1 %3947 }
 0xf71   : >> { %7517 = vmatprep.mubr.msk.f32.mxu1 %vm1297_vm1, %v3948_v23 }
 0xf72   : >> { %7518 = vmatmul.mubr.msk.f32.gmra.mrb[44].mxu1 %vm1297_vm1, %v3950_v54  ;;  %v10976_v54 = vld [vmem:[#allocation11_spill] sm:$0xff] }
 0xf73   : >> { %v3954_v63 = vpop.permute.xlu0 %3953 }
 0xf74   : >> { %v3952_v1 = vpop.permute.xlu1 %3951 }
 0xf75   : >> { %7520 = vmatprep.mubr.msk.f32.mxu1 %vm1297_vm1, %v3952_v1  ;;  %v10977_v1 = vld [vmem:[#allocation10_spill] sm:$0xff] }
 0xf76   : >> { %7521 = vmatmul.mubr.msk.f32.gmra.mrb[46].mxu1 %vm1297_vm1, %v3954_v63 }
 0xf77   : >> { %v3958_v44 = vpop.permute.xlu0 %3957 }
 0xf78   : >> { %v3956_v15 = vpop.permute.xlu1 %3955 }
 0xf79   : >> { %7523 = vmatprep.mubr.msk.f32.mxu1 %vm1297_vm1, %v3956_v15 }
 0xf7a   : >> { %7524 = vmatmul.mubr.msk.f32.gmra.mrb[48].mxu1 %vm1297_vm1, %v3958_v44 }
 0xf7b   : >> { %7542 = vmatprep.mubr.msk.f32.mxu1 %vm1297_vm1, %v4321_v37  ;;  %v4325_v4 = vpop.permute.xlu0 %4324 }
 0xf7c   : >> { %v4323_v48 = vpop.permute.xlu1 %4322 }
 0xf7e   : >> { %7543 = vmatmul.mubr.msk.f32.vlgmr.msra.gmra.mrb[50].mxu1 %vm1297_vm1, %v4323_v48 }
 0xf7f   : >> { %7545 = vmatprep.mubr.msk.f32.mxu1 %vm1297_vm1, %v4325_v4  ;;  %v4329_v28 = vpop.permute.xlu0 %4328 }
 0xf80   : >> { %v4327_v8 = vpop.permute.xlu1 %4326 }
 0xf82   : >> { %7546 = vmatmul.mubr.msk.f32.gmra.mrb[52].mxu1 %vm1297_vm1, %v4327_v8 }
 0xf83   : >> { %7548 = vmatprep.mubr.msk.f32.mxu1 %vm1297_vm1, %v4329_v28  ;;  %v4333_v53 = vpop.permute.xlu0 %4332 }
 0xf84   : >> { %v4331_v39 = vpop.permute.xlu1 %4330 }
 0xf86   : >> { %7549 = vmatmul.mubr.msk.f32.gmra.mrb[54].mxu1 %vm1297_vm1, %v4331_v39 }
 0xf87   : >> { %7551 = vmatprep.mubr.msk.f32.mxu1 %vm1297_vm1, %v4333_v53  ;;  %v4714_v36 = vpop.permute.xlu0 %4713  ;;  %v10978_v53 = vld [vmem:[#allocation15_spill] sm:$0xff] }
 0xf88   : >> { %v4335_v56 = vpop.permute.xlu1 %4334  ;;  %7568 = vmatprep.subr.msk.mxu1 %vm1297_vm1, %v4714_v36 }
 0xf89   : >> { %7569 = vmatpush3.xpose.msk.msra.mxu1 %vm1297_vm1, %v4714_v36  ;;  %v10979_v36 = vld [vmem:[#allocation13_spill] sm:$0xff] }
 0xf8a   : >> { %7552 = vmatmul.mubr.msk.f32.gmra.mrb[56].mxu1 %vm1297_vm1, %v4335_v56 }
 0xf8b   : >> { %v4700_v12 = vpop.permute.xlu0 %4699 }
 0xf8c   : >> { %v4698_v58 = vpop.permute.xlu1 %4697 }
 0xf8d   : >> { %7570 = vmatprep.mubr.msk.f32.mxu1 %vm1297_vm1, %v4698_v58 }
 0xf8e   : >> { %7571 = vmatmul.mubr.msk.f32.vlgmr.msra.gmra.mrb[58].mxu1 %vm1297_vm1, %v4700_v12 }
 0xf8f   : >> { %v4704_v2 = vpop.permute.xlu0 %4703 }
 0xf90   : >> { %v4702_v19 = vpop.permute.xlu1 %4701 }
 0xf91   : >> { %7573 = vmatprep.mubr.msk.f32.mxu1 %vm1297_vm1, %v4702_v19 }
 0xf92   : >> { %7574 = vmatmul.mubr.msk.f32.gmra.mrb[60].mxu1 %vm1297_vm1, %v4704_v2 }
 0xf93   : >> { %v4708_v27 = vpop.permute.xlu0 %4707 }
 0xf94   : >> { %v4706_v47 = vpop.permute.xlu1 %4705 }
 0xf95   : >> { %7576 = vmatprep.mubr.msk.f32.mxu1 %vm1297_vm1, %v4706_v47 }
 0xf96   : >> { %7577 = vmatmul.mubr.msk.f32.gmra.mrb[62].mxu1 %vm1297_vm1, %v4708_v27 }
 0xf97   : >> { %v4712_v41 = vpop.permute.xlu0 %4711 }
 0xf98   : >> { %v4710_v14 = vpop.permute.xlu1 %4709 }
 0xf99   : >> { %7579 = vmatprep.mubr.msk.f32.mxu1 %vm1297_vm1, %v4710_v14 }
 0xf9a   : >> { %7580 = vmatmul.mubr.msk.f32.gmra.mrb[64].mxu1 %vm1297_vm1, %v4712_v41 }
 0xf9c   : >> { %v3812_v5 = vpop.permute.xlu1 %3811 }
 0xf9d   : >> { %7498 = vmatprep.subr.mxu0 %v3812_v5 }
 0xf9e   : >> { %7499 = vmatpush3.msra.mxu0 %v3812_v5 }
 0xfca   : >> { %v7488_v13 = vpop.f32.mrb[34].mxu1 }
 0xfcb   : >> { %v3708_v31 = vmul.f32 0.35355338, %v7488_v13  ;;  %v3668_v7 = vpop.f32.mrb[35].mxu1 }
 0xfcc   : >> { %v3707_v6 = vmul.f32 0.35355338, %v3668_v7 }
 0xfcd   : >> { %v10072_v35 = vadd.f32 %v3708_v31, %v10971_v43 }
 0xfce   : >> { %v10075_v20 = vadd.f32 %v3707_v6, %v10972_v10 }
 0xfcf   : >> { %v3726_v45 = vsel %vm1297_vm1, %v10072_v35, -inf }
 0xfd0   : >> { %3727 = vmax.xlane.f32.xlu0 %v3726_v45  ;;  %v3723_v18 = vsel %vm1297_vm1, %v10075_v20, -inf }
 0xfd1   : >> { %3724 = vmax.xlane.f32.xlu1 %v3723_v18 }
 0xfd2   : >> { %v7491_v61 = vpop.f32.mrb[36].mxu1 }
 0xfd3   : >> { %v3710_v29 = vmul.f32 0.35355338, %v7491_v61  ;;  %v3678_v3 = vpop.f32.mrb[37].mxu1 }
 0xfd4   : >> { %v3709_v38 = vmul.f32 0.35355338, %v3678_v3 }
 0xfd5   : >> { %v10082_v16 = vadd.f32 %v3710_v29, %v10974_v42 }
 0xfd6   : >> { %v7494_v26 = vpop.f32.mrb[38].mxu1  ;;  %v10085_v25 = vadd.f32 %v3709_v38, %v10975_v30 }
 0xfd7   : >> { %v3712_v57 = vmul.f32 0.35355338, %v7494_v26  ;;  %v3688_v11 = vpop.f32.mrb[39].mxu1  ;;  %v3732_v33 = vsel %vm1297_vm1, %v10082_v16, -inf }
 0xfd8   : >> { %v3711_v37 = vmul.f32 0.35355338, %v3688_v11  ;;  %3733 = vmax.xlane.f32.xlu0 %v3732_v33  ;;  %v3729_v48 = vsel %vm1297_vm1, %v10085_v25, -inf }
 0xfd9   : >> { %v10093_v44 = vadd.f32 %v3712_v57, %v10977_v1 }
 0xfda   : >> { %v10090_v23 = vadd.f32 %v3711_v37, %v10976_v54  ;;  %v7497_v63 = vpop.f32.mrb[40].mxu1 }
 0xfdb   : >> { %v3714_v15 = vmul.f32 0.35355338, %v7497_v63  ;;  %v3698_v4 = vpop.f32.mrb[41].mxu1  ;;  %v3738_v12 = vsel %vm1297_vm1, %v10093_v44, -inf }
 0xfdc   : >> { %v3713_v28 = vmul.f32 0.35355338, %v3698_v4  ;;  %3730 = vmax.xlane.f32.xlu0 %v3729_v48  ;;  %v3735_v8 = vsel %vm1297_vm1, %v10090_v23, -inf }
 0xfdd   : >> { %3736 = vmax.xlane.f32.xlu1 %v3735_v8  ;;  %v10103_v56 = vadd.f32 %v3714_v15, %v10979_v36 }
 0xfde   : >> { %v10100_v39 = vadd.f32 %v3713_v28, %v10978_v53 }
 0xfdf   : >> { %v3744_v2 = vsel %vm1297_vm1, %v10103_v56, -inf }
 0xfe0   : >> { %3739 = vmax.xlane.f32.xlu0 %v3738_v12  ;;  %v3741_v58 = vsel %vm1297_vm1, %v10100_v39, -inf }
 0xfe1   : >> { %3742 = vmax.xlane.f32.xlu1 %v3741_v58 }
 0xfe4   : >> { %3745 = vmax.xlane.f32.xlu0 %v3744_v2 }
0x1040   : >> { %v7516_v19 = vpop.f32.mrb[42].mxu1 }
0x1041   : >> { %v4085_v27 = vmul.f32 0.35355338, %v7516_v19  ;;  %v4045_v47 = vpop.f32.mrb[43].mxu1 }
0x1042   : >> { %v4084_v14 = vmul.f32 0.35355338, %v4045_v47 }
0x1043   : >> { %v10112_v41 = vadd.f32 %v4085_v27, %v10971_v43 }
0x1044   : >> { %v10115_v5 = vadd.f32 %v4084_v14, %v10973_v55 }
0x1045   : >> { %v4103_v13 = vsel %vm1297_vm1, %v10112_v41, -inf  ;;  %v7519_v31 = vpop.f32.mrb[44].mxu1 }
0x1046   : >> { %4104 = vmax.xlane.f32.xlu0 %v4103_v13  ;;  %v4100_v7 = vsel %vm1297_vm1, %v10115_v5, -inf  ;;  %v4087_v6 = vmul.f32 0.35355338, %v7519_v31  ;;  %v4055_v10 = vpop.f32.mrb[45].mxu1 }
0x1047   : >> { %4101 = vmax.xlane.f32.xlu1 %v4100_v7  ;;  %v4086_v45 = vmul.f32 0.35355338, %v4055_v10 }
0x1048   : >> { %v10122_v18 = vadd.f32 %v4087_v6, %v10974_v42 }
0x1049   : >> { %v10125_v61 = vadd.f32 %v4086_v45, %v10975_v30  ;;  %v7522_v29 = vpop.f32.mrb[46].mxu1 }
0x104a   : >> { %v4089_v3 = vmul.f32 0.35355338, %v7522_v29  ;;  %v4065_v38 = vpop.f32.mrb[47].mxu1  ;;  %v4109_v26 = vsel %vm1297_vm1, %v10122_v18, -inf }
0x104b   : >> { %v4088_v57 = vmul.f32 0.35355338, %v4065_v38  ;;  %4110 = vmax.xlane.f32.xlu0 %v4109_v26  ;;  %v4106_v11 = vsel %vm1297_vm1, %v10125_v61, -inf }
0x104c   : >> { %v10132_v33 = vadd.f32 %v4089_v3, %v10977_v1  ;;  %4107 = vmax.xlane.f32.xlu1 %v4106_v11 }
0x104d   : >> { %v10135_v37 = vadd.f32 %v4088_v57, %v10976_v54  ;;  %v7525_v63 = vpop.f32.mrb[48].mxu1 }
0x104e   : >> { %v4091_v15 = vmul.f32 0.35355338, %v7525_v63  ;;  %v4075_v4 = vpop.f32.mrb[49].mxu1  ;;  %v4115_v48 = vsel %vm1297_vm1, %v10132_v33, -inf }
0x104f   : >> { %v4090_v28 = vmul.f32 0.35355338, %v4075_v4  ;;  %4116 = vmax.xlane.f32.xlu0 %v4115_v48  ;;  %v4112_v8 = vsel %vm1297_vm1, %v10135_v37, -inf }
0x1050   : >> { %v10142_v12 = vadd.f32 %v4091_v15, %v10979_v36  ;;  %4113 = vmax.xlane.f32.xlu1 %v4112_v8 }
0x1051   : >> { %v10145_v58 = vadd.f32 %v4090_v28, %v10978_v53  ;;  %v7544_v2 = vpop.f32.mrb[50].mxu1 }
0x1052   : >> { %v4462_v19 = vmul.f32 0.35355338, %v7544_v2  ;;  %v4422_v27 = vpop.f32.mrb[51].mxu1  ;;  %v4121_v47 = vsel %vm1297_vm1, %v10142_v12, -inf }
0x1053   : >> { %v4461_v14 = vmul.f32 0.35355338, %v4422_v27  ;;  %4122 = vmax.xlane.f32.xlu0 %v4121_v47  ;;  %v4118_v13 = vsel %vm1297_vm1, %v10145_v58, -inf }
0x1054   : >> { %v10152_v31 = vadd.f32 %v4462_v19, %v10971_v43  ;;  %4119 = vmax.xlane.f32.xlu1 %v4118_v13 }
0x1055   : >> { %v10155_v7 = vadd.f32 %v4461_v14, %v10973_v55  ;;  %v7547_v6 = vpop.f32.mrb[52].mxu1 }
0x1056   : >> { %v4464_v10 = vmul.f32 0.35355338, %v7547_v6  ;;  %v4432_v45 = vpop.f32.mrb[53].mxu1  ;;  %v4480_v29 = vsel %vm1297_vm1, %v10152_v31, -inf }
0x1057   : >> { %v4463_v3 = vmul.f32 0.35355338, %v4432_v45  ;;  %4481 = vmax.xlane.f32.xlu0 %v4480_v29  ;;  %v4477_v38 = vsel %vm1297_vm1, %v10155_v7, -inf }
0x1058   : >> { %v10162_v26 = vadd.f32 %v4464_v10, %v10974_v42  ;;  %4478 = vmax.xlane.f32.xlu1 %v4477_v38 }
0x1059   : >> { %v10165_v57 = vadd.f32 %v4463_v3, %v10975_v30  ;;  %v7550_v11 = vpop.f32.mrb[54].mxu1 }
0x105a   : >> { %v4466_v63 = vmul.f32 0.35355338, %v7550_v11  ;;  %v4442_v15 = vpop.f32.mrb[55].mxu1  ;;  %v4486_v4 = vsel %vm1297_vm1, %v10162_v26, -inf }
0x105b   : >> { %v4465_v48 = vmul.f32 0.35355338, %v4442_v15  ;;  %4487 = vmax.xlane.f32.xlu0 %v4486_v4  ;;  %v4483_v28 = vsel %vm1297_vm1, %v10165_v57, -inf }
0x105c   : >> { %v10172_v8 = vadd.f32 %v4466_v63, %v10977_v1  ;;  %4484 = vmax.xlane.f32.xlu1 %v4483_v28 }
0x105d   : >> { %v3728_v2 = vpop.xlane.xlu0 %3727  ;;  %v10175_v19 = vadd.f32 %v4465_v48, %v10976_v54  ;;  %v7553_v27 = vpop.f32.mrb[56].mxu1 }
0x105e   : >> { %v3748_v47 = vsub.f32 %v10072_v35, %v3728_v2  ;;  %v3725_v14 = vpop.xlane.xlu1 %3724  ;;  %v4468_v13 = vmul.f32 0.35355338, %v7553_v27  ;;  %v4452_v10 = vpop.f32.mrb[57].mxu1  ;;  %v4492_v45 = vsel %vm1297_vm1, %v10172_v8, -inf }
0x105f   : >> { %v3747_v6 = vsub.f32 %v10075_v20, %v3725_v14  ;;  %v4467_v29 = vmul.f32 0.35355338, %v4452_v10  ;;  %4493 = vmax.xlane.f32.xlu0 %v4492_v45  ;;  %v4489_v3 = vsel %vm1297_vm1, %v10175_v19, -inf }
0x1060   : >> { %v10184_v38 = vadd.f32 %v4468_v13, %v10979_v36  ;;  %4490 = vmax.xlane.f32.xlu1 %v4489_v3  ;;  %v3757_v11 = vmul.f32 1.442695, %v3748_v47 }
0x1061   : >> { %v10187_v35 = vadd.f32 %v4467_v29, %v10978_v53  ;;  %v7572_v63 = vpop.f32.mrb[58].mxu1  ;;  %v3755_v15 = vmul.f32 1.442695, %v3747_v6 }
0x1062   : >> { %v4839_v20 = vmul.f32 0.35355338, %v7572_v63  ;;  %v4799_v4 = vpop.f32.mrb[59].mxu1  ;;  %v4498_v48 = vsel %vm1297_vm1, %v10184_v38, -inf  ;;  %8474 = vpow2.f32 %v3757_v11 }
0x1063   : >> { %v4838_v28 = vmul.f32 0.35355338, %v4799_v4  ;;  %4499 = vmax.xlane.f32.xlu0 %v4498_v48  ;;  %v4495_v2 = vsel %vm1297_vm1, %v10187_v35, -inf  ;;  %8476 = vpow2.f32 %v3755_v15 }
0x1064   : >> { %v10194_v27 = vadd.f32 %v4839_v20, %v10971_v43  ;;  %4496 = vmax.xlane.f32.xlu1 %v4495_v2 }
0x1065   : >> { %v10197_v47 = vadd.f32 %v4838_v28, %v10973_v55  ;;  %v7575_v14 = vpop.f32.mrb[60].mxu1  ;;  %v10199_v13 = vpop.xlane.xlu0 %3733 }
0x1066   : >> { %v4841_v6 = vmul.f32 0.35355338, %v7575_v14  ;;  %v4809_v10 = vpop.f32.mrb[61].mxu1  ;;  %v4857_v45 = vsel %vm1297_vm1, %v10194_v27, -inf }
0x1067   : >> { %v4840_v29 = vmul.f32 0.35355338, %v4809_v10  ;;  %4858 = vmax.xlane.f32.xlu0 %v4857_v45  ;;  %v4854_v3 = vsel %vm1297_vm1, %v10197_v47, -inf }
0x1068   : >> { %v10206_v63 = vadd.f32 %v4841_v6, %v10974_v42  ;;  %4855 = vmax.xlane.f32.xlu1 %v4854_v3 }
0x1069   : >> { %v10209_v11 = vadd.f32 %v4840_v29, %v10975_v30  ;;  %v7578_v20 = vpop.f32.mrb[62].mxu1  ;;  %v3731_v4 = vpop.xlane.xlu0 %3730 }
0x106a   : >> { %v4843_v15 = vmul.f32 0.35355338, %v7578_v20  ;;  %v3749_v48 = vsub.f32 %v10085_v25, %v3731_v4  ;;  %v3737_v28 = vpop.xlane.xlu1 %3736  ;;  %v4819_v2 = vpop.f32.mrb[63].mxu1  ;;  %v4863_v14 = vsel %vm1297_vm1, %v10206_v63, -inf }
0x106b   : >> { %v3751_v10 = vsub.f32 %v10090_v23, %v3737_v28  ;;  %v4842_v45 = vmul.f32 0.35355338, %v4819_v2  ;;  %4864 = vmax.xlane.f32.xlu0 %v4863_v14  ;;  %v4860_v6 = vsel %vm1297_vm1, %v10209_v11, -inf }
0x106c   : >> { %v10218_v29 = vadd.f32 %v4843_v15, %v10977_v1  ;;  %v3759_v3 = vmul.f32 1.442695, %v3749_v48  ;;  %4861 = vmax.xlane.f32.xlu1 %v4860_v6  ;;  %v10225_v28 = vpop.eup %8474 }
0x106d   : >> { %v10221_v20 = vadd.f32 %v4842_v45, %v10976_v54  ;;  %v7581_v25 = vpop.f32.mrb[64].mxu1  ;;  %v3763_v4 = vmul.f32 1.442695, %v3751_v10  ;;  %v10230_v14 = vpop.eup %8476  ;;  %v3774_v6 = vsel %vm1297_vm1, %v10225_v28, 0.0 }
0x106e   : >> { %8478 = vpow2.f32 %v3759_v3  ;;  %v4845_v17 = vmul.f32 0.35355338, %v7581_v25  ;;  %v3743_v21 = vpop.xlane.xlu1 %3742  ;;  %v4829_v30 = vpop.f32.mrb[65].mxu1  ;;  %v4869_v23 = vsel %vm1297_vm1, %v10218_v29, -inf }
0x106f   : >> { %v3753_v2 = vsub.f32 %v10100_v39, %v3743_v21  ;;  %v4844_v15 = vmul.f32 0.35355338, %v4829_v30  ;;  %4870 = vmax.xlane.f32.xlu0 %v4869_v23  ;;  %v4866_v48 = vsel %vm1297_vm1, %v10221_v20, -inf  ;;  %8480 = vpow2.f32 %v3763_v4 }
0x1070   : >> { %4867 = vmax.xlane.f32.xlu1 %v4866_v48  ;;  %v10233_v10 = vadd.f32 %v4845_v17, %v10979_v36  ;;  %v3771_v21 = vsel %vm1297_vm1, %v10230_v14, 0.0  ;;  %v3740_v48 = vpop.xlane.xlu0 %3739 }
0x1071   : >> { %v3767_v45 = vmul.f32 1.442695, %v3753_v2  ;;  %v10238_v3 = vadd.f32 %v4844_v15, %v10978_v53 }
0x1072   : >> { %v4875_v30 = vsel %vm1297_vm1, %v10233_v10, -inf }
0x1073   : >> { %3775 = vadd.xlane.f32.xlu0 %v3774_v6  ;;  %8482 = vpow2.f32 %v3767_v45  ;;  %v4872_v17 = vsel %vm1297_vm1, %v10238_v3, -inf  ;;  %v3750_v45 = vsub.f32 %v10082_v16, %v10199_v13 }
0x1074   : >> { %3772 = vadd.xlane.f32.xlu1 %v3771_v21  ;;  %v3752_v21 = vsub.f32 %v10093_v44, %v3740_v48 }
0x1075   : >> { %v3761_v6 = vmul.f32 1.442695, %v3750_v45 }
0x1077   : >> { %4876 = vmax.xlane.f32.xlu0 %v4875_v30  ;;  %v3746_v30 = vpop.xlane.xlu0 %3745  ;;  %8484 = vpow2.f32 %v3761_v6 }
0x1078   : >> { %v10246_v39 = vpop.eup %8478  ;;  %4873 = vmax.xlane.f32.xlu1 %v4872_v17  ;;  %v3765_v17 = vmul.f32 1.442695, %v3752_v21 }
0x1079   : >> { %v3777_v25 = vsel %vm1297_vm1, %v10246_v39, 0.0  ;;  %v10250_v4 = vpop.eup %8480 }
0x107a   : >> { %v3783_v23 = vsel %vm1297_vm1, %v10250_v4, 0.0  ;;  %8486 = vpow2.f32 %v3765_v17 }
0x107c   : >> { %3778 = vadd.xlane.f32.xlu1 %v3777_v25  ;;  %v3754_v25 = vsub.f32 %v10103_v56, %v3746_v30 }
0x107d   : >> { %v10254_v2 = vpop.eup %8482 }
0x107e   : >> { %v3789_v15 = vsel %vm1297_vm1, %v10254_v2, 0.0 }
0x1080   : >> { %3784 = vadd.xlane.f32.xlu1 %v3783_v23  ;;  %v3769_v23 = vmul.f32 1.442695, %v3754_v25 }
0x1081   : >> { %v10264_v1 = vpop.eup %8484 }
0x1082   : >> { %8488 = vpow2.f32 %v3769_v23 }
0x1084   : >> { %3790 = vadd.xlane.f32.xlu1 %v3789_v15  ;;  %v3780_v15 = vsel %vm1297_vm1, %v10264_v1, 0.0  ;;  %v10268_v32 = vpop.eup %8486 }
0x1085   : >> { %v3786_v16 = vsel %vm1297_vm1, %v10268_v32, 0.0 }
0x108c   : >> { %v10272_v44 = vpop.eup %8488 }
0x108d   : >> { %4188 = vrot.lane.b32.xlu0 %v9991_v40, %s8765_s8  ;;  %v3792_v56 = vsel %vm1297_vm1, %v10272_v44, 0.0 }
0x10ac   : >> { %3781 = vadd.xlane.f32.xlu0 %v3780_v15 }
0x10b0   : >> { %3787 = vadd.xlane.f32.xlu0 %v3786_v16 }
0x10b4   : >> { %3793 = vadd.xlane.f32.xlu0 %v3792_v56 }
0x10d3   : >> { %v4105_v13 = vpop.xlane.xlu0 %4104 }
0x10d4   : >> { %v4125_v48 = vsub.f32 %v10112_v41, %v4105_v13  ;;  %v4102_v45 = vpop.xlane.xlu1 %4101 }
0x10d5   : >> { %v4124_v6 = vsub.f32 %v10115_v5, %v4102_v45 }
0x10d6   : >> { %v4134_v21 = vmul.f32 1.442695, %v4125_v48 }
0x10d7   : >> { %v4132_v30 = vmul.f32 1.442695, %v4124_v6 }
0x10d8   : >> { %8490 = vpow2.f32 %v4134_v21  ;;  %v4111_v17 = vpop.xlane.xlu0 %4110 }
0x10d9   : >> { %8492 = vpow2.f32 %v4132_v30  ;;  %v4127_v25 = vsub.f32 %v10122_v18, %v4111_v17  ;;  %v4108_v23 = vpop.xlane.xlu1 %4107 }
0x10da   : >> { %v4126_v15 = vsub.f32 %v10125_v61, %v4108_v23 }
0x10db   : >> { %v4138_v16 = vmul.f32 1.442695, %v4127_v25 }
0x10dc   : >> { %v4136_v34 = vmul.f32 1.442695, %v4126_v15  ;;  %v4117_v36 = vpop.xlane.xlu0 %4116 }
0x10dd   : >> { %8494 = vpow2.f32 %v4138_v16  ;;  %v4129_v56 = vsub.f32 %v10132_v33, %v4117_v36  ;;  %v4114_v41 = vpop.xlane.xlu1 %4113 }
0x10de   : >> { %8496 = vpow2.f32 %v4136_v34  ;;  %v4128_v5 = vsub.f32 %v10135_v37, %v4114_v41 }
0x10df   : >> { %v4142_v13 = vmul.f32 1.442695, %v4129_v56 }
0x10e0   : >> { %v4140_v48 = vmul.f32 1.442695, %v4128_v5  ;;  %v4123_v45 = vpop.xlane.xlu0 %4122 }
0x10e1   : >> { %8498 = vpow2.f32 %v4142_v13  ;;  %v4131_v18 = vsub.f32 %v10142_v12, %v4123_v45  ;;  %v4120_v21 = vpop.xlane.xlu1 %4119 }
0x10e2   : >> { %v10282_v6 = vpop.eup %8490  ;;  %8500 = vpow2.f32 %v4140_v48  ;;  %v4130_v30 = vsub.f32 %v10145_v58, %v4120_v21 }
0x10e3   : >> { %v10285_v61 = vpop.eup %8492  ;;  %v4151_v36 = vsel %vm1297_vm1, %v10282_v6, 0.0  ;;  %v4146_v34 = vmul.f32 1.442695, %v4131_v18 }
0x10e4   : >> { %4152 = vadd.xlane.f32.xlu0 %v4151_v36  ;;  %v4148_v33 = vsel %vm1297_vm1, %v10285_v61, 0.0  ;;  %v4144_v37 = vmul.f32 1.442695, %v4130_v30  ;;  %v4482_v17 = vpop.xlane.xlu0 %4481 }
0x10e5   : >> { %4149 = vadd.xlane.f32.xlu1 %v4148_v33  ;;  %8502 = vpow2.f32 %v4146_v34  ;;  %v4502_v12 = vsub.f32 %v10152_v31, %v4482_v17  ;;  %v4479_v25 = vpop.xlane.xlu1 %4478 }
0x10e6   : >> { %8504 = vpow2.f32 %v4144_v37  ;;  %v4501_v58 = vsub.f32 %v10155_v7, %v4479_v25 }
0x10e7   : >> { %v10293_v23 = vpop.eup %8494  ;;  %v4511_v15 = vmul.f32 1.442695, %v4502_v12 }
0x10e8   : >> { %v10296_v16 = vpop.eup %8496  ;;  %v4488_v56 = vpop.xlane.xlu0 %4487  ;;  %v4157_v41 = vsel %vm1297_vm1, %v10293_v23, 0.0  ;;  %v4509_v45 = vmul.f32 1.442695, %v4501_v58 }
0x10e9   : >> { %v4485_v5 = vpop.xlane.xlu1 %4484  ;;  %4158 = vadd.xlane.f32.xlu0 %v4157_v41  ;;  %v4154_v13 = vsel %vm1297_vm1, %v10296_v16, 0.0  ;;  %8506 = vpow2.f32 %v4511_v15  ;;  %v4504_v7 = vsub.f32 %v10162_v26, %v4488_v56 }
0x10ea   : >> { %v4503_v31 = vsub.f32 %v10165_v57, %v4485_v5  ;;  %4155 = vadd.xlane.f32.xlu1 %v4154_v13 }
0x10eb   : >> { %v10303_v48 = vpop.eup %8498  ;;  %v4515_v26 = vmul.f32 1.442695, %v4504_v7 }
0x10ec   : >> { %v10306_v18 = vpop.eup %8500  ;;  %v4513_v21 = vmul.f32 1.442695, %v4503_v31  ;;  %v4494_v30 = vpop.xlane.xlu0 %4493  ;;  %v4163_v36 = vsel %vm1297_vm1, %v10303_v48, 0.0 }
0x10ed   : >> { %v4506_v34 = vsub.f32 %v10172_v8, %v4494_v30  ;;  %v4491_v33 = vpop.xlane.xlu1 %4490  ;;  %4164 = vadd.xlane.f32.xlu0 %v4163_v36  ;;  %v4160_v57 = vsel %vm1297_vm1, %v10306_v18, 0.0 }
0x10ee   : >> { %8508 = vpow2.f32 %v4513_v21  ;;  %4161 = vadd.xlane.f32.xlu1 %v4160_v57  ;;  %v4505_v56 = vsub.f32 %v10175_v19, %v4491_v33 }
0x10ef   : >> { %v10313_v37 = vpop.eup %8502  ;;  %8510 = vpow2.f32 %v4509_v45  ;;  %v4519_v15 = vmul.f32 1.442695, %v4506_v34 }
0x10f0   : >> { %v4500_v17 = vpop.xlane.xlu0 %4499  ;;  %v4169_v12 = vsel %vm1297_vm1, %v10313_v37, 0.0  ;;  %v10317_v25 = vpop.eup %8504  ;;  %8512 = vpow2.f32 %v4515_v26  ;;  %v4517_v30 = vmul.f32 1.442695, %v4505_v56 }
0x10f1   : >> { %v4497_v58 = vpop.xlane.xlu1 %4496  ;;  %4170 = vadd.xlane.f32.xlu0 %v4169_v12  ;;  %v4166_v13 = vsel %vm1297_vm1, %v10317_v25, 0.0  ;;  %8514 = vpow2.f32 %v4519_v15 }
0x10f2   : >> { %v4507_v8 = vsub.f32 %v10187_v35, %v4497_v58  ;;  %v4508_v35 = vsub.f32 %v10184_v38, %v4500_v17 }
0x10f3   : >> { %v10323_v31 = vpop.eup %8506 }
0x10f4   : >> { %v4521_v41 = vmul.f32 1.442695, %v4507_v8  ;;  %v4859_v5 = vpop.xlane.xlu0 %4858  ;;  %v4528_v57 = vsel %vm1297_vm1, %v10323_v31, 0.0  ;;  %v4523_v17 = vmul.f32 1.442695, %v4508_v35 }
0x10f5   : >> { %v4879_v45 = vsub.f32 %v10194_v27, %v4859_v5  ;;  %v4856_v7 = vpop.xlane.xlu1 %4855  ;;  %4167 = vadd.xlane.f32.xlu0 %v4166_v13 }
0x10f6   : >> { %8516 = vpow2.f32 %v4521_v41  ;;  %v4878_v21 = vsub.f32 %v10197_v47, %v4856_v7 }
0x10f7   : >> { %v4888_v36 = vmul.f32 1.442695, %v4879_v45 }
0x10f8   : >> { %v10328_v19 = vpop.eup %8508  ;;  %v4886_v34 = vmul.f32 1.442695, %v4878_v21  ;;  %v4865_v33 = vpop.xlane.xlu0 %4864 }
0x10f9   : >> { %v10332_v26 = vpop.eup %8510  ;;  %8518 = vpow2.f32 %v4888_v36  ;;  %v4881_v27 = vsub.f32 %v10206_v63, %v4865_v33  ;;  %v4862_v12 = vpop.xlane.xlu1 %4861  ;;  %4529 = vadd.xlane.f32.xlu0 %v4528_v57  ;;  %v4531_v47 = vsel %vm1297_vm1, %v10328_v19, 0.0 }
0x10fa   : >> { %v4880_v38 = vsub.f32 %v10209_v11, %v4862_v12  ;;  %4532 = vadd.xlane.f32.xlu1 %v4531_v47  ;;  %8520 = vpow2.f32 %v4517_v30  ;;  %v4525_v8 = vsel %vm1297_vm1, %v10332_v26, 0.0  ;;  %v10340_v56 = vpop.eup %8512 }
0x10fb   : >> { %8522 = vpow2.f32 %v4886_v34  ;;  %v4892_v15 = vmul.f32 1.442695, %v4881_v27  ;;  %v10342_v5 = vpop.eup %8514  ;;  %v4534_v7 = vsel %vm1297_vm1, %v10340_v56, 0.0 }
0x10fc   : >> { %v4871_v58 = vpop.xlane.xlu0 %4870  ;;  %v4890_v63 = vmul.f32 1.442695, %v4880_v38  ;;  %8524 = vpow2.f32 %v4523_v17  ;;  %v4540_v36 = vsel %vm1297_vm1, %v10342_v5, 0.0 }
0x10fd   : >> { %v4868_v41 = vpop.xlane.xlu1 %4867  ;;  %4526 = vadd.xlane.f32.xlu0 %v4525_v8  ;;  %8526 = vpow2.f32 %v4892_v15  ;;  %v4883_v11 = vsub.f32 %v10218_v29, %v4871_v58 }
0x10fe   : >> { %8528 = vpow2.f32 %v4890_v63  ;;  %v4882_v29 = vsub.f32 %v10221_v20, %v4868_v41 }
0x10ff   : >> { %v4896_v34 = vmul.f32 1.442695, %v4883_v11 }
0x1100   : >> { %v10344_v13 = vpop.eup %8516  ;;  %v3776_v45 = vpop.xlane.xlu0 %3775  ;;  %v4894_v58 = vmul.f32 1.442695, %v4882_v29 }
0x1101   : >> { %v3773_v21 = vpop.xlane.xlu1 %3772  ;;  %4535 = vadd.xlane.f32.xlu0 %v4534_v7  ;;  %v4543_v30 = vsel %vm1297_vm1, %v10344_v13, 0.0  ;;  %8530 = vrcp.f32 %v3776_v45 }
0x1102   : >> { %4544 = vadd.xlane.f32.xlu1 %v4543_v30  ;;  %8532 = vrcp.f32 %v3773_v21 }
0x1103   : >> { %v10351_v35 = vpop.eup %8518  ;;  %8534 = vpow2.f32 %v4896_v34 }
0x1104   : >> { %v4877_v33 = vpop.xlane.xlu0 %4876  ;;  %v4905_v57 = vsel %vm1297_vm1, %v10351_v35, 0.0  ;;  %v10358_v27 = vpop.eup %8520 }
0x1105   : >> { %v4885_v12 = vsub.f32 %v10233_v10, %v4877_v33  ;;  %v4874_v47 = vpop.xlane.xlu1 %4873  ;;  %4541 = vadd.xlane.f32.xlu0 %v4540_v36  ;;  %v10361_v38 = vpop.eup %8522  ;;  %v4537_v41 = vsel %vm1297_vm1, %v10358_v27, 0.0 }
0x1106   : >> { %v4884_v17 = vsub.f32 %v10238_v3, %v4874_v47  ;;  %4906 = vadd.xlane.f32.xlu1 %v4905_v57  ;;  %v10366_v63 = vpop.eup %8524  ;;  %v4902_v10 = vsel %vm1297_vm1, %v10361_v38, 0.0 }
0x1107   : >> { %v4900_v15 = vmul.f32 1.442695, %v4885_v12  ;;  %v10370_v45 = vpop.eup %8526  ;;  %v4546_v7 = vsel %vm1297_vm1, %v10366_v63, 0.0 }
0x1108   : >> { %v4898_v20 = vmul.f32 1.442695, %v4884_v17  ;;  %v4189_v8 = vpop.permute.xlu0 %4188  ;;  %v10372_v3 = vpop.eup %8528  ;;  %v4911_v30 = vsel %vm1297_vm1, %v10370_v45, 0.0 }
0x1109   : >> { %8536 = vpow2.f32 %v4900_v15  ;;  %v3779_v11 = vpop.xlane.xlu1 %3778  ;;  %4538 = vadd.xlane.f32.xlu0 %v4537_v41  ;;  %7526 = vmatprep.subr.mxu0 %v4189_v8  ;;  %v4908_v33 = vsel %vm1297_vm1, %v10372_v3, 0.0 }
0x110a   : >> { %8538 = vpow2.f32 %v4898_v20  ;;  %4903 = vadd.xlane.f32.xlu1 %v4902_v10 }
0x110b   : >> { %8540 = vrcp.f32 %v3779_v11  ;;  %v8531_v21 = vpop.eup %8530 }
0x110c   : >> { %8542 = vpow2.f32 %v4894_v58  ;;  %v8533_v36 = vpop.eup %8532  ;;  %v3804_v29 = vmul.f32 %v8531_v21, %v10225_v28 }
0x110d   : >> { %4547 = vadd.xlane.f32.xlu0 %v4546_v7  ;;  %v3803_v34 = vmul.f32 %v8533_v36, %v10230_v14  ;;  %v10383_v57 = vpop.eup %8534  ;;  %v3785_v41 = vpop.xlane.xlu1 %3784 }
0x110e   : >> { %4912 = vadd.xlane.f32.xlu1 %v4911_v30  ;;  %v4917_v28 = vsel %vm1297_vm1, %v10383_v57, 0.0  ;;  %8544 = vrcp.f32 %v3785_v41 }
0x110f   : >> { %7500 = vmatprep.mubr.msk.f32.mxu0 %vm1297_vm1, %v3803_v34 }
0x1110   : >> { %7501 = vmatmul.mubr.msk.f32.vlgmr.msra.gmra.mrb[56].mxu0 %vm1297_vm1, %v3804_v29 }
0x1111   : >> { %7527 = vmatpush3.msra.mxu0 %v4189_v8 }
0x1112   : >> { %4909 = vadd.xlane.f32.xlu1 %v4908_v33 }
0x1113   : >> { %v10386_v12 = vpop.eup %8536 }
0x1114   : >> { %v10388_v47 = vpop.eup %8538  ;;  %v4923_v14 = vsel %vm1297_vm1, %v10386_v12, 0.0 }
0x1115   : >> { %v8541_v17 = vpop.eup %8540  ;;  %4924 = vadd.xlane.f32.xlu0 %v4923_v14  ;;  %v4920_v20 = vsel %vm1297_vm1, %v10388_v47, 0.0 }
0x1116   : >> { %v10394_v15 = vpop.eup %8542  ;;  %4918 = vadd.xlane.f32.xlu1 %v4917_v28  ;;  %v3805_v58 = vmul.f32 %v8541_v17, %v10246_v39  ;;  %v3791_v39 = vpop.xlane.xlu1 %3790 }
0x1117   : >> { %v4914_v8 = vsel %vm1297_vm1, %v10394_v15, 0.0 }
0x1118   : >> { %7503 = vmatprep.mubr.msk.f32.mxu0 %vm1297_vm1, %v3805_v58  ;;  %v8545_v21 = vpop.eup %8544 }
0x1119   : >> { %4921 = vadd.xlane.f32.xlu0 %v4920_v20  ;;  %v3807_v34 = vmul.f32 %v8545_v21, %v10250_v4 }
0x111a   : >> { %4915 = vadd.xlane.f32.xlu1 %v4914_v8 }
0x112b   : >> { %4565 = vrot.lane.b32.xlu1 %v9991_v40, %s8766_s30  ;;  %s5446_s30 = scalar_lea.vmem %s10868_s16, %s8760_s4 }
0x112f   : >> { %4942 = vrot.lane.b32.xlu0 %v9991_v40, %s8771_s10  ;;  %s10982_s10 = smov 24  }
0x1139   : >> { %v3782_v11 = vpop.xlane.xlu0 %3781 }
0x113a   : >> { %8546 = vrcp.f32 %v3782_v11 }
0x113b   : >> { %8548 = vrcp.f32 %v3791_v39 }
0x113d   : >> { %v3788_v10 = vpop.xlane.xlu0 %3787 }
0x113e   : >> { %8550 = vrcp.f32 %v3788_v10 }
0x1141   : >> { %v3794_v7 = vpop.xlane.xlu0 %3793 }
0x1142   : >> { %8552 = vrcp.f32 %v3794_v7 }
0x1144   : >> { %v8547_v30 = vpop.eup %8546 }
0x1145   : >> { %v3806_v36 = vmul.f32 %v8547_v30, %v10264_v1  ;;  %v8549_v29 = vpop.eup %8548 }
0x1146   : >> { %v3809_v14 = vmul.f32 %v8549_v29, %v10254_v2 }
0x1147   : >> { %7504 = vmatmul.mubr.msk.f32.gmra.mrb[58].mxu0 %vm1297_vm1, %v3806_v36 }
0x1148   : >> { %v8551_v40 = vpop.eup %8550  ;;  %7506 = vmatprep.mubr.msk.f32.mxu0 %vm1297_vm1, %v3807_v34 }
0x1149   : >> { %v3808_v33 = vmul.f32 %v8551_v40, %v10268_v32 }
0x114b   : >> { %7507 = vmatmul.mubr.msk.f32.gmra.mrb[60].mxu0 %vm1297_vm1, %v3808_v33 }
0x114c   : >> { %v8553_v17 = vpop.eup %8552  ;;  %7509 = vmatprep.mubr.msk.f32.mxu0 %vm1297_vm1, %v3809_v14 }
0x114d   : >> { %v3810_v28 = vmul.f32 %v8553_v17, %v10272_v44 }
0x114f   : >> { %7510 = vmatmul.mubr.msk.f32.gmra.mrb[62].mxu0 %vm1297_vm1, %v3810_v28 }
0x1171   : >> { %v4153_v1 = vpop.xlane.xlu0 %4152 }
0x1172   : >> { %8554 = vrcp.f32 %v4153_v1  ;;  %v4150_v4 = vpop.xlane.xlu1 %4149 }
0x1173   : >> { %8556 = vrcp.f32 %v4150_v4 }
0x1176   : >> { %v4159_v58 = vpop.xlane.xlu0 %4158 }
0x1177   : >> { %8558 = vrcp.f32 %v4159_v58  ;;  %v4156_v20 = vpop.xlane.xlu1 %4155 }
0x1178   : >> { %8560 = vrcp.f32 %v4156_v20 }
0x117a   : >> { %v4165_v32 = vpop.xlane.xlu0 %4164 }
0x117b   : >> { %8562 = vrcp.f32 %v4165_v32  ;;  %v4162_v2 = vpop.xlane.xlu1 %4161 }
0x117c   : >> { %v8555_v8 = vpop.eup %8554  ;;  %8564 = vrcp.f32 %v4162_v2 }
0x117d   : >> { %v8557_v41 = vpop.eup %8556  ;;  %v4181_v44 = vmul.f32 %v8555_v8, %v10282_v6 }
0x117e   : >> { %v4180_v11 = vmul.f32 %v8557_v41, %v10285_v61  ;;  %v4171_v39 = vpop.xlane.xlu0 %4170 }
0x117f   : >> { %8566 = vrcp.f32 %v4171_v39 }
0x1180   : >> { %7528 = vmatprep.mubr.msk.f32.mxu0 %vm1297_vm1, %v4180_v11 }
0x1181   : >> { %7529 = vmatmul.mubr.msk.f32.vlgmr.msra.gmra.mrb[64].mxu0 %vm1297_vm1, %v4181_v44  ;;  %v8559_v10 = vpop.eup %8558 }
0x1182   : >> { %v8561_v7 = vpop.eup %8560  ;;  %v4168_v21 = vpop.xlane.xlu0 %4167  ;;  %v4183_v36 = vmul.f32 %v8559_v10, %v10293_v23 }
0x1183   : >> { %8568 = vrcp.f32 %v4168_v21  ;;  %v4182_v30 = vmul.f32 %v8561_v7, %v10296_v16 }
0x1185   : >> { %v8563_v34 = vpop.eup %8562  ;;  %7531 = vmatprep.mubr.msk.f32.mxu0 %vm1297_vm1, %v4182_v30 }
0x1186   : >> { %v8565_v61 = vpop.eup %8564  ;;  %7532 = vmatmul.mubr.msk.f32.gmra.mrb[66].mxu0 %vm1297_vm1, %v4183_v36  ;;  %v4530_v6 = vpop.xlane.xlu0 %4529  ;;  %v4185_v40 = vmul.f32 %v8563_v34, %v10303_v48 }
0x1187   : >> { %v4184_v29 = vmul.f32 %v8565_v61, %v10306_v18  ;;  %v4533_v14 = vpop.xlane.xlu1 %4532 }
0x1189   : >> { %7534 = vmatprep.mubr.msk.f32.mxu0 %vm1297_vm1, %v4184_v29  ;;  %v8567_v16 = vpop.eup %8566 }
0x118a   : >> { %7535 = vmatmul.mubr.msk.f32.gmra.mrb[68].mxu0 %vm1297_vm1, %v4185_v40  ;;  %v4527_v33 = vpop.xlane.xlu0 %4526  ;;  %v4187_v4 = vmul.f32 %v8567_v16, %v10313_v37 }
0x118b   : >> { %8570 = vrcp.f32 %v4527_v33 }
0x118c   : >> { %8572 = vrcp.f32 %v4530_v6 }
0x118d   : >> { %v8569_v23 = vpop.eup %8568  ;;  %8574 = vrcp.f32 %v4533_v14 }
0x118e   : >> { %v4536_v17 = vpop.xlane.xlu0 %4535  ;;  %v4186_v28 = vmul.f32 %v8569_v23, %v10317_v25 }
0x118f   : >> { %v4545_v1 = vpop.xlane.xlu1 %4544  ;;  %8576 = vrcp.f32 %v4536_v17 }
0x1190   : >> { %7537 = vmatprep.mubr.msk.f32.mxu0 %vm1297_vm1, %v4186_v28 }
0x1191   : >> { %7538 = vmatmul.mubr.msk.f32.gmra.mrb[70].mxu0 %vm1297_vm1, %v4187_v4 }
0x1192   : >> { %v4542_v48 = vpop.xlane.xlu0 %4541 }
0x1193   : >> { %v4907_v18 = vpop.xlane.xlu1 %4906 }
0x1195   : >> { %v8571_v58 = vpop.eup %8570 }
0x1196   : >> { %v4557_v20 = vmul.f32 %v8571_v58, %v10332_v26  ;;  %v4539_v8 = vpop.xlane.xlu0 %4538  ;;  %v8573_v10 = vpop.eup %8572 }
0x1197   : >> { %v4904_v32 = vpop.xlane.xlu1 %4903  ;;  %8578 = vrcp.f32 %v4539_v8  ;;  %v8575_v7 = vpop.eup %8574  ;;  %v4558_v21 = vmul.f32 %v8573_v10, %v10323_v31 }
0x1198   : >> { %7556 = vmatprep.mubr.msk.f32.mxu0 %vm1297_vm1, %v4557_v20  ;;  %8580 = vrcp.f32 %v4542_v48  ;;  %v4559_v34 = vmul.f32 %v8575_v7, %v10328_v19 }
0x1199   : >> { %8582 = vrcp.f32 %v4545_v1  ;;  %v8577_v30 = vpop.eup %8576 }
0x119a   : >> { %v4548_v41 = vpop.xlane.xlu0 %4547  ;;  %v4560_v6 = vmul.f32 %v8577_v30, %v10340_v56  ;;  %v3570_v30 = vld [vmem:[%s3568_s9 + $0x8] sm:$0xff] }
0x119b   : >> { %v4913_v2 = vpop.xlane.xlu1 %4912  ;;  %8584 = vrcp.f32 %v4548_v41 }
0x119c   : >> { %8586 = vrcp.f32 %v4904_v32 }
0x119d   : >> { %8588 = vrcp.f32 %v4907_v18 }
0x119f   : >> { %v4910_v25 = vpop.xlane.xlu1 %4909 }
0x11a0   : >> { %8590 = vrcp.f32 %v4910_v25 }
0x11a1   : >> { %v8579_v61 = vpop.eup %8578  ;;  %8592 = vrcp.f32 %v4913_v2 }
0x11a2   : >> { %v4925_v11 = vpop.xlane.xlu0 %4924  ;;  %v8581_v29 = vpop.eup %8580  ;;  %v4561_v31 = vmul.f32 %v8579_v61, %v10358_v27  ;;  %v3571_v61 = vld [vmem:[%s3568_s9 + $0x10] sm:$0xff] }
0x11a3   : >> { %v4919_v37 = vpop.xlane.xlu1 %4918  ;;  %v8583_v40 = vpop.eup %8582  ;;  %v4562_v19 = vmul.f32 %v8581_v29, %v10342_v5 }
0x11a4   : >> { %v4563_v14 = vmul.f32 %v8583_v40, %v10344_v13 }
0x11a5   : >> { %v8585_v33 = vpop.eup %8584 }
0x11a6   : >> { %v4922_v44 = vpop.xlane.xlu0 %4921  ;;  %v8587_v16 = vpop.eup %8586  ;;  %v4564_v56 = vmul.f32 %v8585_v33, %v10366_v63 }
0x11a7   : >> { %v4916_v39 = vpop.xlane.xlu1 %4915  ;;  %v8589_v27 = vpop.eup %8588  ;;  %v4934_v23 = vmul.f32 %v8587_v16, %v10361_v38 }
0x11a8   : >> { %8594 = vrcp.f32 %v4916_v39  ;;  %v4935_v5 = vmul.f32 %v8589_v27, %v10351_v35 }
0x11a9   : >> { %8596 = vrcp.f32 %v4919_v37 }
0x11aa   : >> { %v4943_v36 = vpop.permute.xlu0 %4942  ;;  %8598 = vrcp.f32 %v4922_v44  ;;  %v8591_v17 = vpop.eup %8590 }
0x11ab   : >> { %v4566_v26 = vpop.permute.xlu1 %4565  ;;  %8600 = vrcp.f32 %v4925_v11  ;;  %v8593_v13 = vpop.eup %8592  ;;  %v4936_v28 = vmul.f32 %v8591_v17, %v10372_v3 }
0x11ac   : >> { %7554 = vmatprep.subr.mxu0 %v4566_v26  ;;  %v4937_v63 = vmul.f32 %v8593_v13, %v10370_v45 }
0x11ad   : >> { %7555 = vmatpush3.msra.mxu0 %v4566_v26 }
0x11ae   : >> { %7557 = vmatmul.mubr.msk.f32.vlgmr.msra.gmra.mrb[72].mxu0 %vm1297_vm1, %v4558_v21  ;;  %7582 = vmatprep.subr.mxu0 %v4943_v36  ;;  %v3569_v21 = vld [vmem:[%s3568_s9] sm:$0xff] }
0x11af   : >> { %7559 = vmatprep.mubr.msk.f32.mxu0 %vm1297_vm1, %v4559_v34  ;;  %7583 = vmatpush3.msra.mxu0 %v4943_v36  ;;  %v7950_v36 = vpack.c.bf16 %v3570_v30, %v3569_v21 }
0x11b1   : >> { %7951 = vmatprep.subr.bf16.mxu1 %v7950_v36 }
0x11b2   : >> { %7560 = vmatmul.mubr.msk.f32.gmra.mrb[74].mxu0 %vm1297_vm1, %v4560_v6  ;;  %v8595_v1 = vpop.eup %8594  ;;  %v3572_v6 = vld [vmem:[%s3568_s9 + $0x18] sm:$0xff]  ;;  %7953 = vmatpush3.bf16.msra.mxu1 %v7950_v36 }
0x11b3   : >> { %7562 = vmatprep.mubr.msk.f32.mxu0 %vm1297_vm1, %v4561_v31  ;;  %v8597_v4 = vpop.eup %8596  ;;  %v4938_v38 = vmul.f32 %v8595_v1, %v10394_v15  ;;  %v7954_v31 = vpack.c.bf16 %v3572_v6, %v3571_v61 }
0x11b4   : >> { %v8599_v48 = vpop.eup %8598  ;;  %v4939_v35 = vmul.f32 %v8597_v4, %v10383_v57 }
0x11b5   : >> { %v8601_v18 = vpop.eup %8600  ;;  %v4940_v3 = vmul.f32 %v8599_v48, %v10388_v47  ;;  %7955 = vmatprep.subr.bf16.mxu1 %v7954_v31 }
0x11b6   : >> { %7563 = vmatmul.mubr.msk.f32.gmra.mrb[76].mxu0 %vm1297_vm1, %v4562_v19  ;;  %v4941_v58 = vmul.f32 %v8601_v18, %v10386_v12  ;;  %7957 = vmatpush3.bf16.msra.mxu1 %v7954_v31 }
0x11b7   : >> { %7565 = vmatprep.mubr.msk.f32.mxu0 %vm1297_vm1, %v4563_v14 }
0x11ba   : >> { %7566 = vmatmul.mubr.msk.f32.gmra.mrb[78].mxu0 %vm1297_vm1, %v4564_v56 }
0x11bb   : >> { %7584 = vmatprep.mubr.msk.f32.mxu0 %vm1297_vm1, %v4934_v23 }
0x11be   : >> { %7585 = vmatmul.mubr.msk.f32.vlgmr.msra.gmra.mrb[80].mxu0 %vm1297_vm1, %v4935_v5 }
0x11bf   : >> { %7587 = vmatprep.mubr.msk.f32.mxu0 %vm1297_vm1, %v4936_v28 }
0x11c2   : >> { %7588 = vmatmul.mubr.msk.f32.gmra.mrb[82].mxu0 %vm1297_vm1, %v4937_v63 }
0x11c3   : >> { %7590 = vmatprep.mubr.msk.f32.mxu0 %vm1297_vm1, %v4938_v38 }
0x11c6   : >> { %7591 = vmatmul.mubr.msk.f32.gmra.mrb[84].mxu0 %vm1297_vm1, %v4939_v35 }
0x11c7   : >> { %7593 = vmatprep.mubr.msk.f32.mxu0 %vm1297_vm1, %v4940_v3 }
0x11ca   : >> { %7594 = vmatmul.mubr.msk.f32.gmra.mrb[86].mxu0 %vm1297_vm1, %v4941_v58 }
0x11e3   : >> { %v10464_v45 = vpop.f32.mrb[56].mxu0 }
0x11e4   : >> { %v10466_v15 = vpop.f32.mrb[57].mxu0 }
0x121a   : >> { %v10468_v20 = vpop.f32.mrb[58].mxu0 }
0x121b   : >> { %v10470_v32 = vpop.f32.mrb[59].mxu0 }
0x121e   : >> { %v10472_v57 = vpop.f32.mrb[60].mxu0 }
0x121f   : >> { %v10474_v8 = vpop.f32.mrb[61].mxu0 }
0x1222   : >> { %v10476_v47 = vpop.f32.mrb[62].mxu0 }
0x1223   : >> { %v10478_v2 = vpop.f32.mrb[63].mxu0 }
0x1254   : >> { %v7530_v41 = vpop.f32.mrb[64].mxu0 }
0x1255   : >> { %5084 = vrot.lane.b32.xlu1 %v7530_v41, %s10980_s26  ;;  %v4281_v12 = vpop.f32.mrb[65].mxu0 }
0x1259   : >> { %5082 = vrot.lane.b32.xlu1 %v4281_v12, %s10980_s26  ;;  %v7533_v25 = vpop.f32.mrb[66].mxu0 }
0x125a   : >> { %5088 = vrot.lane.b32.xlu0 %v7533_v25, %s10980_s26  ;;  %v4291_v11 = vpop.f32.mrb[67].mxu0 }
0x125d   : >> { %5086 = vrot.lane.b32.xlu1 %v4291_v11, %s10980_s26  ;;  %v7536_v37 = vpop.f32.mrb[68].mxu0 }
0x125e   : >> { %5092 = vrot.lane.b32.xlu0 %v7536_v37, %s10980_s26  ;;  %v4301_v44 = vpop.f32.mrb[69].mxu0 }
0x1261   : >> { %5090 = vrot.lane.b32.xlu1 %v4301_v44, %s10980_s26 }
0x1264   : >> { %v7539_v39 = vpop.f32.mrb[70].mxu0 }
0x1265   : >> { %5096 = vrot.lane.b32.xlu0 %v7539_v39, %s10980_s26  ;;  %v4311_v10 = vpop.f32.mrb[71].mxu0 }
0x1266   : >> { %5094 = vrot.lane.b32.xlu1 %v4311_v10, %s10980_s26  ;;  %s10648_s26 = scalar_lea.vmem %s10869_s17, %s6793_s1 }
0x1281   : >> { %v7558_v7 = vpop.f32.mrb[72].mxu0 }
0x1282   : >> { %5116 = vrot.lane.b32.xlu1 %v7558_v7, %s10981_s24  ;;  %v4658_v26 = vpop.f32.mrb[73].mxu0 }
0x1285   : >> { %v7561_v34 = vpop.f32.mrb[74].mxu0 }
0x1286   : >> { %5114 = vrot.lane.b32.xlu1 %v4658_v26, %s10981_s24  ;;  %5120 = vrot.lane.b32.xlu0 %v7561_v34, %s10981_s24  ;;  %v4668_v29 = vpop.f32.mrb[75].mxu0 }
0x1289   : >> { %v7564_v40 = vpop.f32.mrb[76].mxu0 }
0x128a   : >> { %5118 = vrot.lane.b32.xlu1 %v4668_v29, %s10981_s24  ;;  %5124 = vrot.lane.b32.xlu0 %v7564_v40, %s10981_s24  ;;  %v4678_v19 = vpop.f32.mrb[77].mxu0 }
0x128d   : >> { %v7567_v33 = vpop.f32.mrb[78].mxu0 }
0x128e   : >> { %5122 = vrot.lane.b32.xlu1 %v4678_v19, %s10981_s24  ;;  %5128 = vrot.lane.b32.xlu0 %v7567_v33, %s10981_s24  ;;  %v4688_v14 = vpop.f32.mrb[79].mxu0 }
0x1291   : >> { %v7586_v16 = vpop.f32.mrb[80].mxu0 }
0x1292   : >> { %5126 = vrot.lane.b32.xlu1 %v4688_v14, %s10981_s24  ;;  %5148 = vrot.lane.b32.xlu0 %v7586_v16, %s10982_s10  ;;  %v5035_v56 = vpop.f32.mrb[81].mxu0 }
0x1295   : >> { %v7589_v27 = vpop.f32.mrb[82].mxu0 }
0x1296   : >> { %5146 = vrot.lane.b32.xlu1 %v5035_v56, %s10982_s10  ;;  %5152 = vrot.lane.b32.xlu0 %v7589_v27, %s10982_s10  ;;  %v5045_v23 = vpop.f32.mrb[83].mxu0 }
0x1299   : >> { %v7592_v17 = vpop.f32.mrb[84].mxu0 }
0x129a   : >> { %5150 = vrot.lane.b32.xlu1 %v5045_v23, %s10982_s10  ;;  %5156 = vrot.lane.b32.xlu0 %v7592_v17, %s10982_s10  ;;  %v5055_v5 = vpop.f32.mrb[85].mxu0 }
0x129d   : >> { %v7595_v13 = vpop.f32.mrb[86].mxu0 }
0x129e   : >> { %5154 = vrot.lane.b32.xlu1 %v5055_v5, %s10982_s10  ;;  %5160 = vrot.lane.b32.xlu0 %v7595_v13, %s10982_s10  ;;  %v5065_v28 = vpop.f32.mrb[87].mxu0 }
0x12a2   : >> { %5158 = vrot.lane.b32.xlu1 %v5065_v28, %s10982_s10  ;;  %s5722_s10 = scalar_lea.vmem %s10870_s18, %s8760_s4  ;;  %s1008_s4 = sadd.s32 1, %s8760_s4  }
0x12a3   : >> { %p1005_p4 = scmp.ge.s32.totalorder %s1008_s4, 12  }
0x12a4   : > { %v5879_v46 = vld [vmem:[%s10873_s21] sm:$0xff] (%p1005_p4)  ;;  %v5880_v51 = vld [vmem:[%s10873_s21 + $0x8] sm:$0xff] (%p1005_p4)  ;;  %v5881_v62 = vld [vmem:[%s10873_s21 + $0x10] sm:$0xff] (%p1005_p4)  ;;  %s10993_s4 = sld [smem:[#allocation37_spill]] (%p1005_p4) }
0x12a5   : > { %v8006_v60 = vpack.c.bf16 (%p1005_p4), %v5880_v51, %v5879_v46  ;;  %v5882_v43 = vld [vmem:[%s10873_s21 + $0x18] sm:$0xff] (%p1005_p4)  ;;  %v6051_v42 = vld [vmem:[%s10875_s23] sm:$0xff] (%p1005_p4)  ;;  %v6052_v54 = vld [vmem:[%s10875_s23 + $0x8] sm:$0xff] (%p1005_p4) }
0x12a6   : > { %v8010_v55 = vpack.c.bf16 (%p1005_p4), %v5882_v43, %v5881_v62  ;;  %v8014_v53 = vpack.c.bf16 (%p1005_p4), %v6052_v54, %v6051_v42 }
0x12c7   : >> { %v5085_v1 = vpop.permute.xlu1 %5084 }
0x12c8   : >> { %v5171_v26 = vsel %vm1297_vm1, %v10464_v45, %v5085_v1 }
0x12cb   : >> { %v5083_v63 = vpop.permute.xlu1 %5082 }
0x12cc   : >> { %v5089_v38 = vpop.permute.xlu0 %5088  ;;  %v5170_v7 = vsel %vm1297_vm1, %v10466_v15, %v5083_v63 }
0x12cd   : >> { %v5173_v45 = vsel %vm1297_vm1, %v10468_v20, %v5089_v38 }
0x12cf   : >> { %v5087_v4 = vpop.permute.xlu1 %5086 }
0x12d0   : >> { %v5093_v35 = vpop.permute.xlu0 %5092  ;;  %v5172_v29 = vsel %vm1297_vm1, %v10470_v32, %v5087_v4 }
0x12d1   : >> { %v5175_v20 = vsel %vm1297_vm1, %v10472_v57, %v5093_v35 }
0x12d3   : >> { %v5091_v48 = vpop.permute.xlu1 %5090 }
0x12d4   : >> { %v5174_v32 = vsel %vm1297_vm1, %v10474_v8, %v5091_v48 }
0x12d7   : >> { %v5097_v3 = vpop.permute.xlu0 %5096 }
0x12d8   : >> { %v5095_v18 = vpop.permute.xlu1 %5094  ;;  %v5177_v57 = vsel %vm1297_vm1, %v10476_v47, %v5097_v3 }
0x12d9   : >> { %v5176_v8 = vsel %vm1297_vm1, %v10478_v2, %v5095_v18  ;;  %v6775_v2 = vld [vmem:[%s3573_s6] ss:$0 sm:$0xff]  ;;  %s10991_s6 = sld [smem:[#allocation36_spill]] (%p1005_p4) }
0x12f4   : >> { %v5117_v58 = vpop.permute.xlu1 %5116 }
0x12f5   : >> { %v5179_v34 = vsel %vm3075_vm4, %v5171_v26, %v5117_v58 }
0x12f8   : >> { %v5115_v41 = vpop.permute.xlu1 %5114  ;;  %v5121_v12 = vpop.permute.xlu0 %5120 }
0x12f9   : >> { %v5178_v21 = vsel %vm3075_vm4, %v5170_v7, %v5115_v41  ;;  %v5181_v40 = vsel %vm3075_vm4, %v5173_v45, %v5121_v12 }
0x12fc   : >> { %v5119_v25 = vpop.permute.xlu1 %5118  ;;  %v5125_v11 = vpop.permute.xlu0 %5124 }
0x12fd   : >> { %v5180_v15 = vsel %vm3075_vm4, %v5172_v29, %v5119_v25  ;;  %v5183_v27 = vsel %vm3075_vm4, %v5175_v20, %v5125_v11 }
0x1300   : >> { %v5123_v37 = vpop.permute.xlu1 %5122  ;;  %v5129_v44 = vpop.permute.xlu0 %5128 }
0x1301   : >> { %v5182_v16 = vsel %vm3075_vm4, %v5174_v32, %v5123_v37  ;;  %v5185_v1 = vsel %vm3075_vm4, %v5177_v57, %v5129_v44 }
0x1304   : >> { %v5127_v39 = vpop.permute.xlu1 %5126  ;;  %v5149_v10 = vpop.permute.xlu0 %5148 }
0x1305   : >> { %v5187_v6 = vsel %vm3084_vm5, %v5179_v34, %v5149_v10  ;;  %v5184_v13 = vsel %vm3075_vm4, %v5176_v8, %v5127_v39 }
0x1308   : >> { %v5147_v30 = vpop.permute.xlu1 %5146  ;;  %v5153_v36 = vpop.permute.xlu0 %5152 }
0x1309   : >> { %v5186_v61 = vsel %vm3084_vm5, %v5178_v21, %v5147_v30  ;;  %v5189_v14 = vsel %vm3084_vm5, %v5181_v40, %v5153_v36 }
0x130a   : >> { %7604 = vmatprep.mubr.msk.f32.mxu1 %vm1017_vm0, %v5186_v61 }
0x130b   : >> { %7605 = vmatmul.mubr.msk.f32.vlgmr.msra.gmra.mrb[66].mxu1 %vm1017_vm0, %v5187_v6 }
0x130c   : >> { %v5151_v31 = vpop.permute.xlu1 %5150  ;;  %v5157_v33 = vpop.permute.xlu0 %5156 }
0x130d   : >> { %v5188_v19 = vsel %vm3084_vm5, %v5180_v15, %v5151_v31  ;;  %v5191_v17 = vsel %vm3084_vm5, %v5183_v27, %v5157_v33 }
0x130e   : >> { %7607 = vmatprep.mubr.msk.f32.mxu1 %vm1017_vm0, %v5188_v19 }
0x130f   : >> { %7608 = vmatmul.mubr.msk.f32.gmra.mrb[68].mxu1 %vm1017_vm0, %v5189_v14 }
0x1310   : >> { %v5155_v56 = vpop.permute.xlu1 %5154  ;;  %v5161_v5 = vpop.permute.xlu0 %5160 }
0x1311   : >> { %v5190_v23 = vsel %vm3084_vm5, %v5182_v16, %v5155_v56  ;;  %v5193_v4 = vsel %vm3084_vm5, %v5185_v1, %v5161_v5 }
0x1312   : >> { %7610 = vmatprep.mubr.msk.f32.mxu1 %vm1017_vm0, %v5190_v23 }
0x1313   : >> { %7611 = vmatmul.mubr.msk.f32.gmra.mrb[70].mxu1 %vm1017_vm0, %v5191_v17 }
0x1314   : >> { %v5159_v28 = vpop.permute.xlu1 %5158 }
0x1315   : >> { %v5192_v63 = vsel %vm3084_vm5, %v5184_v13, %v5159_v28 }
0x1316   : >> { %7613 = vmatprep.mubr.msk.f32.mxu1 %vm1017_vm0, %v5192_v63 }
0x1317   : >> { %7614 = vmatmul.mubr.msk.f32.gmra.mrb[72].mxu1 %vm1017_vm0, %v5193_v4 }
0x13de   : >> { %v7606_v38 = vpop.f32.mrb[66].mxu1 }
0x13df   : >> { %v5296_v47 = vadd.f32 %v7606_v38, %v6775_v2  ;;  %v5290_v48 = vpop.f32.mrb[67].mxu1 }
0x13e0   : >> { %v5291_v35 = vadd.f32 %v6775_v2, %v5290_v48 }
0x13e1   : >> { %v10553_v18 = vadd.f32 %v5296_v47, %v9874_v24 }
0x13e2   : >> { %v10556_v3 = vadd.f32 %v5291_v35, %v9877_v52  ;;  %v7609_v58 = vpop.f32.mrb[68].mxu1 }
0x13e3   : >> { %v5306_v41 = vadd.f32 %v7609_v58, %v6775_v2  ;;  %v5300_v12 = vpop.f32.mrb[69].mxu1  ;;  %v5340_v25 = vsel %vm1017_vm0, %v10553_v18, 0.0 }
0x13e4   : >> { %v5301_v11 = vadd.f32 %v6775_v2, %v5300_v12  ;;  %5341 = vadd.xlane.f32.xlu0 %v5340_v25  ;;  %v5337_v37 = vsel %vm1017_vm0, %v10556_v3, 0.0 }
0x13e5   : >> { %5338 = vadd.xlane.f32.xlu1 %v5337_v37  ;;  %v10566_v39 = vadd.f32 %v5306_v41, %v9884_v59 }
0x13e6   : >> { %v10563_v44 = vadd.f32 %v5301_v11, %v9889_v50  ;;  %v7612_v24 = vpop.f32.mrb[70].mxu1 }
0x13e7   : >> { %v5310_v52 = vpop.f32.mrb[71].mxu1  ;;  %v5316_v10 = vadd.f32 %v7612_v24, %v6775_v2  ;;  %v5346_v50 = vsel %vm1017_vm0, %v10566_v39, 0.0 }
0x13e8   : >> { %v5311_v7 = vadd.f32 %v6775_v2, %v5310_v52  ;;  %v5343_v26 = vsel %vm1017_vm0, %v10563_v44, 0.0 }
0x13e9   : >> { %5344 = vadd.xlane.f32.xlu0 %v5343_v26  ;;  %v10576_v34 = vadd.f32 %v5316_v10, %v9892_v9 }
0x13ea   : >> { %v10571_v21 = vadd.f32 %v5311_v7, %v9897_v22  ;;  %v7615_v30 = vpop.f32.mrb[72].mxu1 }
0x13eb   : >> { %v5320_v36 = vpop.f32.mrb[73].mxu1  ;;  %v5326_v59 = vadd.f32 %v7615_v30, %v6775_v2  ;;  %v5352_v45 = vsel %vm1017_vm0, %v10576_v34, 0.0 }
0x13ec   : >> { %v5321_v61 = vadd.f32 %v6775_v2, %v5320_v36  ;;  %v5349_v6 = vsel %vm1017_vm0, %v10571_v21, 0.0 }
0x13ed   : >> { %5347 = vadd.xlane.f32.xlu0 %v5346_v50  ;;  %5350 = vadd.xlane.f32.xlu1 %v5349_v6  ;;  %v10584_v22 = vadd.f32 %v5326_v59, %v9902_v49  ;;  %v5442_v50 = vld [vmem:[%s5441_s5] sm:$0xff]  ;;  %v5443_v59 = vld [vmem:[%s5441_s5 + $0x8] sm:$0xff]  ;;  %v5444_v6 = vld [vmem:[%s5441_s5 + $0x10] sm:$0xff] }
0x13ee   : >> { %v10581_v29 = vadd.f32 %v5321_v61, %v9907_v0  ;;  %v7958_v61 = vpack.c.bf16 %v5443_v59, %v5442_v50 }
0x13ef   : >> { %v5358_v15 = vsel %vm1017_vm0, %v10584_v22, 0.0 }
0x13f0   : >> { %v5355_v9 = vsel %vm1017_vm0, %v10581_v29, 0.0  ;;  %7959 = vmatprep.subr.bf16.mxu0 %v7958_v61 }
0x13f1   : >> { %5353 = vadd.xlane.f32.xlu0 %v5352_v45  ;;  %5356 = vadd.xlane.f32.xlu1 %v5355_v9  ;;  %v5445_v45 = vld [vmem:[%s5441_s5 + $0x18] sm:$0xff]  ;;  %s10992_s5 = sld [smem:[#allocation35_spill]] (%p1005_p4) }
0x13f2   : >> { %7961 = vmatpush3.bf16.msra.mxu0 %v7958_v61  ;;  %v7962_v9 = vpack.c.bf16 %v5445_v45, %v5444_v6 }
0x13f4   : >> { %7963 = vmatprep.subr.bf16.mxu0 %v7962_v9 }
0x13f5   : >> { %5359 = vadd.xlane.f32.xlu0 %v5358_v15  ;;  %v5593_v15 = vld [vmem:[%s10648_s26] sm:$0xff] }
0x13f6   : >> { %7965 = vmatpush3.bf16.msra.mxu0 %v7962_v9 }
0x13f7   : > { %8015 = vmatprep.subr.bf16.mxu0 (%p1005_p4), %v8014_v53 }
0x1471   : >> { %v5342_v31 = vpop.xlane.xlu0 %5341 }
0x1472   : >> { %v5362_v40 = vmul.f32 0.03125, %v5342_v31  ;;  %v5339_v19 = vpop.xlane.xlu1 %5338  ;;  %v5594_v31 = vld [vmem:[%s10648_s26 + $0x8] sm:$0xff] }
0x1473   : >> { %v5361_v0 = vmul.f32 0.03125, %v5339_v19  ;;  %v7966_v19 = vpack.c.bf16 %v5594_v31, %v5593_v15 }
0x1474   : >> { %v10593_v33 = vsub.f32 %v10553_v18, %v5362_v40  ;;  %v5595_v40 = vld [vmem:[%s10648_s26 + $0x10] sm:$0xff] }
0x1475   : >> { %v10596_v49 = vsub.f32 %v10556_v3, %v5361_v0  ;;  %v5596_v0 = vld [vmem:[%s10648_s26 + $0x18] sm:$0xff]  ;;  %7967 = vmatprep.subr.bf16.mxu1 %v7966_v19 }
0x1476   : >> { %v5345_v14 = vpop.xlane.xlu0 %5344  ;;  %v5378_v32 = vmul.f32 %v10593_v33, %v10593_v33  ;;  %7969 = vmatpush3.bf16.msra.mxu1 %v7966_v19 }
0x1477   : >> { %v5363_v20 = vmul.f32 0.03125, %v5345_v14  ;;  %v5377_v16 = vmul.f32 %v10596_v49, %v10596_v49  ;;  %v7970_v14 = vpack.c.bf16 %v5596_v0, %v5595_v40 }
0x1478   : >> { %v5388_v56 = vsel %vm1017_vm0, %v5378_v32, 0.0  ;;  %v5597_v32 = vld [vmem:[%s10648_s26 + $0x20] sm:$0xff] }
0x1479   : >> { %v10604_v27 = vsub.f32 %v10563_v44, %v5363_v20  ;;  %5389 = vadd.xlane.f32.xlu0 %v5388_v56  ;;  %v5385_v23 = vsel %vm1017_vm0, %v5377_v16, 0.0  ;;  %v5598_v20 = vld [vmem:[%s10648_s26 + $0x28] sm:$0xff]  ;;  %7971 = vmatprep.subr.bf16.mxu1 %v7970_v14  ;;  %v5599_v56 = vld [vmem:[%s10648_s26 + $0x30] sm:$0xff] }
0x147a   : >> { %v5351_v17 = vpop.xlane.xlu1 %5350  ;;  %5386 = vadd.xlane.f32.xlu1 %v5385_v23  ;;  %v5348_v8 = vpop.xlane.xlu0 %5347  ;;  %v7974_v16 = vpack.c.bf16 %v5598_v20, %v5597_v32  ;;  %v5600_v23 = vld [vmem:[%s10648_s26 + $0x38] sm:$0xff]  ;;  %7973 = vmatpush3.bf16.msra.mxu1 %v7970_v14 }
0x147b   : >> { %v5365_v5 = vmul.f32 0.03125, %v5351_v17  ;;  %v5364_v57 = vmul.f32 0.03125, %v5348_v8  ;;  %v5379_v13 = vmul.f32 %v10604_v27, %v10604_v27  ;;  %v7978_v17 = vpack.c.bf16 %v5600_v23, %v5599_v56  ;;  %v5601_v8 = vld [vmem:[%s10648_s26 + $0x40] sm:$0xff] }
0x147c   : >> { %7975 = vmatprep.subr.bf16.mxu1 %v7974_v16 }
0x147d   : >> { %v10610_v28 = vsub.f32 %v10571_v21, %v5365_v5  ;;  %v10613_v1 = vsub.f32 %v10566_v39, %v5364_v57  ;;  %v5391_v63 = vsel %vm1017_vm0, %v5379_v13, 0.0  ;;  %v5602_v5 = vld [vmem:[%s10648_s26 + $0x48] sm:$0xff]  ;;  %v5603_v13 = vld [vmem:[%s10648_s26 + $0x50] sm:$0xff] }
0x147e   : >> { %v5357_v4 = vpop.xlane.xlu1 %5356  ;;  %5392 = vadd.xlane.f32.xlu1 %v5391_v63  ;;  %v5354_v2 = vpop.xlane.xlu0 %5353  ;;  %7977 = vmatpush3.bf16.msra.mxu1 %v7974_v16  ;;  %v7982_v57 = vpack.c.bf16 %v5602_v5, %v5601_v8  ;;  %v5604_v63 = vld [vmem:[%s10648_s26 + $0x58] sm:$0xff] }
0x147f   : >> { %v5367_v38 = vmul.f32 0.03125, %v5357_v4  ;;  %v5366_v47 = vmul.f32 0.03125, %v5354_v2  ;;  %v5381_v48 = vmul.f32 %v10610_v28, %v10610_v28  ;;  %v5380_v35 = vmul.f32 %v10613_v1, %v10613_v1  ;;  %7979 = vmatprep.subr.bf16.mxu1 %v7978_v17  ;;  %v5605_v2 = vld [vmem:[%s10648_s26 + $0x60] sm:$0xff] }
0x1480   : >> { %v7986_v4 = vpack.c.bf16 %v5604_v63, %v5603_v13 }
0x1481   : >> { %v10621_v58 = vsub.f32 %v10581_v29, %v5367_v38  ;;  %v10624_v41 = vsub.f32 %v10576_v34, %v5366_v47  ;;  %v5397_v12 = vsel %vm1017_vm0, %v5381_v48, 0.0  ;;  %v5394_v25 = vsel %vm1017_vm0, %v5380_v35, 0.0  ;;  %v5606_v38 = vld [vmem:[%s10648_s26 + $0x68] sm:$0xff] }
0x1482   : >> { %5398 = vadd.xlane.f32.xlu1 %v5397_v12  ;;  %5395 = vadd.xlane.f32.xlu0 %v5394_v25  ;;  %v5360_v11 = vpop.xlane.xlu0 %5359  ;;  %v7990_v47 = vpack.c.bf16 %v5606_v38, %v5605_v2  ;;  %v5608_v2 = vld [vmem:[%s10648_s26 + $0x78] sm:$0xff] }
0x1483   : >> { %v5368_v37 = vmul.f32 0.03125, %v5360_v11  ;;  %v5383_v24 = vmul.f32 %v10621_v58, %v10621_v58  ;;  %v5382_v52 = vmul.f32 %v10624_v41, %v10624_v41  ;;  %7981 = vmatpush3.bf16.msra.mxu1 %v7978_v17 }
0x1484   : >> { %7983 = vmatprep.subr.bf16.mxu1 %v7982_v57 }
0x1485   : >> { %v10633_v10 = vsub.f32 %v10584_v22, %v5368_v37  ;;  %v5403_v7 = vsel %vm1017_vm0, %v5383_v24, 0.0  ;;  %v5400_v26 = vsel %vm1017_vm0, %v5382_v52, 0.0 }
0x1486   : >> { %5404 = vadd.xlane.f32.xlu1 %v5403_v7  ;;  %5401 = vadd.xlane.f32.xlu0 %v5400_v26 }
0x1487   : >> { %v5384_v30 = vmul.f32 %v10633_v10, %v10633_v10  ;;  %7985 = vmatpush3.bf16.msra.mxu1 %v7982_v57 }
0x1488   : >> { %7987 = vmatprep.subr.bf16.mxu1 %v7986_v4 }
0x1489   : >> { %v5406_v36 = vsel %vm1017_vm0, %v5384_v30, 0.0 }
0x148a   : >> { %5407 = vadd.xlane.f32.xlu0 %v5406_v36 }
0x148b   : >> { %7989 = vmatpush3.bf16.msra.mxu1 %v7986_v4 }
0x148c   : >> { %7991 = vmatprep.subr.bf16.mxu1 %v7990_v47 }
0x148f   : >> { %7993 = vmatpush3.bf16.msra.mxu1 %v7990_v47 }
0x1506   : >> { %v5390_v48 = vpop.xlane.xlu0 %5389 }
0x1507   : >> { %v5410_v35 = vmul.f32 0.03125, %v5390_v48  ;;  %v5387_v12 = vpop.xlane.xlu1 %5386 }
0x1508   : >> { %v5409_v25 = vmul.f32 0.03125, %v5387_v12 }
0x1509   : >> { %v5418_v11 = vadd.f32 1e-05, %v5410_v35 }
0x150a   : >> { %v5417_v37 = vadd.f32 1e-05, %v5409_v25 }
0x150b   : >> { %8602 = vrsqrt.f32 %v5418_v11  ;;  %v5393_v24 = vpop.xlane.xlu1 %5392 }
0x150c   : >> { %8604 = vrsqrt.f32 %v5417_v37  ;;  %v5411_v52 = vmul.f32 0.03125, %v5393_v24 }
0x150e   : >> { %v5419_v7 = vadd.f32 1e-05, %v5411_v52 }
0x150f   : >> { %v5399_v26 = vpop.xlane.xlu1 %5398  ;;  %v5396_v30 = vpop.xlane.xlu0 %5395 }
0x1510   : >> { %8606 = vrsqrt.f32 %v5419_v7  ;;  %v5413_v36 = vmul.f32 0.03125, %v5399_v26  ;;  %v5412_v50 = vmul.f32 0.03125, %v5396_v30 }
0x1512   : >> { %v5421_v59 = vadd.f32 1e-05, %v5413_v36  ;;  %v5420_v61 = vadd.f32 1e-05, %v5412_v50 }
0x1513   : >> { %v5405_v6 = vpop.xlane.xlu1 %5404  ;;  %v5402_v45 = vpop.xlane.xlu0 %5401 }
0x1514   : >> { %8608 = vrsqrt.f32 %v5421_v59  ;;  %v5415_v9 = vmul.f32 0.03125, %v5405_v6  ;;  %v5414_v15 = vmul.f32 0.03125, %v5402_v45 }
0x1515   : >> { %v8603_v31 = vpop.eup %8602  ;;  %8610 = vrsqrt.f32 %v5420_v61 }
0x1516   : >> { %v8605_v40 = vpop.eup %8604  ;;  %v5423_v19 = vadd.f32 1e-05, %v5415_v9  ;;  %v5422_v0 = vadd.f32 1e-05, %v5414_v15  ;;  %v5434_v20 = vmul.f32 %v8603_v31, %v10593_v33 }
0x1517   : >> { %v5408_v14 = vpop.xlane.xlu0 %5407  ;;  %v5433_v32 = vmul.f32 %v8605_v40, %v10596_v49 }
0x1518   : >> { %8612 = vrsqrt.f32 %v5423_v19  ;;  %v5416_v16 = vmul.f32 0.03125, %v5408_v14 }
0x1519   : >> { %8614 = vrsqrt.f32 %v5422_v0  ;;  %7624 = vmatprep.mubr.msk.f32.mxu0 %vm1017_vm0, %v5433_v32  ;;  %v6794_v0 = vld [vmem:[%s5722_s10] ss:$0 sm:$0xff] }
0x151a   : >> { %v8607_v56 = vpop.eup %8606  ;;  %v5424_v23 = vadd.f32 1e-05, %v5416_v16  ;;  %7625 = vmatmul.mubr.msk.f32.vlgmr.msra.gmra.mrb[88].mxu0 %vm1017_vm0, %v5434_v20 }
0x151b   : >> { %v5435_v17 = vmul.f32 %v8607_v56, %v10604_v27  ;;  %8017 = vmatpush3.bf16.msra.mxu0 (%p1005_p4), %v8014_v53 }
0x151c   : >> { %8616 = vrsqrt.f32 %v5424_v23 }
0x151d   : >> { %7627 = vmatprep.mubr.msk.f32.mxu0 %vm1017_vm0, %v5435_v17 }
0x151e   : >> { %v8609_v8 = vpop.eup %8608 }
0x151f   : >> { %v8611_v49 = vpop.eup %8610  ;;  %v5437_v33 = vmul.f32 %v8609_v8, %v10610_v28 }
0x1520   : >> { %v5436_v5 = vmul.f32 %v8611_v49, %v10613_v1  ;;  %v5607_v1 = vld [vmem:[%s10648_s26 + $0x70] sm:$0xff] }
0x1521   : >> { %v7994_v38 = vpack.c.bf16 %v5608_v2, %v5607_v1 }
0x1522   : >> { %v8613_v57 = vpop.eup %8612  ;;  %7628 = vmatmul.mubr.msk.f32.gmra.mrb[90].mxu0 %vm1017_vm0, %v5436_v5 }
0x1523   : >> { %v8615_v13 = vpop.eup %8614  ;;  %7630 = vmatprep.mubr.msk.f32.mxu0 %vm1017_vm0, %v5437_v33  ;;  %v5439_v27 = vmul.f32 %v8613_v57, %v10621_v58  ;;  %7995 = vmatprep.subr.bf16.mxu1 %v7994_v38  ;;  %v6784_v58 = vld [vmem:[%s5446_s30] ss:$0 sm:$0xff] }
0x1524   : >> { %v5438_v63 = vmul.f32 %v8615_v13, %v10624_v41  ;;  %7997 = vmatpush3.bf16.msra.mxu1 %v7994_v38 }
0x1526   : >> { %v8617_v4 = vpop.eup %8616  ;;  %7631 = vmatmul.mubr.msk.f32.gmra.mrb[92].mxu0 %vm1017_vm0, %v5438_v63 }
0x1527   : >> { %7633 = vmatprep.mubr.msk.f32.mxu0 %vm1017_vm0, %v5439_v27  ;;  %v5440_v28 = vmul.f32 %v8617_v4, %v10633_v10 }
0x152a   : >> { %7634 = vmatmul.mubr.msk.f32.gmra.mrb[94].mxu0 %vm1017_vm0, %v5440_v28 }
0x15ed   : >> { %v7626_v41 = vpop.f32.mrb[88].mxu0 }
0x15ee   : >> { %v5550_v47 = vadd.f32 %v7626_v41, %v6784_v58  ;;  %v5544_v48 = vpop.f32.mrb[89].mxu0  ;;  %v6053_v41 = vld [vmem:[%s10875_s23 + $0x10] sm:$0xff] (%p1005_p4) }
0x15ef   : >> { %v5545_v35 = vadd.f32 %v6784_v58, %v5544_v48 }
0x15f0   : >> { %v5584_v25 = vmax.f32 %v5550_v47, 0.0  ;;  %v6054_v47 = vld [vmem:[%s10875_s23 + $0x18] sm:$0xff] (%p1005_p4) }
0x15f1   : >> { %v5583_v12 = vmax.f32 %v5545_v35, 0.0  ;;  %v8018_v48 = vpack.c.bf16 (%p1005_p4), %v6054_v47, %v6053_v41 }
0x15f3   : >> { %7668 = vmatprep.mubr.f32.mxu1 %v5583_v12  ;;  %8019 = vmatprep.subr.bf16.mxu0 (%p1005_p4), %v8018_v48 }
0x15f4   : >> { %7669 = vmatmul.mubr.f32.vlgmr.msra.gmra.mrb[74].mxu1 %v5584_v25  ;;  %8021 = vmatpush3.bf16.msra.mxu0 (%p1005_p4), %v8018_v48 }
0x15f5   : >> { %v7629_v10 = vpop.f32.mrb[90].mxu0 }
0x15f6   : >> { %v5560_v11 = vadd.f32 %v7629_v10, %v6784_v58  ;;  %v5554_v37 = vpop.f32.mrb[91].mxu0 }
0x15f7   : >> { %v5555_v24 = vadd.f32 %v6784_v58, %v5554_v37 }
0x15f8   : >> { %v5586_v26 = vmax.f32 %v5560_v11, 0.0 }
0x15f9   : >> { %v5585_v52 = vmax.f32 %v5555_v24, 0.0  ;;  %v7632_v7 = vpop.f32.mrb[92].mxu0 }
0x15fa   : >> { %v5570_v30 = vadd.f32 %v7632_v7, %v6784_v58  ;;  %v5564_v36 = vpop.f32.mrb[93].mxu0 }
0x15fb   : >> { %v5565_v50 = vadd.f32 %v6784_v58, %v5564_v36  ;;  %7671 = vmatprep.mubr.f32.mxu1 %v5585_v52 }
0x15fc   : >> { %7672 = vmatmul.mubr.f32.gmra.mrb[76].mxu1 %v5586_v26  ;;  %v5588_v6 = vmax.f32 %v5570_v30, 0.0 }
0x15fd   : >> { %v5587_v59 = vmax.f32 %v5565_v50, 0.0  ;;  %v7635_v61 = vpop.f32.mrb[94].mxu0 }
0x15fe   : >> { %v5580_v45 = vadd.f32 %v7635_v61, %v6784_v58  ;;  %v5574_v9 = vpop.f32.mrb[95].mxu0 }
0x15ff   : >> { %v5575_v15 = vadd.f32 %v6784_v58, %v5574_v9  ;;  %7674 = vmatprep.mubr.f32.mxu1 %v5587_v59 }
0x1600   : >> { %7675 = vmatmul.mubr.f32.gmra.mrb[78].mxu1 %v5588_v6  ;;  %v5590_v40 = vmax.f32 %v5580_v45, 0.0 }
0x1601   : >> { %v5589_v31 = vmax.f32 %v5575_v15, 0.0 }
0x1603   : >> { %7677 = vmatprep.mubr.f32.mxu1 %v5589_v31 }
0x1604   : >> { %7678 = vmatmul.mubr.f32.gmra.mrb[80].mxu1 %v5590_v40 }
0x16c7   : >> { %v7670_v19 = vpop.f32.mrb[74].mxu1 }
0x16c8   : >> { %v5715_v14 = vadd.f32 %v7670_v19, %v10553_v18  ;;  %v5675_v32 = vpop.f32.mrb[75].mxu1 }
0x16c9   : >> { %v5714_v20 = vadd.f32 %v5675_v32, %v10556_v3 }
0x16ca   : >> { %v5731_v16 = vadd.f32 %v6794_v0, %v5715_v14  }
0x16cb   : >> { %v5730_v56 = vadd.f32 %v6794_v0, %v5714_v20  }
0x16cd   : > { %7688 = vmatprep.mubr.msk.f32.mxu1 (%p1005_p4), %vm1017_vm0, %v5730_v56 }
0x16cf   : >> { %v7673_v23 = vpop.f32.mrb[76].mxu1 }
0x16d0   : >> { %v5717_v17 = vadd.f32 %v7673_v23, %v10566_v39  ;;  %v5685_v8 = vpop.f32.mrb[77].mxu1 }
0x16d1   : >> { %v5716_v49 = vadd.f32 %v5685_v8, %v10563_v44  ;;  %v5738_v44 = vld [vmem:[%s10871_s19] sm:$0xff] (%p1005_p4) }
0x16d2   : >> { %v5733_v33 = vadd.f32 %v6794_v0, %v5717_v17  }
0x16d3   : >> { %v5732_v57 = vadd.f32 %v6794_v0, %v5716_v49   ;;  %v7676_v5 = vpop.f32.mrb[78].mxu1 }
0x16d4   : >> { %v5719_v13 = vadd.f32 %v7676_v5, %v10576_v34  ;;  %v5695_v27 = vpop.f32.mrb[79].mxu1  ;;  %v10987_v7 = vmov %v5733_v33  ;;  %v10989_v5 = vmov %v5731_v16  ;;  %v5740_v34 = vld [vmem:[%s10871_s19 + $0x10] sm:$0xff] (%p1005_p4) }
0x16d5   : >> { %v5718_v63 = vadd.f32 %v5695_v27, %v10571_v21  ;;  %v10988_v6 = vmov %v5732_v57  ;;  %v5739_v21 = vld [vmem:[%s10871_s19 + $0x8] sm:$0xff] (%p1005_p4)  ;;  %v6804_v7 = vld [vmem:[%s10874_s22] ss:$0 sm:$0xff] (%p1005_p4) }
0x16d6   : >> { %v5735_v18 = vadd.f32 %v6794_v0, %v5719_v13  }
0x16d7   : >> { %v5734_v28 = vadd.f32 %v6794_v0, %v5718_v63   ;;  %v7679_v4 = vpop.f32.mrb[80].mxu1  ;;  %1007 = sbr.rel (!%p1005_p4) target bundleno = 185 (0xb9), region = 191 }
0x16d8   : >> { %v5721_v3 = vadd.f32 %v7679_v4, %v10584_v22  ;;  %v5705_v1 = vpop.f32.mrb[81].mxu1  ;;  %v10985_v9 = vmov %v5735_v18  ;;  %v10990_v4 = vmov %v5730_v56  ;;  %v5741_v22 = vld [vmem:[%s10871_s19 + $0x18] sm:$0xff] (%p1005_p4) }
0x16d9   : >> { %v5720_v2 = vadd.f32 %v5705_v1, %v10581_v29  ;;  %v10986_v8 = vmov %v5734_v28  ;;  %v7998_v29 = vpack.c.bf16 (%p1005_p4), %v5739_v21, %v5738_v44  ;;  %v8002_v58 = vpack.c.bf16 (%p1005_p4), %v5741_v22, %v5740_v34 }
0x16da   : >> { %v5737_v39 = vadd.f32 %v6794_v0, %v5721_v3  }
0x16db   : >> { %v5736_v38 = vadd.f32 %v6794_v0, %v5720_v2   ;;  %7999 = vmatprep.subr.bf16.mxu1 (%p1005_p4), %v7998_v29 }
0x16dc   : >> { %v10983_v11 = vmov %v5737_v39  ;;  %8001 = vmatpush3.bf16.msra.mxu1 (%p1005_p4), %v7998_v29 }
0x16dd   : >> { %v10984_v10 = vmov %v5736_v38  ;;  %8003 = vmatprep.subr.bf16.mxu1 (%p1005_p4), %v8002_v58 }
0x16e0   : > { %8005 = vmatpush3.bf16.msra.mxu1 %v8002_v58 }
0x16e1   : > { %8007 = vmatprep.subr.bf16.mxu1 %v8006_v60 }
0x16e3   : > { %7689 = vmatmul.mubr.msk.f32.vlgmr.msra.gmra.mrb[0].mxu1 %vm1017_vm0, %v5731_v16 }
0x16e4   : > { %8009 = vmatpush3.bf16.msra.mxu1 %v8006_v60  ;;  %7691 = vmatprep.mubr.msk.f32.mxu1 %vm1017_vm0, %v5732_v57 }
0x16e5   : > { %8011 = vmatprep.subr.bf16.mxu1 %v8010_v55 }
0x16e7   : > { %7692 = vmatmul.mubr.msk.f32.gmra.mrb[2].mxu1 %vm1017_vm0, %v5733_v33 }
0x16e8   : > { %7694 = vmatprep.mubr.msk.f32.mxu1 %vm1017_vm0, %v5734_v28  ;;  %8013 = vmatpush3.bf16.msra.mxu1 %v8010_v55 }
0x16eb   : > { %7695 = vmatmul.mubr.msk.f32.gmra.mrb[4].mxu1 %vm1017_vm0, %v5735_v18 }
0x16ec   : > { %7697 = vmatprep.mubr.msk.f32.mxu1 %vm1017_vm0, %v5736_v38 }
0x16ef   : > { %7698 = vmatmul.mubr.msk.f32.gmra.mrb[6].mxu1 %vm1017_vm0, %v5737_v39 }
0x16f0   : > { %7708 = vmatprep.mubr.msk.f32.mxu1 %vm1017_vm0, %v5730_v56 }
0x16f3   : > { %7709 = vmatmul.mubr.msk.f32.vlgmr.msra.gmra.mrb[8].mxu1 %vm1017_vm0, %v5731_v16 }
0x16f4   : > { %7711 = vmatprep.mubr.msk.f32.mxu1 %vm1017_vm0, %v5732_v57 }
0x16f7   : > { %7712 = vmatmul.mubr.msk.f32.gmra.mrb[10].mxu1 %vm1017_vm0, %v5733_v33 }
0x16f8   : > { %7714 = vmatprep.mubr.msk.f32.mxu1 %vm1017_vm0, %v5734_v28 }
0x16fb   : > { %7715 = vmatmul.mubr.msk.f32.gmra.mrb[12].mxu1 %vm1017_vm0, %v5735_v18 }
0x16fc   : > { %7717 = vmatprep.mubr.msk.f32.mxu1 %vm1017_vm0, %v5736_v38 }
0x16ff   : > { %7718 = vmatmul.mubr.msk.f32.gmra.mrb[14].mxu1 %vm1017_vm0, %v5737_v39 }
0x17b6   : > { %v10769_v35 = vpop.f32.mrb[0].mxu1 }
0x17b7   : > { %v10771_v12 = vpop.f32.mrb[1].mxu1 }
0x17ba   : > { %v10773_v25 = vpop.f32.mrb[2].mxu1 }
0x17bb   : > { %v10775_v10 = vpop.f32.mrb[3].mxu1 }
0x17be   : > { %v10777_v11 = vpop.f32.mrb[4].mxu1 }
0x17bf   : > { %v10779_v37 = vpop.f32.mrb[5].mxu1 }
0x17c2   : > { %v10781_v24 = vpop.f32.mrb[6].mxu1 }
0x17c3   : > { %v10783_v52 = vpop.f32.mrb[7].mxu1 }
0x17c6   : > { %v7710_v26 = vpop.f32.mrb[8].mxu1 }
0x17c7   : > { %v5962_v30 = vadd.f32 %v7710_v26, %v6804_v7  ;;  %v5956_v36 = vpop.f32.mrb[9].mxu1  ;;  %v6247_v26 = vld [vmem:[%s10877_s25] sm:$0xff] }
0x17c8   : > { %v5957_v50 = vadd.f32 %v6804_v7, %v5956_v36 }
0x17c9   : > { %v6814_v59 = vmul.f32 -1.442695, %v5962_v30 }
0x17ca   : > { %v6813_v61 = vmul.f32 -1.442695, %v5957_v50  ;;  %v7713_v6 = vpop.f32.mrb[10].mxu1 }
0x17cb   : > { %8618 = vpow2.f32 %v6814_v59  ;;  %v5972_v45 = vadd.f32 %v7713_v6, %v6804_v7  ;;  %v5966_v9 = vpop.f32.mrb[11].mxu1  ;;  %v6250_v59 = vld [vmem:[%s10877_s25 + $0x18] sm:$0xff]  ;;  %v6821_v6 = vld [vmem:[%s10991_s6] ss:$0 sm:$0xff] }
0x17cc   : > { %8620 = vpow2.f32 %v6813_v61  ;;  %v5967_v15 = vadd.f32 %v6804_v7, %v5966_v9 }
0x17cd   : > { %v6816_v31 = vmul.f32 -1.442695, %v5972_v45 }
0x17ce   : > { %v6815_v40 = vmul.f32 -1.442695, %v5967_v15  ;;  %v7716_v19 = vpop.f32.mrb[12].mxu1 }
0x17cf   : > { %8622 = vpow2.f32 %v6816_v31  ;;  %v5982_v0 = vadd.f32 %v7716_v19, %v6804_v7  ;;  %v5976_v14 = vpop.f32.mrb[13].mxu1 }
0x17d0   : > { %8624 = vpow2.f32 %v6815_v40  ;;  %v5977_v32 = vadd.f32 %v6804_v7, %v5976_v14 }
0x17d1   : > { %v6818_v20 = vmul.f32 -1.442695, %v5982_v0 }
0x17d2   : > { %v6817_v16 = vmul.f32 -1.442695, %v5977_v32  ;;  %v7719_v56 = vpop.f32.mrb[14].mxu1 }
0x17d3   : > { %8626 = vpow2.f32 %v6818_v20  ;;  %v5992_v23 = vadd.f32 %v7719_v56, %v6804_v7  ;;  %v5986_v17 = vpop.f32.mrb[15].mxu1 }
0x17d4   : > { %8628 = vpow2.f32 %v6817_v16  ;;  %v5987_v8 = vadd.f32 %v6804_v7, %v5986_v17 }
0x17d5   : > { %v8619_v49 = vpop.eup %8618  ;;  %v6820_v33 = vmul.f32 -1.442695, %v5992_v23 }
0x17d6   : > { %v8621_v57 = vpop.eup %8620  ;;  %v6020_v5 = vadd.f32 1.0, %v8619_v49  ;;  %v6819_v13 = vmul.f32 -1.442695, %v5987_v8 }
0x17d7   : > { %v6019_v27 = vadd.f32 1.0, %v8621_v57  ;;  %8630 = vpow2.f32 %v6820_v33 }
0x17d8   : > { %8632 = vrcp.f32 %v6020_v5 }
0x17d9   : > { %v8623_v63 = vpop.eup %8622  ;;  %8634 = vrcp.f32 %v6019_v27 }
0x17da   : > { %v8625_v18 = vpop.eup %8624  ;;  %v6022_v28 = vadd.f32 1.0, %v8623_v63  ;;  %8636 = vpow2.f32 %v6819_v13 }
0x17db   : > { %v6021_v4 = vadd.f32 1.0, %v8625_v18 }
0x17dc   : > { %8638 = vrcp.f32 %v6022_v28 }
0x17dd   : > { %v8627_v3 = vpop.eup %8626  ;;  %8640 = vrcp.f32 %v6021_v4 }
0x17de   : > { %v8629_v1 = vpop.eup %8628  ;;  %v6024_v2 = vadd.f32 1.0, %v8627_v3 }
0x17df   : > { %v6023_v39 = vadd.f32 1.0, %v8629_v1 }
0x17e0   : > { %8642 = vrcp.f32 %v6024_v2 }
0x17e1   : > { %v8631_v38 = vpop.eup %8630  ;;  %8644 = vrcp.f32 %v6023_v39 }
0x17e2   : > { %v8633_v44 = vpop.eup %8632  ;;  %v6026_v21 = vadd.f32 1.0, %v8631_v38 }
0x17e3   : > { %v8635_v34 = vpop.eup %8634  ;;  %v6044_v58 = vmul.f32 %v8633_v44, %v5962_v30  ;;  %v6248_v30 = vld [vmem:[%s10877_s25 + $0x8] sm:$0xff] }
0x17e4   : > { %v8637_v29 = vpop.eup %8636  ;;  %v6043_v22 = vmul.f32 %v8635_v34, %v5957_v50  ;;  %8646 = vrcp.f32 %v6026_v21  ;;  %v8022_v36 = vpack.c.bf16 %v6248_v30, %v6247_v26  ;;  %v6249_v50 = vld [vmem:[%s10877_s25 + $0x10] sm:$0xff] }
0x17e5   : > { %v6025_v46 = vadd.f32 1.0, %v8637_v29  ;;  %v8026_v61 = vpack.c.bf16 %v6250_v59, %v6249_v50 }
0x17e6   : > { %v8639_v51 = vpop.eup %8638  ;;  %7728 = vmatprep.mubr.msk.f32.mxu0 %vm1017_vm0, %v6043_v22  ;;  %8023 = vmatprep.subr.bf16.mxu0 %v8022_v36 }
0x17e7   : > { %v8641_v60 = vpop.eup %8640  ;;  %8648 = vrcp.f32 %v6025_v46  ;;  %7729 = vmatmul.mubr.msk.f32.vlgmr.msra.gmra.mrb[0].mxu0 %vm1017_vm0, %v6044_v58  ;;  %v6046_v43 = vmul.f32 %v8639_v51, %v5972_v45 }
0x17e8   : > { %v6045_v62 = vmul.f32 %v8641_v60, %v5967_v15  ;;  %8025 = vmatpush3.bf16.msra.mxu0 %v8022_v36 }
0x17e9   : > { %8027 = vmatprep.subr.bf16.mxu0 %v8026_v61 }
0x17ea   : > { %v8643_v55 = vpop.eup %8642  ;;  %7731 = vmatprep.mubr.msk.f32.mxu0 %vm1017_vm0, %v6045_v62 }
0x17eb   : > { %v8645_v42 = vpop.eup %8644  ;;  %7732 = vmatmul.mubr.msk.f32.gmra.mrb[2].mxu0 %vm1017_vm0, %v6046_v43  ;;  %v6048_v53 = vmul.f32 %v8643_v55, %v5982_v0 }
0x17ec   : > { %v6047_v54 = vmul.f32 %v8645_v42, %v5977_v32  ;;  %8029 = vmatpush3.bf16.msra.mxu0 %v8026_v61 }
0x17ee   : > { %7734 = vmatprep.mubr.msk.f32.mxu0 %vm1017_vm0, %v6047_v54  ;;  %v8647_v41 = vpop.eup %8646 }
0x17ef   : > { %7735 = vmatmul.mubr.msk.f32.gmra.mrb[4].mxu0 %vm1017_vm0, %v6048_v53  ;;  %v6050_v7 = vmul.f32 %v8647_v41, %v5992_v23 }
0x17f1   : > { %v8649_v47 = vpop.eup %8648 }
0x17f2   : > { %v6049_v48 = vmul.f32 %v8649_v47, %v5987_v8 }
0x17f4   : > { %7737 = vmatprep.mubr.msk.f32.mxu0 %vm1017_vm0, %v6049_v48 }
0x17f5   : > { %7738 = vmatmul.mubr.msk.f32.gmra.mrb[6].mxu0 %vm1017_vm0, %v6050_v7 }
0x18ba   : > { %v7730_v45 = vpop.f32.mrb[0].mxu0 }
0x18bb   : > { %v6158_v9 = vadd.f32 %v7730_v45, %v6821_v6  ;;  %v6152_v15 = vpop.f32.mrb[1].mxu0  ;;  %v6795_v45 = vld [vmem:[%s10992_s5] ss:$0 sm:$0xff] }
0x18bc   : > { %v6153_v31 = vadd.f32 %v6821_v6, %v6152_v15  ;;  %v5856_v15 = vadd.f32 %v10773_v25, %v6795_v45  ;;  %v5861_v25 = vadd.f32 %v6795_v45, %v10779_v37 }
0x18bd   : > { %v6831_v40 = vmul.f32 -1.442695, %v6158_v9 }
0x18be   : > { %v6830_v19 = vmul.f32 -1.442695, %v6153_v31  ;;  %v7733_v0 = vpop.f32.mrb[2].mxu0 }
0x18bf   : > { %8650 = vpow2.f32 %v6831_v40  ;;  %v6168_v14 = vadd.f32 %v7733_v0, %v6821_v6  ;;  %v6162_v32 = vpop.f32.mrb[3].mxu0  ;;  %v5851_v40 = vadd.f32 %v6795_v45, %v10775_v10  ;;  %v6838_v0 = vld [vmem:[%s10993_s4] ss:$0 sm:$0xff] }
0x18c0   : > { %8652 = vpow2.f32 %v6830_v19  ;;  %v6163_v20 = vadd.f32 %v6821_v6, %v6162_v32  ;;  %v8046_v37 = vadd.f32 %v6838_v0, %v5861_v25 }
0x18c1   : > { %v6833_v16 = vmul.f32 -1.442695, %v6168_v14  ;;  %v8040_v10 = vadd.f32 %v6838_v0, %v5851_v40 }
0x18c2   : > { %v6832_v56 = vmul.f32 -1.442695, %v6163_v20  ;;  %v7736_v23 = vpop.f32.mrb[4].mxu0 }
0x18c3   : > { %8654 = vpow2.f32 %v6833_v16  ;;  %v6178_v17 = vadd.f32 %v7736_v23, %v6821_v6  ;;  %v6172_v8 = vpop.f32.mrb[5].mxu0 }
0x18c4   : > { %8656 = vpow2.f32 %v6832_v56  ;;  %v6173_v49 = vadd.f32 %v6821_v6, %v6172_v8  ;;  %v8037_v56 = vadd.f32 %v6838_v0, %v5856_v15 }
0x18c5   : > { %v6835_v33 = vmul.f32 -1.442695, %v6178_v17 }
0x18c6   : > { %v6834_v57 = vmul.f32 -1.442695, %v6173_v49 }
0x18c7   : > { %8658 = vpow2.f32 %v6835_v33 }
0x18c8   : > { %8660 = vpow2.f32 %v6834_v57  ;;  %v7739_v5 = vpop.f32.mrb[6].mxu0 }
0x18c9   : > { %v8651_v13 = vpop.eup %8650  ;;  %v6188_v27 = vadd.f32 %v7739_v5, %v6821_v6  ;;  %v6182_v63 = vpop.f32.mrb[7].mxu0 }
0x18ca   : > { %v8653_v18 = vpop.eup %8652  ;;  %v6216_v28 = vadd.f32 1.0, %v8651_v13  ;;  %v6183_v4 = vadd.f32 %v6821_v6, %v6182_v63  ;;  %v5876_v13 = vadd.f32 %v10781_v24, %v6795_v45  ;;  %v5871_v63 = vadd.f32 %v6795_v45, %v10783_v52 }
0x18cb   : > { %v6215_v3 = vadd.f32 1.0, %v8653_v18  ;;  %v6837_v1 = vmul.f32 -1.442695, %v6188_v27 }
0x18cc   : > { %8662 = vrcp.f32 %v6216_v28  ;;  %v6836_v2 = vmul.f32 -1.442695, %v6183_v4  ;;  %v8049_v18 = vadd.f32 %v6838_v0, %v5876_v13 }
0x18cd   : > { %v8655_v39 = vpop.eup %8654  ;;  %8664 = vrcp.f32 %v6215_v3 }
0x18ce   : > { %v8657_v38 = vpop.eup %8656  ;;  %v6218_v44 = vadd.f32 1.0, %v8655_v39  ;;  %8666 = vpow2.f32 %v6837_v1 }
0x18cf   : > { %v6217_v21 = vadd.f32 1.0, %v8657_v38  ;;  %8668 = vpow2.f32 %v6836_v2 }
0x18d0   : > { %8670 = vrcp.f32 %v6218_v44 }
0x18d1   : > { %v8659_v34 = vpop.eup %8658  ;;  %8672 = vrcp.f32 %v6217_v21 }
0x18d2   : > { %v8661_v29 = vpop.eup %8660  ;;  %v6220_v22 = vadd.f32 1.0, %v8659_v34 }
0x18d3   : > { %v6219_v58 = vadd.f32 1.0, %v8661_v29 }
0x18d4   : > { %8674 = vrcp.f32 %v6220_v22 }
0x18d5   : > { %8676 = vrcp.f32 %v6219_v58 }
0x18d6   : > { %v8663_v46 = vpop.eup %8662 }
0x18d7   : > { %v8665_v51 = vpop.eup %8664  ;;  %v6240_v55 = vmul.f32 %v8663_v46, %v6158_v9  ;;  %v5846_v9 = vadd.f32 %v10769_v35, %v6795_v45  ;;  %v5866_v35 = vadd.f32 %v10777_v11, %v6795_v45 }
0x18d8   : > { %v8667_v60 = vpop.eup %8666  ;;  %v6239_v62 = vmul.f32 %v8665_v51, %v6153_v31  ;;  %v5841_v31 = vadd.f32 %v6795_v45, %v10771_v12 }
0x18d9   : > { %v8669_v43 = vpop.eup %8668  ;;  %v6222_v42 = vadd.f32 1.0, %v8667_v60  ;;  %v8043_v33 = vadd.f32 %v6838_v0, %v5866_v35 }
0x18da   : > { %v8671_v54 = vpop.eup %8670  ;;  %v6221_v53 = vadd.f32 1.0, %v8669_v43  ;;  %7748 = vmatprep.mubr.msk.f32.mxu0 %vm1017_vm0, %v6239_v62 }
0x18db   : > { %v8673_v41 = vpop.eup %8672  ;;  %8678 = vrcp.f32 %v6222_v42  ;;  %7749 = vmatmul.mubr.msk.f32.vlgmr.msra.gmra.mrb[8].mxu0 %vm1017_vm0, %v6240_v55  ;;  %v6242_v48 = vmul.f32 %v8671_v54, %v6168_v14 }
0x18dc   : > { %v6241_v47 = vmul.f32 %v8673_v41, %v6163_v20  ;;  %8680 = vrcp.f32 %v6221_v53 }
0x18de   : > { %v8675_v7 = vpop.eup %8674  ;;  %7751 = vmatprep.mubr.msk.f32.mxu0 %vm1017_vm0, %v6241_v47 }
0x18df   : > { %v8677_v26 = vpop.eup %8676  ;;  %7752 = vmatmul.mubr.msk.f32.gmra.mrb[10].mxu0 %vm1017_vm0, %v6242_v48  ;;  %v6244_v36 = vmul.f32 %v8675_v7, %v6178_v17 }
0x18e0   : > { %v6243_v30 = vmul.f32 %v8677_v26, %v6173_v49 }
0x18e2   : > { %7754 = vmatprep.mubr.msk.f32.mxu0 %vm1017_vm0, %v6243_v30 }
0x18e3   : > { %7755 = vmatmul.mubr.msk.f32.gmra.mrb[12].mxu0 %vm1017_vm0, %v6244_v36 }
0x18e5   : > { %v8679_v50 = vpop.eup %8678 }
0x18e6   : > { %v8681_v59 = vpop.eup %8680  ;;  %v6246_v6 = vmul.f32 %v8679_v50, %v6188_v27 }
0x18e7   : > { %v6245_v61 = vmul.f32 %v8681_v59, %v6183_v4  ;;  %v8052_v4 = vadd.f32 %v6838_v0, %v5871_v63 }
0x18e9   : > { %7757 = vmatprep.mubr.msk.f32.mxu0 %vm1017_vm0, %v6245_v61 }
0x18ea   : > { %7758 = vmatmul.mubr.msk.f32.gmra.mrb[14].mxu0 %vm1017_vm0, %v6246_v6 }
0x19ae   : > { %v7750_v19 = vpop.f32.mrb[8].mxu0 }
0x19af   : > { %v8031_v14 = vadd.f32 %v7750_v19, %v5846_v9  ;;  %v6348_v32 = vpop.f32.mrb[9].mxu0 }
0x19b0   : > { %v8034_v20 = vadd.f32 %v6348_v32, %v5841_v31 }
0x19b1   : > { %v8032_v16 = vadd.f32 %v8031_v14, %v6838_v0 }
0x19b2   : > { %v8035_v12 = vadd.f32 %v8034_v20, %v6838_v0  ;;  %v7753_v23 = vpop.f32.mrb[10].mxu0 }
0x19b3   : > { %6397 = vst.msk [vmem:[%s8941_s3 + $0x8] sm:$0xff] %vm1297_vm1, %v8032_v16  ;;  %v8038_v17 = vadd.f32 %v8037_v56, %v7753_v23  ;;  %v6358_v8 = vpop.f32.mrb[11].mxu0 }
0x19b4   : > { %6396 = vst.msk [vmem:[%s8941_s3] sm:$0xff] %vm1297_vm1, %v8035_v12  ;;  %v8041_v49 = vadd.f32 %v8040_v10, %v6358_v8 }
0x19b5   : > { %6399 = vst.msk [vmem:[%s8941_s3 + $0x18] sm:$0xff] %vm1297_vm1, %v8038_v17 }
0x19b6   : > { %6398 = vst.msk [vmem:[%s8941_s3 + $0x10] sm:$0xff] %vm1297_vm1, %v8041_v49  ;;  %v7756_v11 = vpop.f32.mrb[12].mxu0 }
0x19b7   : > { %v8044_v57 = vadd.f32 %v8043_v33, %v7756_v11  ;;  %v6368_v5 = vpop.f32.mrb[13].mxu0 }
0x19b8   : > { %v8047_v27 = vadd.f32 %v8046_v37, %v6368_v5 }
0x19b9   : > { %6401 = vst.msk [vmem:[%s8941_s3 + $0x28] sm:$0xff] %vm1297_vm1, %v8044_v57 }
0x19ba   : > { %6400 = vst.msk [vmem:[%s8941_s3 + $0x20] sm:$0xff] %vm1297_vm1, %v8047_v27 }
0x19bd   : > { %v7759_v28 = vpop.f32.mrb[14].mxu0 }
0x19be   : > { %v8050_v3 = vadd.f32 %v8049_v18, %v7759_v28  ;;  %v6378_v1 = vpop.f32.mrb[15].mxu0 }
0x19bf   : > { %v8053_v2 = vadd.f32 %v8052_v4, %v6378_v1 }
0x19c0   : > { %6403 = vst.msk [vmem:[%s8941_s3 + $0x38] sm:$0xff] %vm1297_vm1, %v8050_v3 }
0x19c1   : > { %6402 = vst.msk [vmem:[%s8941_s3 + $0x30] sm:$0xff] %vm1297_vm1, %v8053_v2 }
0x19c2 PF: > { %s10994_s20 = sld [smem:[#allocation2_spill]] }
0x19c8   : > { %s37_s7 = sadd.s32 1, %s10994_s20  }
0x19c9   : > { %p34_p5 = scmp.ge.s32.totalorder %s37_s7, 4  }
0x19cb   :  { %36 = sbr.rel (!%p34_p5) target bundleno = 16 (0x10), region = 202 }

</bundles_post_ra>
